<compile_context>
chip_gen: v6e
topology: v6e:2x2x1
jax: 0.10.0
libtpu: 0.0.40
codegen_flags: <defaults>
</compile_context>

<pallas_src>
import math
import jax
import jax.numpy as jnp
from jax import lax
from jax.experimental import pallas as pl
from jax.experimental.pallas import tpu as pltpu

# ---------------- config (small, consistent with the module's shape conventions) ----
B = 2              # batch
L = 8              # n_max_seq / seq_len
D_MODEL = 32
N_HEAD = 4
D_K = 8
D_V = 8
D_INNER = 2 * D_MODEL       # d_inner_hid = 2 * d_model (as in __init__)
N_LAYERS = 2
VOCAB = 16
PAD = 0
EPS = 1e-6
G = N_HEAD * B              # fused (head, batch) leading batch dim, g = h * B + b

# Matmul-input dtype. Flip to jnp.bfloat16 for scaled configs (see header note).
MATMUL_DTYPE = jnp.float32

# packed "small vector" rows (all shape (1, D_MODEL)): bo, ln1_g, ln1_b, b2, ln2_g, ln2_b
VEC_BO, VEC_G1, VEC_BE1, VEC_B2, VEC_G2, VEC_BE2 = range(6)


# ---------------------- Pallas kernel: full encoder, one invocation -----------------
def encoder_kernel(x_ref, bias_ref,
                   wq_ref, wk_ref, wv_ref, wo_ref, w1_ref, w2_ref, b1_ref, vecs_ref,
                   out_ref):
    x = x_ref[...]                   # (B, L, D)   activations, stay in vregs all layers
    bias = bias_ref[...]             # (G, 1, L)   additive key-padding bias (0 / -1e9)

    def layer_norm(z, g, b):
        mu = jnp.mean(z, axis=-1, keepdims=True)
        var = jnp.mean((z - mu) ** 2, axis=-1, keepdims=True)
        return (z - mu) * lax.rsqrt(var + EPS) * g + b

    # Static unroll over layers (N_LAYERS == 2). TODO(synk): for deeper stacks move the
    # layer axis into a grid axis / lax.fori_loop to bound vreg live ranges.
    for li in range(N_LAYERS):
        wq = wq_ref[li]              # (G, D, Dk)   Q part pre-scaled by 1/sqrt(Dk)
        wk = wk_ref[li]              # (G, D, Dk)
        wv = wv_ref[li]              # (G, D, Dv)
        wo = wo_ref[li]              # (G, Dv, D)
        w1 = w1_ref[li]              # (D, D_INNER)
        w2 = w2_ref[li]              # (D_INNER, D)
        b1 = b1_ref[li]              # (1, D_INNER)
        vecs = vecs_ref[li]          # (6, D)
        bo = vecs[VEC_BO:VEC_BO + 1]
        g1 = vecs[VEC_G1:VEC_G1 + 1]
        be1 = vecs[VEC_BE1:VEC_BE1 + 1]
        b2 = vecs[VEC_B2:VEC_B2 + 1]
        g2 = vecs[VEC_G2:VEC_G2 + 1]
        be2 = vecs[VEC_BE2:VEC_BE2 + 1]

        xm = x.astype(MATMUL_DTYPE)
        # Replicate activations along the head axis (leading-dim whole-tile copies) so
        # every attention matmul is one dot with a single leading batch dim G = H*B.
        xg = jnp.concatenate([xm] * N_HEAD, axis=0)                      # (G, L, D)

        # ---- multi-head self attention: head-batched dots, no per-head loop --------
        q = jnp.einsum('gld,gdk->glk', xg, wq, preferred_element_type=jnp.float32)
        k = jnp.einsum('gld,gdk->glk', xg, wk, preferred_element_type=jnp.float32)
        v = jnp.einsum('gld,gdk->glk', xg, wv, preferred_element_type=jnp.float32)

        s = jnp.einsum('gqd,gkd->gqk', q.astype(MATMUL_DTYPE), k.astype(MATMUL_DTYPE),
                       preferred_element_type=jnp.float32)               # (G, L, L)
        s = s + bias                                                     # mask PAD keys
        m = jnp.max(s, axis=-1, keepdims=True)
        e = jnp.exp(s - m)
        p = e / jnp.sum(e, axis=-1, keepdims=True)                       # exact softmax

        heads = jnp.einsum('gqk,gkd->gqd', p.astype(MATMUL_DTYPE), v.astype(MATMUL_DTYPE),
                           preferred_element_type=jnp.float32)           # (G, L, Dv)
        proj = jnp.einsum('gqd,gdm->gqm', heads.astype(MATMUL_DTYPE), wo,
                          preferred_element_type=jnp.float32)            # (G, L, D)
        # Reduce over heads (== concat heads then project); leading-axis slices are
        # whole-tile views, so this is plain vector adds, no lane shuffles.
        attn = proj[0:B]
        for h in range(1, N_HEAD):
            attn = attn + proj[h * B:(h + 1) * B]
        attn = attn + bo                                                 # (B, L, D)

        y = layer_norm(attn + x, g1, be1)                                # residual + LN

        # ---- position-wise feed forward (Conv1d k=1 == Linear), batch folded in rows
        y2d = y.reshape(B * L, D_MODEL).astype(MATMUL_DTYPE)
        hdn = jnp.maximum(
            jnp.dot(y2d, w1, preferred_element_type=jnp.float32) + b1, 0.0)
        ffn = jnp.dot(hdn.astype(MATMUL_DTYPE), w2,
                      preferred_element_type=jnp.float32) + b2
        x = layer_norm(ffn.reshape(B, L, D_MODEL) + y, g2, be2)          # residual + LN

    # Lane-dense store: 256-wide rows (2 x 128 lanes) -> unmasked vst.
    out_ref[...] = x.reshape(B, L * D_MODEL)


def run_encoder(x, attn_bias_g, packed):
    wq, wk, wv, wo, w1, w2, b1, vecs = packed
    vmem = lambda: pl.BlockSpec(memory_space=pltpu.MemorySpace.VMEM)
    out_flat = pl.pallas_call(
        encoder_kernel,
        out_shape=jax.ShapeDtypeStruct((B, L * D_MODEL), jnp.float32),
        in_specs=[vmem() for _ in range(10)],
        out_specs=vmem(),
    )(x, attn_bias_g, wq, wk, wv, wo, w1, w2, b1, vecs)
    return out_flat.reshape(B, L, D_MODEL)


# ---------------------- plain-JAX glue: embedder, mask, weight packing --------------
def position_encoding_init(n_position, d_model):
    pos = jnp.arange(n_position, dtype=jnp.float32)[:, None]
    dim = jnp.arange(d_model, dtype=jnp.float32)[None, :]
    angle = pos / jnp.power(10000.0, 2.0 * jnp.floor(dim / 2.0) / d_model)
    pe = jnp.where((jnp.arange(d_model) % 2 == 0)[None, :], jnp.sin(angle), jnp.cos(angle))
    return pe.at[0].set(0.0)                         # PAD position row is zero


def make_params(key):
    """Deterministic synthetic weights mirroring the PyTorch module's shapes."""
    keys = jax.random.split(key, 1 + N_LAYERS)
    word_emb = 0.1 * jax.random.normal(keys[0], (VOCAB, D_MODEL), jnp.float32)
    word_emb = word_emb.at[PAD].set(0.0)             # padding_idx row
    pos_enc = position_encoding_init(L + 1, D_MODEL)

    layers = []
    for li in range(N_LAYERS):
        ks = jax.random.split(keys[1 + li], 13)
        sqk = 1.0 / math.sqrt(D_MODEL + D_K)
        sv = 1.0 / math.sqrt(D_MODEL + D_V)
        layers.append((
            math.sqrt(2.0) * sqk * jax.random.normal(ks[0], (N_HEAD, D_MODEL, D_K)),  # wq
            math.sqrt(2.0) * sqk * jax.random.normal(ks[1], (N_HEAD, D_MODEL, D_K)),  # wk
            math.sqrt(2.0) * sv * jax.random.normal(ks[2], (N_HEAD, D_MODEL, D_V)),   # wv
            0.1 * jax.random.normal(ks[3], (N_HEAD, D_V, D_MODEL)),                   # wo
            0.05 * jax.random.normal(ks[4], (1, D_MODEL)),                            # bo
            1.0 + 0.05 * jax.random.normal(ks[5], (1, D_MODEL)),                      # ln1 g
            0.05 * jax.random.normal(ks[6], (1, D_MODEL)),                            # ln1 b
            0.1 * jax.random.normal(ks[7], (D_MODEL, D_INNER)),                       # w1
            0.05 * jax.random.normal(ks[8], (1, D_INNER)),                            # b1
            0.1 * jax.random.normal(ks[9], (D_INNER, D_MODEL)),                       # w2
            0.05 * jax.random.normal(ks[10], (1, D_MODEL)),                           # b2
            1.0 + 0.05 * jax.random.normal(ks[11], (1, D_MODEL)),                     # ln2 g
            0.05 * jax.random.normal(ks[12], (1, D_MODEL)),                           # ln2 b
        ))
    return word_emb, pos_enc, layers


def pack_layers(layers):
    """Stack per-layer weights along a leading layer axis and expand the attention
    weights to the (G, ...) = (head*batch, ...) layout the kernel's batched dots consume
    directly (g = h * B + b). 1/sqrt(d_k) is folded into Wq at pack time."""
    inv_sqrt_dk = 1.0 / math.sqrt(D_K)
    wq_l, wk_l, wv_l, wo_l, w1_l, w2_l, b1_l, vecs_l = ([] for _ in range(8))
    for (wq, wk, wv, wo, bo, g1, be1, w1, b1, w2, b2, g2, be2) in layers:
        wq_l.append(jnp.repeat(wq * inv_sqrt_dk, B, axis=0))    # (G, D, Dk)
        wk_l.append(jnp.repeat(wk, B, axis=0))                  # (G, D, Dk)
        wv_l.append(jnp.repeat(wv, B, axis=0))                  # (G, D, Dv)
        wo_l.append(jnp.repeat(wo, B, axis=0))                  # (G, Dv, D)
        w1_l.append(w1)
        w2_l.append(w2)
        b1_l.append(b1)
        vecs_l.append(jnp.concatenate([bo, g1, be1, b2, g2, be2], axis=0))  # (6, D)
    stack_mm = lambda a: jnp.stack(a).astype(MATMUL_DTYPE)
    return (stack_mm(wq_l), stack_mm(wk_l), stack_mm(wv_l), stack_mm(wo_l),
            stack_mm(w1_l), stack_mm(w2_l),
            jnp.stack(b1_l).astype(jnp.float32),
            jnp.stack(vecs_l).astype(jnp.float32))


def transformer_encoder(src_seq, word_emb, pos_enc, layers):
    # Embedder: token embedding + positional encoding (positions 1..L, 0 at PAD).
    positions = jnp.where(src_seq == PAD, 0,
                          jnp.arange(1, L + 1, dtype=jnp.int32)[None, :])
    enc_input = (word_emb[src_seq] + pos_enc[positions]).astype(jnp.float32)   # (B,L,D)
    # get_attn_padding_mask as an additive key bias (-1e9 at PAD keys), expanded to the
    # fused (head*batch) leading dim used by the kernel's batched attention dots.
    attn_bias = jnp.where(src_seq == PAD, -1e9, 0.0).astype(jnp.float32)[:, None, :]
    attn_bias_g = jnp.tile(attn_bias, (N_HEAD, 1, 1))                          # (G,1,L)
    packed = pack_layers(layers)
    return run_encoder(enc_input, attn_bias_g, packed)


# ---------------------- pure-JAX reference (for the correctness check) --------------
def reference_encoder(src_seq, word_emb, pos_enc, layers):
    positions = jnp.where(src_seq == PAD, 0,
                          jnp.arange(1, L + 1, dtype=jnp.int32)[None, :])
    x = (word_emb[src_seq] + pos_enc[positions]).astype(jnp.float32)
    pad = (src_seq == PAD)[:, None, :]                                  # (B, 1, L_k)
    hi = lax.Precision.HIGHEST                                          # true-f32 reference

    def ln(z, g, b):
        mu = jnp.mean(z, -1, keepdims=True)
        var = jnp.mean((z - mu) ** 2, -1, keepdims=True)
        return (z - mu) / jnp.sqrt(var + EPS) * g + b

    for (wq, wk, wv, wo, bo, g1, be1, w1, bb1, w2, bb2, g2, be2) in layers:
        q = jnp.einsum('bld,hdk->bhlk', x, wq, precision=hi)
        k = jnp.einsum('bld,hdk->bhlk', x, wk, precision=hi)
        v = jnp.einsum('bld,hdk->bhlk', x, wv, precision=hi)
        s = jnp.einsum('bhqk,bhjk->bhqj', q, k, precision=hi) / math.sqrt(D_K)
        s = jnp.where(pad[:, None, :, :], -1e9, s)
        p = jax.nn.softmax(s, axis=-1)
        heads = jnp.einsum('bhqj,bhjk->bhqk', p, v, precision=hi)
        attn = jnp.einsum('bhqk,hkd->bqd', heads, wo, precision=hi) + bo
        y = ln(attn + x, g1, be1)
        hdn = jnp.maximum(jnp.einsum('bld,de->ble', y, w1, precision=hi) + bb1, 0.0)
        ffn = jnp.einsum('ble,ed->bld', hdn, w2, precision=hi) + bb2
        x = ln(ffn + y, g2, be2)
    return x


if __name__ == "__main__":
    key = jax.random.PRNGKey(0)
    k_tok, k_par = jax.random.split(key)
    # token ids in [1, VOCAB); pad the tail of sequence 1 to exercise the attention mask
    src_seq = jax.random.randint(k_tok, (B, L), 1, VOCAB, dtype=jnp.int32)
    src_seq = src_seq.at[1, L - 2:].set(PAD)

    word_emb, pos_enc, layers = make_params(k_par)

    out = transformer_encoder(src_seq, word_emb, pos_enc, layers)
    out = jax.block_until_ready(out)
    assert out.shape == (B, L, D_MODEL)
    assert bool(jnp.all(jnp.isfinite(out)))

    ref = reference_encoder(src_seq, word_emb, pos_enc, layers)
    # f32 matmul path (default): kernel and reference typically agree to <1e-4; 1e-3
    # leaves margin for the MXU's multi-pass f32 emulation. The bf16 scaling knob needs
    # the looser tolerance (bf16 MXU inputs), which is why it is off for this check.
    tol = 1e-3 if MATMUL_DTYPE == jnp.float32 else 5e-2
    assert jnp.allclose(out, ref, atol=tol, rtol=tol), "mismatch vs JAX reference"

    print("KERNEL_OK")
</pallas_src>

<mosaic_0001>
module attributes {stable_mosaic.version = 11 : i64} {
  func.func @encoder_kernel(%arg0: memref<2x8x32xf32, #tpu.memory_space<vmem>>, %arg1: memref<8x1x8xf32, #tpu.memory_space<vmem>>, %arg2: memref<2x8x32x8xf32, #tpu.memory_space<vmem>>, %arg3: memref<2x8x32x8xf32, #tpu.memory_space<vmem>>, %arg4: memref<2x8x32x8xf32, #tpu.memory_space<vmem>>, %arg5: memref<2x8x8x32xf32, #tpu.memory_space<vmem>>, %arg6: memref<2x32x64xf32, #tpu.memory_space<vmem>>, %arg7: memref<2x64x32xf32, #tpu.memory_space<vmem>>, %arg8: memref<2x1x64xf32, #tpu.memory_space<vmem>>, %arg9: memref<2x6x32xf32, #tpu.memory_space<vmem>>, %arg10: memref<2x256xf32, #tpu.memory_space<vmem>>) attributes {dimension_semantics = [], scalar_prefetch = 0 : i64, scratch_operands = 0 : i64, tpu.core_type = #tpu.core_type<tc>} {
    %c0 = arith.constant 0 : index
    %c0_0 = arith.constant 0 : index
    %c0_1 = arith.constant 0 : index
    %0 = vector.load %arg0[%c0, %c0_0, %c0_1] : memref<2x8x32xf32, #tpu.memory_space<vmem>>, vector<2x8x32xf32>
    %c0_2 = arith.constant 0 : index
    %c0_3 = arith.constant 0 : index
    %c0_4 = arith.constant 0 : index
    %1 = vector.load %arg1[%c0_2, %c0_3, %c0_4] : memref<8x1x8xf32, #tpu.memory_space<vmem>>, vector<8x1x8xf32>
    %c0_5 = arith.constant 0 : index
    %c0_6 = arith.constant 0 : index
    %c0_7 = arith.constant 0 : index
    %c0_8 = arith.constant 0 : index
    %2 = vector.load %arg2[%c0_5, %c0_6, %c0_7, %c0_8] : memref<2x8x32x8xf32, #tpu.memory_space<vmem>>, vector<1x8x32x8xf32>
    %3 = vector.shape_cast %2 : vector<1x8x32x8xf32> to vector<8x32x8xf32>
    %c0_9 = arith.constant 0 : index
    %c0_10 = arith.constant 0 : index
    %c0_11 = arith.constant 0 : index
    %c0_12 = arith.constant 0 : index
    %4 = vector.load %arg3[%c0_9, %c0_10, %c0_11, %c0_12] : memref<2x8x32x8xf32, #tpu.memory_space<vmem>>, vector<1x8x32x8xf32>
    %5 = vector.shape_cast %4 : vector<1x8x32x8xf32> to vector<8x32x8xf32>
    %c0_13 = arith.constant 0 : index
    %c0_14 = arith.constant 0 : index
    %c0_15 = arith.constant 0 : index
    %c0_16 = arith.constant 0 : index
    %6 = vector.load %arg4[%c0_13, %c0_14, %c0_15, %c0_16] : memref<2x8x32x8xf32, #tpu.memory_space<vmem>>, vector<1x8x32x8xf32>
    %7 = vector.shape_cast %6 : vector<1x8x32x8xf32> to vector<8x32x8xf32>
    %c0_17 = arith.constant 0 : index
    %c0_18 = arith.constant 0 : index
    %c0_19 = arith.constant 0 : index
    %c0_20 = arith.constant 0 : index
    %8 = vector.load %arg5[%c0_17, %c0_18, %c0_19, %c0_20] : memref<2x8x8x32xf32, #tpu.memory_space<vmem>>, vector<1x8x8x32xf32>
    %9 = vector.shape_cast %8 : vector<1x8x8x32xf32> to vector<8x8x32xf32>
    %c0_21 = arith.constant 0 : index
    %c0_22 = arith.constant 0 : index
    %c0_23 = arith.constant 0 : index
    %10 = vector.load %arg6[%c0_21, %c0_22, %c0_23] : memref<2x32x64xf32, #tpu.memory_space<vmem>>, vector<1x32x64xf32>
    %11 = vector.shape_cast %10 : vector<1x32x64xf32> to vector<32x64xf32>
    %c0_24 = arith.constant 0 : index
    %c0_25 = arith.constant 0 : index
    %c0_26 = arith.constant 0 : index
    %12 = vector.load %arg7[%c0_24, %c0_25, %c0_26] : memref<2x64x32xf32, #tpu.memory_space<vmem>>, vector<1x64x32xf32>
    %13 = vector.shape_cast %12 : vector<1x64x32xf32> to vector<64x32xf32>
    %c0_27 = arith.constant 0 : index
    %c0_28 = arith.constant 0 : index
    %c0_29 = arith.constant 0 : index
    %14 = vector.load %arg8[%c0_27, %c0_28, %c0_29] : memref<2x1x64xf32, #tpu.memory_space<vmem>>, vector<1x1x64xf32>
    %15 = vector.shape_cast %14 : vector<1x1x64xf32> to vector<1x64xf32>
    %c0_30 = arith.constant 0 : index
    %c0_31 = arith.constant 0 : index
    %c0_32 = arith.constant 0 : index
    %16 = vector.load %arg9[%c0_30, %c0_31, %c0_32] : memref<2x6x32xf32, #tpu.memory_space<vmem>>, vector<1x6x32xf32>
    %17 = vector.shape_cast %16 : vector<1x6x32xf32> to vector<6x32xf32>
    %18 = vector.extract_strided_slice %17 {offsets = [0, 0], sizes = [1, 32], strides = [1, 1]} : vector<6x32xf32> to vector<1x32xf32>
    %19 = vector.extract_strided_slice %17 {offsets = [1, 0], sizes = [1, 32], strides = [1, 1]} : vector<6x32xf32> to vector<1x32xf32>
    %20 = vector.extract_strided_slice %17 {offsets = [2, 0], sizes = [1, 32], strides = [1, 1]} : vector<6x32xf32> to vector<1x32xf32>
    %21 = vector.extract_strided_slice %17 {offsets = [3, 0], sizes = [1, 32], strides = [1, 1]} : vector<6x32xf32> to vector<1x32xf32>
    %22 = vector.extract_strided_slice %17 {offsets = [4, 0], sizes = [1, 32], strides = [1, 1]} : vector<6x32xf32> to vector<1x32xf32>
    %23 = vector.extract_strided_slice %17 {offsets = [5, 0], sizes = [1, 32], strides = [1, 1]} : vector<6x32xf32> to vector<1x32xf32>
    %24 = tpu.concatenate %0, %0, %0, %0 in 0 : vector<2x8x32xf32>, vector<2x8x32xf32>, vector<2x8x32xf32>, vector<2x8x32xf32> -> vector<8x8x32xf32>
    "tpu.trace_start"() <{level = 10 : i32, message = "gld,gdk->glk"}> : () -> ()
    %cst = arith.constant dense<0.000000e+00> : vector<8x8x8xf32>
    %25 = tpu.matmul %24, %3, %cst {dimension_numbers = #tpu.dot_dimension_numbers<[2], [1], [1], [2], [0, 0, 0, 1, 1, 2], [0], [0]>} : vector<8x8x32xf32>, vector<8x32x8xf32>, vector<8x8x8xf32> -> vector<8x8x8xf32>
    %cst_33 = arith.constant dense<0.000000e+00> : vector<8x8x8xf32>
    %26 = tpu.matmul %24, %5, %cst_33 {dimension_numbers = #tpu.dot_dimension_numbers<[2], [1], [1], [2], [0, 0, 0, 1, 1, 2], [0], [0]>} : vector<8x8x32xf32>, vector<8x32x8xf32>, vector<8x8x8xf32> -> vector<8x8x8xf32>
    %cst_34 = arith.constant dense<0.000000e+00> : vector<8x8x8xf32>
    %27 = tpu.matmul %24, %7, %cst_34 {dimension_numbers = #tpu.dot_dimension_numbers<[2], [1], [1], [2], [0, 0, 0, 1, 1, 2], [0], [0]>} : vector<8x8x32xf32>, vector<8x32x8xf32>, vector<8x8x8xf32> -> vector<8x8x8xf32>
    "tpu.trace_stop"() : () -> ()
    "tpu.trace_start"() <{level = 10 : i32, message = "gqd,gkd->gqk"}> : () -> ()
    %cst_35 = arith.constant dense<0.000000e+00> : vector<8x8x8xf32>
    %28 = tpu.matmul %25, %26, %cst_35 {dimension_numbers = #tpu.dot_dimension_numbers<[2], [2], [1], [1], [0, 0, 0, 1, 1, 1], [0], [0]>} : vector<8x8x8xf32>, vector<8x8x8xf32>, vector<8x8x8xf32> -> vector<8x8x8xf32>
    "tpu.trace_stop"() : () -> ()
    %29 = vector.broadcast %1 : vector<8x1x8xf32> to vector<8x8x8xf32>
    %30 = arith.addf %28, %29 : vector<8x8x8xf32>
    %cst_36 = arith.constant dense<0xFF800000> : vector<8x8xf32>
    %31 = vector.multi_reduction <maximumf>, %30, %cst_36 [2] : vector<8x8x8xf32> to vector<8x8xf32>
    %32 = vector.shape_cast %31 : vector<8x8xf32> to vector<8x8x1xf32>
    %33 = vector.broadcast %32 : vector<8x8x1xf32> to vector<8x8x8xf32>
    %34 = arith.subf %30, %33 : vector<8x8x8xf32>
    %35 = math.exp %34 : vector<8x8x8xf32>
    %cst_37 = arith.constant dense<0.000000e+00> : vector<8x8xf32>
    %36 = vector.multi_reduction <add>, %35, %cst_37 [2] : vector<8x8x8xf32> to vector<8x8xf32>
    %37 = vector.shape_cast %36 : vector<8x8xf32> to vector<8x8x1xf32>
    %38 = vector.broadcast %37 : vector<8x8x1xf32> to vector<8x8x8xf32>
    %39 = arith.divf %35, %38 : vector<8x8x8xf32>
    "tpu.trace_start"() <{level = 10 : i32, message = "gqk,gkd->gqd"}> : () -> ()
    %cst_38 = arith.constant dense<0.000000e+00> : vector<8x8x8xf32>
    %40 = tpu.matmul %39, %27, %cst_38 {dimension_numbers = #tpu.dot_dimension_numbers<[2], [1], [1], [2], [0, 0, 0, 1, 1, 2], [0], [0]>} : vector<8x8x8xf32>, vector<8x8x8xf32>, vector<8x8x8xf32> -> vector<8x8x8xf32>
    "tpu.trace_stop"() : () -> ()
    "tpu.trace_start"() <{level = 10 : i32, message = "gqd,gdm->gqm"}> : () -> ()
    %cst_39 = arith.constant dense<0.000000e+00> : vector<8x8x32xf32>
    %41 = tpu.matmul %40, %9, %cst_39 {dimension_numbers = #tpu.dot_dimension_numbers<[2], [1], [1], [2], [0, 0, 0, 1, 1, 2], [0], [0]>} : vector<8x8x8xf32>, vector<8x8x32xf32>, vector<8x8x32xf32> -> vector<8x8x32xf32>
    "tpu.trace_stop"() : () -> ()
    %42 = vector.extract_strided_slice %41 {offsets = [0, 0, 0], sizes = [2, 8, 32], strides = [1, 1, 1]} : vector<8x8x32xf32> to vector<2x8x32xf32>
    %43 = vector.extract_strided_slice %41 {offsets = [2, 0, 0], sizes = [2, 8, 32], strides = [1, 1, 1]} : vector<8x8x32xf32> to vector<2x8x32xf32>
    %44 = arith.addf %42, %43 : vector<2x8x32xf32>
    %45 = vector.extract_strided_slice %41 {offsets = [4, 0, 0], sizes = [2, 8, 32], strides = [1, 1, 1]} : vector<8x8x32xf32> to vector<2x8x32xf32>
    %46 = arith.addf %44, %45 : vector<2x8x32xf32>
    %47 = vector.extract_strided_slice %41 {offsets = [6, 0, 0], sizes = [2, 8, 32], strides = [1, 1, 1]} : vector<8x8x32xf32> to vector<2x8x32xf32>
    %48 = arith.addf %46, %47 : vector<2x8x32xf32>
    %49 = vector.shape_cast %18 : vector<1x32xf32> to vector<1x1x32xf32>
    %50 = vector.broadcast %49 : vector<1x1x32xf32> to vector<2x8x32xf32>
    %51 = arith.addf %48, %50 : vector<2x8x32xf32>
    %52 = arith.addf %51, %0 : vector<2x8x32xf32>
    %cst_40 = arith.constant dense<0.000000e+00> : vector<2x8xf32>
    %53 = vector.multi_reduction <add>, %52, %cst_40 [2] : vector<2x8x32xf32> to vector<2x8xf32>
    %54 = vector.shape_cast %53 : vector<2x8xf32> to vector<2x8x1xf32>
    %cst_41 = arith.constant 3.200000e+01 : f32
    %55 = vector.broadcast %cst_41 : f32 to vector<2x8x1xf32>
    %56 = arith.divf %54, %55 : vector<2x8x1xf32>
    %57 = vector.broadcast %56 : vector<2x8x1xf32> to vector<2x8x32xf32>
    %58 = arith.subf %52, %57 : vector<2x8x32xf32>
    %59 = arith.mulf %58, %58 : vector<2x8x32xf32>
    %cst_42 = arith.constant dense<0.000000e+00> : vector<2x8xf32>
    %60 = vector.multi_reduction <add>, %59, %cst_42 [2] : vector<2x8x32xf32> to vector<2x8xf32>
    %61 = vector.shape_cast %60 : vector<2x8xf32> to vector<2x8x1xf32>
    %cst_43 = arith.constant 3.200000e+01 : f32
    %62 = vector.broadcast %cst_43 : f32 to vector<2x8x1xf32>
    %63 = arith.divf %61, %62 : vector<2x8x1xf32>
    %64 = vector.broadcast %56 : vector<2x8x1xf32> to vector<2x8x32xf32>
    %65 = arith.subf %52, %64 : vector<2x8x32xf32>
    %cst_44 = arith.constant 9.99999997E-7 : f32
    %66 = vector.broadcast %cst_44 : f32 to vector<2x8x1xf32>
    %67 = arith.addf %63, %66 : vector<2x8x1xf32>
    %68 = math.rsqrt %67 : vector<2x8x1xf32>
    %69 = vector.broadcast %68 : vector<2x8x1xf32> to vector<2x8x32xf32>
    %70 = arith.mulf %65, %69 : vector<2x8x32xf32>
    %71 = vector.shape_cast %19 : vector<1x32xf32> to vector<1x1x32xf32>
    %72 = vector.broadcast %71 : vector<1x1x32xf32> to vector<2x8x32xf32>
    %73 = arith.mulf %70, %72 : vector<2x8x32xf32>
    %74 = vector.shape_cast %20 : vector<1x32xf32> to vector<1x1x32xf32>
    %75 = vector.broadcast %74 : vector<1x1x32xf32> to vector<2x8x32xf32>
    %76 = arith.addf %73, %75 : vector<2x8x32xf32>
    %77 = vector.shape_cast %76 : vector<2x8x32xf32> to vector<16x32xf32>
    %cst_45 = arith.constant dense<0.000000e+00> : vector<16x64xf32>
    %78 = tpu.matmul %77, %11, %cst_45 {dimension_numbers = #tpu.dot_dimension_numbers<[1], [0], [0], [1], [0, 0, 1, 1], [], []>} : vector<16x32xf32>, vector<32x64xf32>, vector<16x64xf32> -> vector<16x64xf32>
    %79 = vector.broadcast %15 : vector<1x64xf32> to vector<16x64xf32>
    %80 = arith.addf %78, %79 : vector<16x64xf32>
    %cst_46 = arith.constant 0.000000e+00 : f32
    %81 = vector.broadcast %cst_46 : f32 to vector<16x64xf32>
    %82 = arith.maximumf %80, %81 : vector<16x64xf32>
    %cst_47 = arith.constant dense<0.000000e+00> : vector<16x32xf32>
    %83 = tpu.matmul %82, %13, %cst_47 {dimension_numbers = #tpu.dot_dimension_numbers<[1], [0], [0], [1], [0, 0, 1, 1], [], []>} : vector<16x64xf32>, vector<64x32xf32>, vector<16x32xf32> -> vector<16x32xf32>
    %84 = vector.broadcast %21 : vector<1x32xf32> to vector<16x32xf32>
    %85 = arith.addf %83, %84 : vector<16x32xf32>
    %86 = vector.shape_cast %85 : vector<16x32xf32> to vector<2x8x32xf32>
    %87 = arith.addf %86, %76 : vector<2x8x32xf32>
    %cst_48 = arith.constant dense<0.000000e+00> : vector<2x8xf32>
    %88 = vector.multi_reduction <add>, %87, %cst_48 [2] : vector<2x8x32xf32> to vector<2x8xf32>
    %89 = vector.shape_cast %88 : vector<2x8xf32> to vector<2x8x1xf32>
    %cst_49 = arith.constant 3.200000e+01 : f32
    %90 = vector.broadcast %cst_49 : f32 to vector<2x8x1xf32>
    %91 = arith.divf %89, %90 : vector<2x8x1xf32>
    %92 = vector.broadcast %91 : vector<2x8x1xf32> to vector<2x8x32xf32>
    %93 = arith.subf %87, %92 : vector<2x8x32xf32>
    %94 = arith.mulf %93, %93 : vector<2x8x32xf32>
    %cst_50 = arith.constant dense<0.000000e+00> : vector<2x8xf32>
    %95 = vector.multi_reduction <add>, %94, %cst_50 [2] : vector<2x8x32xf32> to vector<2x8xf32>
    %96 = vector.shape_cast %95 : vector<2x8xf32> to vector<2x8x1xf32>
    %cst_51 = arith.constant 3.200000e+01 : f32
    %97 = vector.broadcast %cst_51 : f32 to vector<2x8x1xf32>
    %98 = arith.divf %96, %97 : vector<2x8x1xf32>
    %99 = vector.broadcast %91 : vector<2x8x1xf32> to vector<2x8x32xf32>
    %100 = arith.subf %87, %99 : vector<2x8x32xf32>
    %cst_52 = arith.constant 9.99999997E-7 : f32
    %101 = vector.broadcast %cst_52 : f32 to vector<2x8x1xf32>
    %102 = arith.addf %98, %101 : vector<2x8x1xf32>
    %103 = math.rsqrt %102 : vector<2x8x1xf32>
    %104 = vector.broadcast %103 : vector<2x8x1xf32> to vector<2x8x32xf32>
    %105 = arith.mulf %100, %104 : vector<2x8x32xf32>
    %106 = vector.shape_cast %22 : vector<1x32xf32> to vector<1x1x32xf32>
    %107 = vector.broadcast %106 : vector<1x1x32xf32> to vector<2x8x32xf32>
    %108 = arith.mulf %105, %107 : vector<2x8x32xf32>
    %109 = vector.shape_cast %23 : vector<1x32xf32> to vector<1x1x32xf32>
    %110 = vector.broadcast %109 : vector<1x1x32xf32> to vector<2x8x32xf32>
    %111 = arith.addf %108, %110 : vector<2x8x32xf32>
    %c1 = arith.constant 1 : index
    %c0_53 = arith.constant 0 : index
    %c0_54 = arith.constant 0 : index
    %c0_55 = arith.constant 0 : index
    %112 = vector.load %arg2[%c1, %c0_53, %c0_54, %c0_55] : memref<2x8x32x8xf32, #tpu.memory_space<vmem>>, vector<1x8x32x8xf32>
    %113 = vector.shape_cast %112 : vector<1x8x32x8xf32> to vector<8x32x8xf32>
    %c1_56 = arith.constant 1 : index
    %c0_57 = arith.constant 0 : index
    %c0_58 = arith.constant 0 : index
    %c0_59 = arith.constant 0 : index
    %114 = vector.load %arg3[%c1_56, %c0_57, %c0_58, %c0_59] : memref<2x8x32x8xf32, #tpu.memory_space<vmem>>, vector<1x8x32x8xf32>
    %115 = vector.shape_cast %114 : vector<1x8x32x8xf32> to vector<8x32x8xf32>
    %c1_60 = arith.constant 1 : index
    %c0_61 = arith.constant 0 : index
    %c0_62 = arith.constant 0 : index
    %c0_63 = arith.constant 0 : index
    %116 = vector.load %arg4[%c1_60, %c0_61, %c0_62, %c0_63] : memref<2x8x32x8xf32, #tpu.memory_space<vmem>>, vector<1x8x32x8xf32>
    %117 = vector.shape_cast %116 : vector<1x8x32x8xf32> to vector<8x32x8xf32>
    %c1_64 = arith.constant 1 : index
    %c0_65 = arith.constant 0 : index
    %c0_66 = arith.constant 0 : index
    %c0_67 = arith.constant 0 : index
    %118 = vector.load %arg5[%c1_64, %c0_65, %c0_66, %c0_67] : memref<2x8x8x32xf32, #tpu.memory_space<vmem>>, vector<1x8x8x32xf32>
    %119 = vector.shape_cast %118 : vector<1x8x8x32xf32> to vector<8x8x32xf32>
    %c1_68 = arith.constant 1 : index
    %c0_69 = arith.constant 0 : index
    %c0_70 = arith.constant 0 : index
    %120 = vector.load %arg6[%c1_68, %c0_69, %c0_70] : memref<2x32x64xf32, #tpu.memory_space<vmem>>, vector<1x32x64xf32>
    %121 = vector.shape_cast %120 : vector<1x32x64xf32> to vector<32x64xf32>
    %c1_71 = arith.constant 1 : index
    %c0_72 = arith.constant 0 : index
    %c0_73 = arith.constant 0 : index
    %122 = vector.load %arg7[%c1_71, %c0_72, %c0_73] : memref<2x64x32xf32, #tpu.memory_space<vmem>>, vector<1x64x32xf32>
    %123 = vector.shape_cast %122 : vector<1x64x32xf32> to vector<64x32xf32>
    %c1_74 = arith.constant 1 : index
    %c0_75 = arith.constant 0 : index
    %c0_76 = arith.constant 0 : index
    %124 = vector.load %arg8[%c1_74, %c0_75, %c0_76] : memref<2x1x64xf32, #tpu.memory_space<vmem>>, vector<1x1x64xf32>
    %125 = vector.shape_cast %124 : vector<1x1x64xf32> to vector<1x64xf32>
    %c1_77 = arith.constant 1 : index
    %c0_78 = arith.constant 0 : index
    %c0_79 = arith.constant 0 : index
    %126 = vector.load %arg9[%c1_77, %c0_78, %c0_79] : memref<2x6x32xf32, #tpu.memory_space<vmem>>, vector<1x6x32xf32>
    %127 = vector.shape_cast %126 : vector<1x6x32xf32> to vector<6x32xf32>
    %128 = vector.extract_strided_slice %127 {offsets = [0, 0], sizes = [1, 32], strides = [1, 1]} : vector<6x32xf32> to vector<1x32xf32>
    %129 = vector.extract_strided_slice %127 {offsets = [1, 0], sizes = [1, 32], strides = [1, 1]} : vector<6x32xf32> to vector<1x32xf32>
    %130 = vector.extract_strided_slice %127 {offsets = [2, 0], sizes = [1, 32], strides = [1, 1]} : vector<6x32xf32> to vector<1x32xf32>
    %131 = vector.extract_strided_slice %127 {offsets = [3, 0], sizes = [1, 32], strides = [1, 1]} : vector<6x32xf32> to vector<1x32xf32>
    %132 = vector.extract_strided_slice %127 {offsets = [4, 0], sizes = [1, 32], strides = [1, 1]} : vector<6x32xf32> to vector<1x32xf32>
    %133 = vector.extract_strided_slice %127 {offsets = [5, 0], sizes = [1, 32], strides = [1, 1]} : vector<6x32xf32> to vector<1x32xf32>
    %134 = tpu.concatenate %111, %111, %111, %111 in 0 : vector<2x8x32xf32>, vector<2x8x32xf32>, vector<2x8x32xf32>, vector<2x8x32xf32> -> vector<8x8x32xf32>
    "tpu.trace_start"() <{level = 10 : i32, message = "gld,gdk->glk"}> : () -> ()
    %cst_80 = arith.constant dense<0.000000e+00> : vector<8x8x8xf32>
    %135 = tpu.matmul %134, %113, %cst_80 {dimension_numbers = #tpu.dot_dimension_numbers<[2], [1], [1], [2], [0, 0, 0, 1, 1, 2], [0], [0]>} : vector<8x8x32xf32>, vector<8x32x8xf32>, vector<8x8x8xf32> -> vector<8x8x8xf32>
    %cst_81 = arith.constant dense<0.000000e+00> : vector<8x8x8xf32>
    %136 = tpu.matmul %134, %115, %cst_81 {dimension_numbers = #tpu.dot_dimension_numbers<[2], [1], [1], [2], [0, 0, 0, 1, 1, 2], [0], [0]>} : vector<8x8x32xf32>, vector<8x32x8xf32>, vector<8x8x8xf32> -> vector<8x8x8xf32>
    %cst_82 = arith.constant dense<0.000000e+00> : vector<8x8x8xf32>
    %137 = tpu.matmul %134, %117, %cst_82 {dimension_numbers = #tpu.dot_dimension_numbers<[2], [1], [1], [2], [0, 0, 0, 1, 1, 2], [0], [0]>} : vector<8x8x32xf32>, vector<8x32x8xf32>, vector<8x8x8xf32> -> vector<8x8x8xf32>
    "tpu.trace_stop"() : () -> ()
    "tpu.trace_start"() <{level = 10 : i32, message = "gqd,gkd->gqk"}> : () -> ()
    %cst_83 = arith.constant dense<0.000000e+00> : vector<8x8x8xf32>
    %138 = tpu.matmul %135, %136, %cst_83 {dimension_numbers = #tpu.dot_dimension_numbers<[2], [2], [1], [1], [0, 0, 0, 1, 1, 1], [0], [0]>} : vector<8x8x8xf32>, vector<8x8x8xf32>, vector<8x8x8xf32> -> vector<8x8x8xf32>
    "tpu.trace_stop"() : () -> ()
    %139 = vector.broadcast %1 : vector<8x1x8xf32> to vector<8x8x8xf32>
    %140 = arith.addf %138, %139 : vector<8x8x8xf32>
    %cst_84 = arith.constant dense<0xFF800000> : vector<8x8xf32>
    %141 = vector.multi_reduction <maximumf>, %140, %cst_84 [2] : vector<8x8x8xf32> to vector<8x8xf32>
    %142 = vector.shape_cast %141 : vector<8x8xf32> to vector<8x8x1xf32>
    %143 = vector.broadcast %142 : vector<8x8x1xf32> to vector<8x8x8xf32>
    %144 = arith.subf %140, %143 : vector<8x8x8xf32>
    %145 = math.exp %144 : vector<8x8x8xf32>
    %cst_85 = arith.constant dense<0.000000e+00> : vector<8x8xf32>
    %146 = vector.multi_reduction <add>, %145, %cst_85 [2] : vector<8x8x8xf32> to vector<8x8xf32>
    %147 = vector.shape_cast %146 : vector<8x8xf32> to vector<8x8x1xf32>
    %148 = vector.broadcast %147 : vector<8x8x1xf32> to vector<8x8x8xf32>
    %149 = arith.divf %145, %148 : vector<8x8x8xf32>
    "tpu.trace_start"() <{level = 10 : i32, message = "gqk,gkd->gqd"}> : () -> ()
    %cst_86 = arith.constant dense<0.000000e+00> : vector<8x8x8xf32>
    %150 = tpu.matmul %149, %137, %cst_86 {dimension_numbers = #tpu.dot_dimension_numbers<[2], [1], [1], [2], [0, 0, 0, 1, 1, 2], [0], [0]>} : vector<8x8x8xf32>, vector<8x8x8xf32>, vector<8x8x8xf32> -> vector<8x8x8xf32>
    "tpu.trace_stop"() : () -> ()
    "tpu.trace_start"() <{level = 10 : i32, message = "gqd,gdm->gqm"}> : () -> ()
    %cst_87 = arith.constant dense<0.000000e+00> : vector<8x8x32xf32>
    %151 = tpu.matmul %150, %119, %cst_87 {dimension_numbers = #tpu.dot_dimension_numbers<[2], [1], [1], [2], [0, 0, 0, 1, 1, 2], [0], [0]>} : vector<8x8x8xf32>, vector<8x8x32xf32>, vector<8x8x32xf32> -> vector<8x8x32xf32>
    "tpu.trace_stop"() : () -> ()
    %152 = vector.extract_strided_slice %151 {offsets = [0, 0, 0], sizes = [2, 8, 32], strides = [1, 1, 1]} : vector<8x8x32xf32> to vector<2x8x32xf32>
    %153 = vector.extract_strided_slice %151 {offsets = [2, 0, 0], sizes = [2, 8, 32], strides = [1, 1, 1]} : vector<8x8x32xf32> to vector<2x8x32xf32>
    %154 = arith.addf %152, %153 : vector<2x8x32xf32>
    %155 = vector.extract_strided_slice %151 {offsets = [4, 0, 0], sizes = [2, 8, 32], strides = [1, 1, 1]} : vector<8x8x32xf32> to vector<2x8x32xf32>
    %156 = arith.addf %154, %155 : vector<2x8x32xf32>
    %157 = vector.extract_strided_slice %151 {offsets = [6, 0, 0], sizes = [2, 8, 32], strides = [1, 1, 1]} : vector<8x8x32xf32> to vector<2x8x32xf32>
    %158 = arith.addf %156, %157 : vector<2x8x32xf32>
    %159 = vector.shape_cast %128 : vector<1x32xf32> to vector<1x1x32xf32>
    %160 = vector.broadcast %159 : vector<1x1x32xf32> to vector<2x8x32xf32>
    %161 = arith.addf %158, %160 : vector<2x8x32xf32>
    %162 = arith.addf %161, %111 : vector<2x8x32xf32>
    %cst_88 = arith.constant dense<0.000000e+00> : vector<2x8xf32>
    %163 = vector.multi_reduction <add>, %162, %cst_88 [2] : vector<2x8x32xf32> to vector<2x8xf32>
    %164 = vector.shape_cast %163 : vector<2x8xf32> to vector<2x8x1xf32>
    %cst_89 = arith.constant 3.200000e+01 : f32
    %165 = vector.broadcast %cst_89 : f32 to vector<2x8x1xf32>
    %166 = arith.divf %164, %165 : vector<2x8x1xf32>
    %167 = vector.broadcast %166 : vector<2x8x1xf32> to vector<2x8x32xf32>
    %168 = arith.subf %162, %167 : vector<2x8x32xf32>
    %169 = arith.mulf %168, %168 : vector<2x8x32xf32>
    %cst_90 = arith.constant dense<0.000000e+00> : vector<2x8xf32>
    %170 = vector.multi_reduction <add>, %169, %cst_90 [2] : vector<2x8x32xf32> to vector<2x8xf32>
    %171 = vector.shape_cast %170 : vector<2x8xf32> to vector<2x8x1xf32>
    %cst_91 = arith.constant 3.200000e+01 : f32
    %172 = vector.broadcast %cst_91 : f32 to vector<2x8x1xf32>
    %173 = arith.divf %171, %172 : vector<2x8x1xf32>
    %174 = vector.broadcast %166 : vector<2x8x1xf32> to vector<2x8x32xf32>
    %175 = arith.subf %162, %174 : vector<2x8x32xf32>
    %cst_92 = arith.constant 9.99999997E-7 : f32
    %176 = vector.broadcast %cst_92 : f32 to vector<2x8x1xf32>
    %177 = arith.addf %173, %176 : vector<2x8x1xf32>
    %178 = math.rsqrt %177 : vector<2x8x1xf32>
    %179 = vector.broadcast %178 : vector<2x8x1xf32> to vector<2x8x32xf32>
    %180 = arith.mulf %175, %179 : vector<2x8x32xf32>
    %181 = vector.shape_cast %129 : vector<1x32xf32> to vector<1x1x32xf32>
    %182 = vector.broadcast %181 : vector<1x1x32xf32> to vector<2x8x32xf32>
    %183 = arith.mulf %180, %182 : vector<2x8x32xf32>
    %184 = vector.shape_cast %130 : vector<1x32xf32> to vector<1x1x32xf32>
    %185 = vector.broadcast %184 : vector<1x1x32xf32> to vector<2x8x32xf32>
    %186 = arith.addf %183, %185 : vector<2x8x32xf32>
    %187 = vector.shape_cast %186 : vector<2x8x32xf32> to vector<16x32xf32>
    %cst_93 = arith.constant dense<0.000000e+00> : vector<16x64xf32>
    %188 = tpu.matmul %187, %121, %cst_93 {dimension_numbers = #tpu.dot_dimension_numbers<[1], [0], [0], [1], [0, 0, 1, 1], [], []>} : vector<16x32xf32>, vector<32x64xf32>, vector<16x64xf32> -> vector<16x64xf32>
    %189 = vector.broadcast %125 : vector<1x64xf32> to vector<16x64xf32>
    %190 = arith.addf %188, %189 : vector<16x64xf32>
    %cst_94 = arith.constant 0.000000e+00 : f32
    %191 = vector.broadcast %cst_94 : f32 to vector<16x64xf32>
    %192 = arith.maximumf %190, %191 : vector<16x64xf32>
    %cst_95 = arith.constant dense<0.000000e+00> : vector<16x32xf32>
    %193 = tpu.matmul %192, %123, %cst_95 {dimension_numbers = #tpu.dot_dimension_numbers<[1], [0], [0], [1], [0, 0, 1, 1], [], []>} : vector<16x64xf32>, vector<64x32xf32>, vector<16x32xf32> -> vector<16x32xf32>
    %194 = vector.broadcast %131 : vector<1x32xf32> to vector<16x32xf32>
    %195 = arith.addf %193, %194 : vector<16x32xf32>
    %196 = vector.shape_cast %195 : vector<16x32xf32> to vector<2x8x32xf32>
    %197 = arith.addf %196, %186 : vector<2x8x32xf32>
    %cst_96 = arith.constant dense<0.000000e+00> : vector<2x8xf32>
    %198 = vector.multi_reduction <add>, %197, %cst_96 [2] : vector<2x8x32xf32> to vector<2x8xf32>
    %199 = vector.shape_cast %198 : vector<2x8xf32> to vector<2x8x1xf32>
    %cst_97 = arith.constant 3.200000e+01 : f32
    %200 = vector.broadcast %cst_97 : f32 to vector<2x8x1xf32>
    %201 = arith.divf %199, %200 : vector<2x8x1xf32>
    %202 = vector.broadcast %201 : vector<2x8x1xf32> to vector<2x8x32xf32>
    %203 = arith.subf %197, %202 : vector<2x8x32xf32>
    %204 = arith.mulf %203, %203 : vector<2x8x32xf32>
    %cst_98 = arith.constant dense<0.000000e+00> : vector<2x8xf32>
    %205 = vector.multi_reduction <add>, %204, %cst_98 [2] : vector<2x8x32xf32> to vector<2x8xf32>
    %206 = vector.shape_cast %205 : vector<2x8xf32> to vector<2x8x1xf32>
    %cst_99 = arith.constant 3.200000e+01 : f32
    %207 = vector.broadcast %cst_99 : f32 to vector<2x8x1xf32>
    %208 = arith.divf %206, %207 : vector<2x8x1xf32>
    %209 = vector.broadcast %201 : vector<2x8x1xf32> to vector<2x8x32xf32>
    %210 = arith.subf %197, %209 : vector<2x8x32xf32>
    %cst_100 = arith.constant 9.99999997E-7 : f32
    %211 = vector.broadcast %cst_100 : f32 to vector<2x8x1xf32>
    %212 = arith.addf %208, %211 : vector<2x8x1xf32>
    %213 = math.rsqrt %212 : vector<2x8x1xf32>
    %214 = vector.broadcast %213 : vector<2x8x1xf32> to vector<2x8x32xf32>
    %215 = arith.mulf %210, %214 : vector<2x8x32xf32>
    %216 = vector.shape_cast %132 : vector<1x32xf32> to vector<1x1x32xf32>
    %217 = vector.broadcast %216 : vector<1x1x32xf32> to vector<2x8x32xf32>
    %218 = arith.mulf %215, %217 : vector<2x8x32xf32>
    %219 = vector.shape_cast %133 : vector<1x32xf32> to vector<1x1x32xf32>
    %220 = vector.broadcast %219 : vector<1x1x32xf32> to vector<2x8x32xf32>
    %221 = arith.addf %218, %220 : vector<2x8x32xf32>
    %222 = vector.shape_cast %221 : vector<2x8x32xf32> to vector<2x256xf32>
    %c0_101 = arith.constant 0 : index
    %c0_102 = arith.constant 0 : index
    %223 = vector.load %arg10[%c0_101, %c0_102] : memref<2x256xf32, #tpu.memory_space<vmem>>, vector<2x256xf32>
    tpu.vector_store %arg10[%c0_101, %c0_102], %222 {strides = array<i32>} : memref<2x256xf32, #tpu.memory_space<vmem>>, vector<2x256xf32>,
    return
  }
}

</mosaic_0001>

<bundles_post_ra>
// kernel: tpu_custom_call.1
= control target key start
LH: loop header
LB: loop body
LE: loop exit
PB: predicated region body
PF: predicated region fallthrough
CT: control target
= control target key end

     0   :  { %v9662_v2 = vmov 0.0   ;;  %vm164_vm0 = vcmask 261120   ;;  %vm9663_vm1 = vmmov 0   ;;  %s11250_s0 = inlined_call_operand.vmem [shape: f32[2,8,32], index: 0, kind: input, shape index: {}]   ;;  %s11251_s1 = inlined_call_operand.vmem [shape: f32[8,1,8], index: 1, kind: input, shape index: {}]   ;;  %s11252_s2 = inlined_call_operand.vmem [shape: f32[2,8,32,8], index: 2, kind: input, shape index: {}]   ;;  %s11253_s3 = inlined_call_operand.vmem [shape: f32[2,8,32,8], index: 3, kind: input, shape index: {}]   ;;  %s11254_s4 = inlined_call_operand.vmem [shape: f32[2,8,32,8], index: 4, kind: input, shape index: {}]   ;;  %s11255_s5 = inlined_call_operand.vmem [shape: f32[2,8,8,32], index: 5, kind: input, shape index: {}]   ;;  %s11256_s6 = inlined_call_operand.vmem [shape: f32[2,32,64], index: 6, kind: input, shape index: {}]   ;;  %s11257_s7 = inlined_call_operand.vmem [shape: f32[2,64,32], index: 7, kind: input, shape index: {}]   ;;  %s11258_s8 = inlined_call_operand.vmem [shape: f32[2,1,64], index: 8, kind: input, shape index: {}]   ;;  %s11259_s9 = inlined_call_operand.vmem [shape: f32[2,6,32], index: 9, kind: input, shape index: {}]   ;;  %s11260_s10 = inlined_call_operand.hbm [shape: f32[2,256], index: 10, kind: output, shape index: {}]  }
   0x1   :  { %v49_v0 = vld [vmem:[%s11252_s2 + $0x18] sm:$0xff]  ;;  %8714 = vmatprep.subr.mxu0 %v9662_v2  ;;  %8725 = vmatprep.subr.mxu1 %v9662_v2  ;;  %v48_v3 = vld [vmem:[%s11252_s2 + $0x10] sm:$0xff]  ;;  %v47_v5 = vld [vmem:[%s11252_s2 + $0x8] sm:$0xff] }
   0x2   :  { %v53_v1 = vld [vmem:[%s11252_s2 + $0x38] sm:$0xff]  ;;  %v52_v4 = vld [vmem:[%s11252_s2 + $0x30] sm:$0xff]  ;;  %8715 = vmatpush3.msra.mxu0 %v49_v0  ;;  %v51_v6 = vld [vmem:[%s11252_s2 + $0x28] sm:$0xff]  ;;  %8722 = vmatprep.mubr.msk.f32.mxu0 %vm9663_vm1, %v9662_v2 }
   0x3   :  { %8726 = vmatpush3.msra.mxu1 %v53_v1  ;;  %8716 = vmatprep.subr.mxu0 %v9662_v2  ;;  %v46_v7 = vld [vmem:[%s11252_s2] sm:$0xff]  ;;  %v9765_v10 = vld [vmem:[%s11250_s0 + $0x8] sm:$0xff]  ;;  %v57_v11 = vld [vmem:[%s11252_s2 + $0x58] sm:$0xff] }
   0x4   :  { %8727 = vmatprep.subr.mxu1 %v9662_v2  ;;  %8717 = vmatpush3.msra.mxu0 %v48_v3  ;;  %v50_v8 = vld [vmem:[%s11252_s2 + $0x20] sm:$0xff]  ;;  %v61_v12 = vld [vmem:[%s11252_s2 + $0x78] sm:$0xff]  ;;  %v56_v13 = vld [vmem:[%s11252_s2 + $0x50] sm:$0xff] }
   0x5   :  { %8728 = vmatpush3.msra.mxu1 %v52_v4  ;;  %8718 = vmatprep.subr.mxu0 %v9662_v2  ;;  %v9760_v9 = vld [vmem:[%s11250_s0] sm:$0xff]  ;;  %v60_v14 = vld [vmem:[%s11252_s2 + $0x70] sm:$0xff]  ;;  %v55_v15 = vld [vmem:[%s11252_s2 + $0x48] sm:$0xff] }
   0x6   :  { %8729 = vmatprep.subr.mxu1 %v9662_v2  ;;  %8719 = vmatpush3.msra.mxu0 %v47_v5  ;;  %v59_v16 = vld [vmem:[%s11252_s2 + $0x68] sm:$0xff]  ;;  %v54_v17 = vld [vmem:[%s11252_s2 + $0x40] sm:$0xff]  ;;  %v65_v19 = vld [vmem:[%s11252_s2 + $0x98] sm:$0xff] }
   0x7   :  { %8730 = vmatpush3.msra.mxu1 %v51_v6  ;;  %8720 = vmatprep.subr.mxu0 %v9662_v2  ;;  %v58_v18 = vld [vmem:[%s11252_s2 + $0x60] sm:$0xff]  ;;  %v69_v20 = vld [vmem:[%s11252_s2 + $0xb8] sm:$0xff]  ;;  %v64_v21 = vld [vmem:[%s11252_s2 + $0x90] sm:$0xff] }
   0x8   :  { %8731 = vmatprep.subr.mxu1 %v9662_v2  ;;  %8721 = vmatpush3.msra.mxu0 %v46_v7  ;;  %v68_v22 = vld [vmem:[%s11252_s2 + $0xb0] sm:$0xff] }
   0x9   :  { %8732 = vmatpush3.msra.mxu1 %v50_v8  ;;  %8733 = vmatprep.mubr.msk.f32.mxu1 %vm9663_vm1, %v9662_v2 }
   0xa   :  { %8723 = vmatmul.mubr.msk.f32.vlgmr.msra.gmra.mxu0 %vm164_vm0, %v9760_v9  ;;  %8734 = vmatmul.mubr.msk.f32.vlgmr.msra.gmra.mxu1 %vm164_vm0, %v9765_v10 }
   0xb   :  { %8736 = vmatprep.subr.mxu0 %v9662_v2  ;;  %8747 = vmatprep.subr.mxu1 %v9662_v2 }
   0xc   :  { %8737 = vmatpush3.msra.mxu0 %v57_v11  ;;  %8748 = vmatpush3.msra.mxu1 %v61_v12 }
   0xd   :  { %8738 = vmatprep.subr.mxu0 %v9662_v2  ;;  %8749 = vmatprep.subr.mxu1 %v9662_v2 }
   0xe   :  { %8739 = vmatpush3.msra.mxu0 %v56_v13  ;;  %8750 = vmatpush3.msra.mxu1 %v60_v14 }
   0xf   :  { %8740 = vmatprep.subr.mxu0 %v9662_v2  ;;  %8751 = vmatprep.subr.mxu1 %v9662_v2 }
  0x10   :  { %8741 = vmatpush3.msra.mxu0 %v55_v15  ;;  %8752 = vmatpush3.msra.mxu1 %v59_v16 }
  0x11   :  { %8742 = vmatprep.subr.mxu0 %v9662_v2  ;;  %8753 = vmatprep.subr.mxu1 %v9662_v2 }
  0x12   :  { %8743 = vmatpush3.msra.mxu0 %v54_v17  ;;  %8744 = vmatprep.mubr.msk.f32.mxu0 %vm9663_vm1, %v9662_v2 }
  0x13   :  { %8754 = vmatpush3.msra.mxu1 %v58_v18  ;;  %8755 = vmatprep.mubr.msk.f32.mxu1 %vm9663_vm1, %v9662_v2 }
  0x14   :  { %8745 = vmatmul.mubr.msk.f32.vlgmr.msra.gmra.mxu0 %vm164_vm0, %v9760_v9  ;;  %8756 = vmatmul.mubr.msk.f32.vlgmr.msra.gmra.mxu1 %vm164_vm0, %v9765_v10 }
  0x15   :  { %8758 = vmatprep.subr.mxu0 %v9662_v2  ;;  %8769 = vmatprep.subr.mxu1 %v9662_v2 }
  0x16   :  { %8759 = vmatpush3.msra.mxu0 %v65_v19  ;;  %8770 = vmatpush3.msra.mxu1 %v69_v20 }
  0x17   :  { %15 = vsyncpa [#allocation3], 0  ;;  %8760 = vmatprep.subr.mxu0 %v9662_v2  ;;  %8771 = vmatprep.subr.mxu1 %v9662_v2  ;;  %v63_v23 = vld [vmem:[%s11252_s2 + $0x88] sm:$0xff]  ;;  %v62_v25 = vld [vmem:[%s11252_s2 + $0x80] sm:$0xff]  ;;  %vm1899_vm2 = vcmask 64512   ;;  %vm3910_vm3 = vcmask 523264  }
  0x18   :  { %v67_v24 = vld [vmem:[%s11252_s2 + $0xa8] sm:$0xff]  ;;  %8761 = vmatpush3.msra.mxu0 %v64_v21  ;;  %8772 = vmatpush3.msra.mxu1 %v68_v22  ;;  %v66_v26 = vld [vmem:[%s11252_s2 + $0xa0] sm:$0xff]  ;;  %v73_v27 = vld [vmem:[%s11252_s2 + $0xd8] sm:$0xff]  ;;  %vm8066_vm4 = vcmask 785408   ;;  %s9669_s11 = smov [#allocation2]  }
  0x19   :  { %8762 = vmatprep.subr.mxu0 %v9662_v2  ;;  %8773 = vmatprep.subr.mxu1 %v9662_v2  ;;  %v77_v28 = vld [vmem:[%s11252_s2 + $0xf8] sm:$0xff]  ;;  %v72_v29 = vld [vmem:[%s11252_s2 + $0xd0] sm:$0xff]  ;;  %v71_v31 = vld [vmem:[%s11252_s2 + $0xc8] sm:$0xff] }
  0x1a   :  { %8763 = vmatpush3.msra.mxu0 %v63_v23  ;;  %8774 = vmatpush3.msra.mxu1 %v67_v24  ;;  %v76_v30 = vld [vmem:[%s11252_s2 + $0xf0] sm:$0xff]  ;;  %v75_v32 = vld [vmem:[%s11252_s2 + $0xe8] sm:$0xff]  ;;  %v70_v33 = vld [vmem:[%s11252_s2 + $0xc0] sm:$0xff] }
  0x1b   :  { %8764 = vmatprep.subr.mxu0 %v9662_v2  ;;  %8775 = vmatprep.subr.mxu1 %v9662_v2  ;;  %v74_v34 = vld [vmem:[%s11252_s2 + $0xe0] sm:$0xff]  ;;  %v81_v35 = vld [vmem:[%s11253_s3 + $0x18] sm:$0xff]  ;;  %v80_v37 = vld [vmem:[%s11253_s3 + $0x10] sm:$0xff] }
  0x1c   :  { %8765 = vmatpush3.msra.mxu0 %v62_v25  ;;  %8766 = vmatprep.mubr.msk.f32.mxu0 %vm9663_vm1, %v9662_v2  ;;  %v85_v36 = vld [vmem:[%s11253_s3 + $0x38] sm:$0xff]  ;;  %v84_v38 = vld [vmem:[%s11253_s3 + $0x30] sm:$0xff]  ;;  %v79_v39 = vld [vmem:[%s11253_s3 + $0x8] sm:$0xff] }
  0x1d   :  { %8776 = vmatpush3.msra.mxu1 %v66_v26  ;;  %8777 = vmatprep.mubr.msk.f32.mxu1 %vm9663_vm1, %v9662_v2  ;;  %v83_v40 = vld [vmem:[%s11253_s3 + $0x28] sm:$0xff]  ;;  %v78_v41 = vld [vmem:[%s11253_s3] sm:$0xff]  ;;  %v89_v43 = vld [vmem:[%s11253_s3 + $0x58] sm:$0xff] }
  0x1e   :  { %8767 = vmatmul.mubr.msk.f32.vlgmr.msra.gmra.mxu0 %vm164_vm0, %v9760_v9  ;;  %8778 = vmatmul.mubr.msk.f32.vlgmr.msra.gmra.mxu1 %vm164_vm0, %v9765_v10  ;;  %v82_v42 = vld [vmem:[%s11253_s3 + $0x20] sm:$0xff]  ;;  %v93_v44 = vld [vmem:[%s11253_s3 + $0x78] sm:$0xff]  ;;  %v88_v45 = vld [vmem:[%s11253_s3 + $0x50] sm:$0xff] }
  0x1f   :  { %8780 = vmatprep.subr.mxu0 %v9662_v2  ;;  %8791 = vmatprep.subr.mxu1 %v9662_v2  ;;  %v92_v46 = vld [vmem:[%s11253_s3 + $0x70] sm:$0xff]  ;;  %v87_v47 = vld [vmem:[%s11253_s3 + $0x48] sm:$0xff]  ;;  %v86_v49 = vld [vmem:[%s11253_s3 + $0x40] sm:$0xff] }
  0x20   :  { %8781 = vmatpush3.msra.mxu0 %v73_v27  ;;  %8792 = vmatpush3.msra.mxu1 %v77_v28  ;;  %v91_v48 = vld [vmem:[%s11253_s3 + $0x68] sm:$0xff]  ;;  %v90_v50 = vld [vmem:[%s11253_s3 + $0x60] sm:$0xff]  ;;  %v97_v51 = vld [vmem:[%s11253_s3 + $0x98] sm:$0xff] }
  0x21   :  { %8782 = vmatprep.subr.mxu0 %v9662_v2  ;;  %8793 = vmatprep.subr.mxu1 %v9662_v2  ;;  %v101_v52 = vld [vmem:[%s11253_s3 + $0xb8] sm:$0xff]  ;;  %v96_v53 = vld [vmem:[%s11253_s3 + $0x90] sm:$0xff]  ;;  %v95_v55 = vld [vmem:[%s11253_s3 + $0x88] sm:$0xff] }
  0x22   :  { %8783 = vmatpush3.msra.mxu0 %v72_v29  ;;  %8794 = vmatpush3.msra.mxu1 %v76_v30  ;;  %v100_v54 = vld [vmem:[%s11253_s3 + $0xb0] sm:$0xff]  ;;  %v99_v56 = vld [vmem:[%s11253_s3 + $0xa8] sm:$0xff]  ;;  %v94_v57 = vld [vmem:[%s11253_s3 + $0x80] sm:$0xff] }
  0x23   :  { %8784 = vmatprep.subr.mxu0 %v9662_v2  ;;  %8795 = vmatprep.subr.mxu1 %v9662_v2  ;;  %v98_v58 = vld [vmem:[%s11253_s3 + $0xa0] sm:$0xff]  ;;  %v105_v59 = vld [vmem:[%s11253_s3 + $0xd8] sm:$0xff]  ;;  %v104_v61 = vld [vmem:[%s11253_s3 + $0xd0] sm:$0xff] }
  0x24   :  { %8785 = vmatpush3.msra.mxu0 %v71_v31  ;;  %8796 = vmatpush3.msra.mxu1 %v75_v32  ;;  %v109_v60 = vld [vmem:[%s11253_s3 + $0xf8] sm:$0xff]  ;;  %v108_v62 = vld [vmem:[%s11253_s3 + $0xf0] sm:$0xff]  ;;  %v103_v63 = vld [vmem:[%s11253_s3 + $0xc8] sm:$0xff] }
  0x25   :  { %8786 = vmatprep.subr.mxu0 %v9662_v2  ;;  %8797 = vmatprep.subr.mxu1 %v9662_v2  ;;  %v107_v0 = vld [vmem:[%s11253_s3 + $0xe8] sm:$0xff]  ;;  %v102_v1 = vld [vmem:[%s11253_s3 + $0xc0] sm:$0xff]  ;;  %v113_v4 = vld [vmem:[%s11254_s4 + $0x18] sm:$0xff] }
  0x26   :  { %8787 = vmatpush3.msra.mxu0 %v70_v33  ;;  %8788 = vmatprep.mubr.msk.f32.mxu0 %vm9663_vm1, %v9662_v2  ;;  %v106_v3 = vld [vmem:[%s11253_s3 + $0xe0] sm:$0xff]  ;;  %v112_v5 = vld [vmem:[%s11254_s4 + $0x10] sm:$0xff]  ;;  %v111_v6 = vld [vmem:[%s11254_s4 + $0x8] sm:$0xff] }
  0x27   :  { %8798 = vmatpush3.msra.mxu1 %v74_v34  ;;  %8799 = vmatprep.mubr.msk.f32.mxu1 %vm9663_vm1, %v9662_v2  ;;  %v117_v7 = vld [vmem:[%s11254_s4 + $0x38] sm:$0xff]  ;;  %v110_v8 = vld [vmem:[%s11254_s4] sm:$0xff]  ;;  %v116_v11 = vld [vmem:[%s11254_s4 + $0x30] sm:$0xff] }
  0x28   :  { %8789 = vmatmul.mubr.msk.f32.vlgmr.msra.gmra.mxu0 %vm164_vm0, %v9760_v9  ;;  %8800 = vmatmul.mubr.msk.f32.vlgmr.msra.gmra.mxu1 %vm164_vm0, %v9765_v10  ;;  %v121_v12 = vld [vmem:[%s11254_s4 + $0x58] sm:$0xff]  ;;  %v115_v13 = vld [vmem:[%s11254_s4 + $0x28] sm:$0xff]  ;;  %v120_v14 = vld [vmem:[%s11254_s4 + $0x50] sm:$0xff] }
  0x29   :  { %8802 = vmatprep.subr.mxu0 %v9662_v2  ;;  %8813 = vmatprep.subr.mxu1 %v9662_v2  ;;  %v114_v15 = vld [vmem:[%s11254_s4 + $0x20] sm:$0xff]  ;;  %v119_v16 = vld [vmem:[%s11254_s4 + $0x48] sm:$0xff]  ;;  %v125_v18 = vld [vmem:[%s11254_s4 + $0x78] sm:$0xff] }
  0x2a   :  { %8803 = vmatpush3.msra.mxu0 %v81_v35  ;;  %8814 = vmatpush3.msra.mxu1 %v85_v36  ;;  %v118_v17 = vld [vmem:[%s11254_s4 + $0x40] sm:$0xff]  ;;  %v129_v19 = vld [vmem:[%s11254_s4 + $0x98] sm:$0xff]  ;;  %v124_v20 = vld [vmem:[%s11254_s4 + $0x70] sm:$0xff] }
  0x2b   :  { %8804 = vmatprep.subr.mxu0 %v9662_v2  ;;  %8815 = vmatprep.subr.mxu1 %v9662_v2  ;;  %v128_v21 = vld [vmem:[%s11254_s4 + $0x90] sm:$0xff]  ;;  %v123_v22 = vld [vmem:[%s11254_s4 + $0x68] sm:$0xff]  ;;  %v122_v24 = vld [vmem:[%s11254_s4 + $0x60] sm:$0xff] }
  0x2c   :  { %8805 = vmatpush3.msra.mxu0 %v80_v37  ;;  %8816 = vmatpush3.msra.mxu1 %v84_v38  ;;  %v127_v23 = vld [vmem:[%s11254_s4 + $0x88] sm:$0xff]  ;;  %v126_v25 = vld [vmem:[%s11254_s4 + $0x80] sm:$0xff]  ;;  %v133_v26 = vld [vmem:[%s11254_s4 + $0xb8] sm:$0xff] }
  0x2d   :  { %8806 = vmatprep.subr.mxu0 %v9662_v2  ;;  %8817 = vmatprep.subr.mxu1 %v9662_v2  ;;  %v137_v27 = vld [vmem:[%s11254_s4 + $0xd8] sm:$0xff]  ;;  %v132_v28 = vld [vmem:[%s11254_s4 + $0xb0] sm:$0xff]  ;;  %v131_v30 = vld [vmem:[%s11254_s4 + $0xa8] sm:$0xff] }
  0x2e   :  { %8807 = vmatpush3.msra.mxu0 %v79_v39  ;;  %8818 = vmatpush3.msra.mxu1 %v83_v40  ;;  %v136_v29 = vld [vmem:[%s11254_s4 + $0xd0] sm:$0xff]  ;;  %v135_v31 = vld [vmem:[%s11254_s4 + $0xc8] sm:$0xff]  ;;  %v130_v32 = vld [vmem:[%s11254_s4 + $0xa0] sm:$0xff] }
  0x2f   :  { %8808 = vmatprep.subr.mxu0 %v9662_v2  ;;  %8819 = vmatprep.subr.mxu1 %v9662_v2  ;;  %v134_v33 = vld [vmem:[%s11254_s4 + $0xc0] sm:$0xff]  ;;  %v141_v34 = vld [vmem:[%s11254_s4 + $0xf8] sm:$0xff]  ;;  %v140_v35 = vld [vmem:[%s11254_s4 + $0xf0] sm:$0xff] }
  0x30   :  { %8809 = vmatpush3.msra.mxu0 %v78_v41  ;;  %8810 = vmatprep.mubr.msk.f32.mxu0 %vm9663_vm1, %v9662_v2  ;;  %v138_v36 = vld [vmem:[%s11254_s4 + $0xe0] sm:$0xff] }
  0x31   :  { %8820 = vmatpush3.msra.mxu1 %v82_v42  ;;  %8821 = vmatprep.mubr.msk.f32.mxu1 %vm9663_vm1, %v9662_v2 }
  0x32   :  { %8811 = vmatmul.mubr.msk.f32.vlgmr.msra.gmra.mxu0 %vm164_vm0, %v9760_v9  ;;  %8822 = vmatmul.mubr.msk.f32.vlgmr.msra.gmra.mxu1 %vm164_vm0, %v9765_v10 }
  0x33   :  { %8824 = vmatprep.subr.mxu0 %v9662_v2  ;;  %8835 = vmatprep.subr.mxu1 %v9662_v2 }
  0x34   :  { %8825 = vmatpush3.msra.mxu0 %v89_v43  ;;  %8836 = vmatpush3.msra.mxu1 %v93_v44 }
  0x35   :  { %8826 = vmatprep.subr.mxu0 %v9662_v2  ;;  %8837 = vmatprep.subr.mxu1 %v9662_v2 }
  0x36   :  { %8827 = vmatpush3.msra.mxu0 %v88_v45  ;;  %8838 = vmatpush3.msra.mxu1 %v92_v46 }
  0x37   :  { %8828 = vmatprep.subr.mxu0 %v9662_v2  ;;  %8839 = vmatprep.subr.mxu1 %v9662_v2 }
  0x38   :  { %8829 = vmatpush3.msra.mxu0 %v87_v47  ;;  %8840 = vmatpush3.msra.mxu1 %v91_v48 }
  0x39   :  { %8830 = vmatprep.subr.mxu0 %v9662_v2  ;;  %8841 = vmatprep.subr.mxu1 %v9662_v2 }
  0x3a   :  { %8831 = vmatpush3.msra.mxu0 %v86_v49  ;;  %8832 = vmatprep.mubr.msk.f32.mxu0 %vm9663_vm1, %v9662_v2 }
  0x3b   :  { %8842 = vmatpush3.msra.mxu1 %v90_v50  ;;  %8843 = vmatprep.mubr.msk.f32.mxu1 %vm9663_vm1, %v9662_v2 }
  0x3c   :  { %8833 = vmatmul.mubr.msk.f32.vlgmr.msra.gmra.mxu0 %vm164_vm0, %v9760_v9  ;;  %8844 = vmatmul.mubr.msk.f32.vlgmr.msra.gmra.mxu1 %vm164_vm0, %v9765_v10 }
  0x3d   :  { %8846 = vmatprep.subr.mxu0 %v9662_v2  ;;  %8857 = vmatprep.subr.mxu1 %v9662_v2 }
  0x3e   :  { %8847 = vmatpush3.msra.mxu0 %v97_v51  ;;  %8858 = vmatpush3.msra.mxu1 %v101_v52 }
  0x3f   :  { %8848 = vmatprep.subr.mxu0 %v9662_v2  ;;  %8859 = vmatprep.subr.mxu1 %v9662_v2 }
  0x40   :  { %8849 = vmatpush3.msra.mxu0 %v96_v53  ;;  %8860 = vmatpush3.msra.mxu1 %v100_v54 }
  0x41   :  { %8850 = vmatprep.subr.mxu0 %v9662_v2  ;;  %8861 = vmatprep.subr.mxu1 %v9662_v2 }
  0x42   :  { %8851 = vmatpush3.msra.mxu0 %v95_v55  ;;  %8862 = vmatpush3.msra.mxu1 %v99_v56 }
  0x43   :  { %8852 = vmatprep.subr.mxu0 %v9662_v2  ;;  %8863 = vmatprep.subr.mxu1 %v9662_v2 }
  0x44   :  { %8853 = vmatpush3.msra.mxu0 %v94_v57  ;;  %8854 = vmatprep.mubr.msk.f32.mxu0 %vm9663_vm1, %v9662_v2 }
  0x45   :  { %8864 = vmatpush3.msra.mxu1 %v98_v58  ;;  %8865 = vmatprep.mubr.msk.f32.mxu1 %vm9663_vm1, %v9662_v2 }
  0x46   :  { %8855 = vmatmul.mubr.msk.f32.vlgmr.msra.gmra.mxu0 %vm164_vm0, %v9760_v9  ;;  %8866 = vmatmul.mubr.msk.f32.vlgmr.msra.gmra.mxu1 %vm164_vm0, %v9765_v10 }
  0x47   :  { %8868 = vmatprep.subr.mxu0 %v9662_v2  ;;  %8879 = vmatprep.subr.mxu1 %v9662_v2 }
  0x48   :  { %8869 = vmatpush3.msra.mxu0 %v105_v59  ;;  %8880 = vmatpush3.msra.mxu1 %v109_v60 }
  0x49   :  { %8870 = vmatprep.subr.mxu0 %v9662_v2  ;;  %8881 = vmatprep.subr.mxu1 %v9662_v2 }
  0x4a   :  { %8871 = vmatpush3.msra.mxu0 %v104_v61  ;;  %8882 = vmatpush3.msra.mxu1 %v108_v62 }
  0x4b   :  { %8872 = vmatprep.subr.mxu0 %v9662_v2  ;;  %8883 = vmatprep.subr.mxu1 %v9662_v2 }
  0x4c   :  { %8873 = vmatpush3.msra.mxu0 %v103_v63  ;;  %8884 = vmatpush3.msra.mxu1 %v107_v0 }
  0x4d   :  { %8874 = vmatprep.subr.mxu0 %v9662_v2  ;;  %8885 = vmatprep.subr.mxu1 %v9662_v2 }
  0x4e   :  { %8875 = vmatpush3.msra.mxu0 %v102_v1  ;;  %8876 = vmatprep.mubr.msk.f32.mxu0 %vm9663_vm1, %v9662_v2 }
  0x4f   :  { %8886 = vmatpush3.msra.mxu1 %v106_v3  ;;  %8887 = vmatprep.mubr.msk.f32.mxu1 %vm9663_vm1, %v9662_v2 }
  0x50   :  { %8877 = vmatmul.mubr.msk.f32.vlgmr.msra.gmra.mxu0 %vm164_vm0, %v9760_v9  ;;  %8888 = vmatmul.mubr.msk.f32.vlgmr.msra.gmra.mxu1 %vm164_vm0, %v9765_v10 }
  0x51   :  { %8890 = vmatprep.subr.mxu0 %v9662_v2  ;;  %8898 = vmatprep.mubr.msk.f32.mxu0 %vm9663_vm1, %v9662_v2 }
  0x52   :  { %8891 = vmatpush3.msra.mxu0 %v113_v4  ;;  %8901 = vmatprep.subr.mxu1 %v9662_v2 }
  0x53   :  { %8892 = vmatprep.subr.mxu0 %v9662_v2  ;;  %8909 = vmatprep.mubr.msk.f32.mxu1 %vm9663_vm1, %v9662_v2 }
  0x54   :  { %8893 = vmatpush3.msra.mxu0 %v112_v5  ;;  %8902 = vmatpush3.msra.mxu1 %v117_v7 }
  0x55   :  { %8894 = vmatprep.subr.mxu0 %v9662_v2  ;;  %8903 = vmatprep.subr.mxu1 %v9662_v2 }
  0x56   :  { %8895 = vmatpush3.msra.mxu0 %v111_v6  ;;  %8904 = vmatpush3.msra.mxu1 %v116_v11 }
  0x57   :  { %8896 = vmatprep.subr.mxu0 %v9662_v2  ;;  %8905 = vmatprep.subr.mxu1 %v9662_v2 }
  0x58   :  { %8897 = vmatpush3.msra.mxu0 %v110_v8  ;;  %8906 = vmatpush3.msra.mxu1 %v115_v13 }
  0x59   :  { %8912 = vmatprep.subr.mxu0 %v9662_v2  ;;  %8899 = vmatmul.mubr.msk.f32.vlgmr.msra.gmra.mxu0 %vm164_vm0, %v9760_v9 }
  0x5a   :  { %8913 = vmatpush3.msra.mxu0 %v121_v12  ;;  %8907 = vmatprep.subr.mxu1 %v9662_v2 }
  0x5b   :  { %8914 = vmatprep.subr.mxu0 %v9662_v2  ;;  %8908 = vmatpush3.msra.mxu1 %v114_v15 }
  0x5c   :  { %8915 = vmatpush3.msra.mxu0 %v120_v14  ;;  %8920 = vmatprep.mubr.msk.f32.mxu0 %vm9663_vm1, %v9662_v2 }
  0x5d   :  { %8916 = vmatprep.subr.mxu0 %v9662_v2  ;;  %8923 = vmatprep.subr.mxu1 %v9662_v2 }
  0x5e   :  { %8917 = vmatpush3.msra.mxu0 %v119_v16  ;;  %8910 = vmatmul.mubr.msk.f32.vlgmr.msra.gmra.mxu1 %vm164_vm0, %v9765_v10 }
  0x5f   :  { %8918 = vmatprep.subr.mxu0 %v9662_v2  ;;  %8924 = vmatpush3.msra.mxu1 %v125_v18 }
  0x60   :  { %8919 = vmatpush3.msra.mxu0 %v118_v17  ;;  %8925 = vmatprep.subr.mxu1 %v9662_v2 }
  0x61   :  { %8934 = vmatprep.subr.mxu0 %v9662_v2  ;;  %8921 = vmatmul.mubr.msk.f32.vlgmr.msra.gmra.mxu0 %vm164_vm0, %v9760_v9 }
  0x62   :  { %8935 = vmatpush3.msra.mxu0 %v129_v19  ;;  %8926 = vmatpush3.msra.mxu1 %v124_v20 }
  0x63   :  { %8936 = vmatprep.subr.mxu0 %v9662_v2  ;;  %8927 = vmatprep.subr.mxu1 %v9662_v2 }
  0x64   :  { %8937 = vmatpush3.msra.mxu0 %v128_v21  ;;  %8928 = vmatpush3.msra.mxu1 %v123_v22 }
  0x65   :  { %8938 = vmatprep.subr.mxu0 %v9662_v2  ;;  %8929 = vmatprep.subr.mxu1 %v9662_v2 }
  0x66   :  { %8939 = vmatpush3.msra.mxu0 %v127_v23  ;;  %8930 = vmatpush3.msra.mxu1 %v122_v24  ;;  %v8121_v23 = vld [vmem:[%s11251_s1] ss:$0 sm:$0xff] }
  0x67   :  { %8940 = vmatprep.subr.mxu0 %v9662_v2  ;;  %8931 = vmatprep.mubr.msk.f32.mxu1 %vm9663_vm1, %v9662_v2 }
  0x68   :  { %8941 = vmatpush3.msra.mxu0 %v126_v25  ;;  %8942 = vmatprep.mubr.msk.f32.mxu0 %vm9663_vm1, %v9662_v2 }
  0x69   :  { %8945 = vmatprep.subr.mxu1 %v9662_v2  ;;  %8956 = vmatprep.subr.mxu0 %v9662_v2 }
  0x6a   :  { %8932 = vmatmul.mubr.msk.f32.vlgmr.msra.gmra.mxu1 %vm164_vm0, %v9765_v10  ;;  %8943 = vmatmul.mubr.msk.f32.vlgmr.msra.gmra.mxu0 %vm164_vm0, %v9760_v9 }
  0x6b   :  { %8946 = vmatpush3.msra.mxu1 %v133_v26  ;;  %8957 = vmatpush3.msra.mxu0 %v137_v27  ;;  %v8122_v27 = vld [vmem:[%s11251_s1 + $0x1] ss:$0 sm:$0xff] }
  0x6c   :  { %8947 = vmatprep.subr.mxu1 %v9662_v2  ;;  %8958 = vmatprep.subr.mxu0 %v9662_v2 }
  0x6d   :  { %8948 = vmatpush3.msra.mxu1 %v132_v28  ;;  %8959 = vmatpush3.msra.mxu0 %v136_v29 }
  0x6e   :  { %8949 = vmatprep.subr.mxu1 %v9662_v2  ;;  %8960 = vmatprep.subr.mxu0 %v9662_v2 }
  0x6f   :  { %8950 = vmatpush3.msra.mxu1 %v131_v30  ;;  %8961 = vmatpush3.msra.mxu0 %v135_v31 }
  0x70   :  { %8951 = vmatprep.subr.mxu1 %v9662_v2  ;;  %8962 = vmatprep.subr.mxu0 %v9662_v2 }
  0x71   :  { %8952 = vmatpush3.msra.mxu1 %v130_v32  ;;  %8963 = vmatpush3.msra.mxu0 %v134_v33  ;;  %v8123_v33 = vld [vmem:[%s11251_s1 + $0x2] ss:$0 sm:$0xff] }
  0x72   :  { %8964 = vmatprep.mubr.msk.f32.mxu0 %vm9663_vm1, %v9662_v2  ;;  %8953 = vmatprep.mubr.msk.f32.mxu1 %vm9663_vm1, %v9662_v2 }
  0x73   :  { %8965 = vmatmul.mubr.msk.f32.vlgmr.msra.gmra.mxu0 %vm164_vm0, %v9760_v9  ;;  %8967 = vmatprep.subr.mxu1 %v9662_v2  ;;  %v139_v9 = vld [vmem:[%s11254_s4 + $0xe8] sm:$0xff] }
  0x74   :  { %8978 = vmatprep.subr.mxu0 %v9662_v2  ;;  %8954 = vmatmul.mubr.msk.f32.vlgmr.msra.gmra.mxu1 %vm164_vm0, %v9765_v10 }
  0x75   :  { %8980 = vmatprep.mubr.msk.f32.mxu0 %vm9663_vm1, %v9662_v2  ;;  %8968 = vmatpush3.msra.mxu1 %v141_v34  ;;  %v8124_v34 = vld [vmem:[%s11251_s1 + $0x3] ss:$0 sm:$0xff] }
  0x76   :  { %8975 = vmatprep.mubr.msk.f32.mxu1 %vm9663_vm1, %v9662_v2  ;;  %8969 = vmatprep.subr.mxu1 %v9662_v2 }
  0x77   :  { %8970 = vmatpush3.msra.mxu1 %v140_v35 }
  0x78   :  { %8971 = vmatprep.subr.mxu1 %v9662_v2 }
  0x79   :  { %8972 = vmatpush3.msra.mxu1 %v139_v9 }
  0x7a   :  { %8973 = vmatprep.subr.mxu1 %v9662_v2 }
  0x7b   :  { %8974 = vmatpush3.msra.mxu1 %v138_v36 }
  0x7c   :  { %8976 = vmatmul.mubr.msk.f32.vlgmr.msra.gmra.mxu1 %vm164_vm0, %v9765_v10  ;;  %8993 = vmatprep.subr.mxu1 %v9662_v2 }
  0x7d   :  { %8995 = vmatprep.mubr.msk.f32.mxu1 %vm9663_vm1, %v9662_v2 }
  0xca   :  { %v234_v37 = vpop.f32.mrf.mxu0  ;;  %v307_v38 = vpop.f32.mrf.mxu1 }
  0xcc   :  { %v8724_v39 = vpop.f32.mrf.mxu0  ;;  %v8735_v40 = vpop.f32.mrf.mxu1 }
  0xd4   :  { %v377_v41 = vpop.f32.mrf.mxu0  ;;  %v447_v42 = vpop.f32.mrf.mxu1 }
  0xd6   :  { %v8746_v43 = vpop.f32.mrf.mxu0  ;;  %v8757_v44 = vpop.f32.mrf.mxu1 }
  0xd7   :  { %v8125_v43 = vld [vmem:[%s11251_s1 + $0x4] ss:$0 sm:$0xff] }
  0xde   :  { %v517_v45 = vpop.f32.mrf.mxu0  ;;  %v587_v46 = vpop.f32.mrf.mxu1 }
  0xe0   :  { %v8768_v47 = vpop.f32.mrf.mxu0  ;;  %v8779_v48 = vpop.f32.mrf.mxu1 }
  0xe8   :  { %v657_v49 = vpop.f32.mrf.mxu0  ;;  %v727_v50 = vpop.f32.mrf.mxu1 }
  0xea   :  { %v8790_v10 = vpop.f32.mrf.mxu0  ;;  %v8801_v51 = vpop.f32.mrf.mxu1 }
  0xeb   :  { %v8127_v51 = vld [vmem:[%s11251_s1 + $0x6] ss:$0 sm:$0xff] }
  0xf2   :  { %v797_v52 = vpop.f32.mrf.mxu0  ;;  %v867_v53 = vpop.f32.mrf.mxu1 }
  0xf3   :  { %8979 = vmatpush3.xpose.msk.msra.mxu0 %vm1899_vm2, %v797_v52  ;;  %v8128_v52 = vld [vmem:[%s11251_s1 + $0x7] ss:$0 sm:$0xff] }
  0xf4   :  { %v8812_v54 = vpop.f32.mrf.mxu0  ;;  %v8823_v55 = vpop.f32.mrf.mxu1  ;;  %8983 = vmatprep.subr.mxu0 %v9662_v2 }
  0xf6   :  { %8981 = vmatmul.mubr.msk.f32.vlgmr.msra.gmra.mxu0 %vm1899_vm2, %v234_v37 }
  0xf7   :  { %8984 = vmatpush3.xpose.msk.msra.mxu0 %vm1899_vm2, %v867_v53  ;;  %8985 = vmatprep.mubr.msk.f32.mxu0 %vm9663_vm1, %v9662_v2 }
  0xf8   :  { %8988 = vmatprep.subr.mxu0 %v9662_v2 }
  0xfa   :  { %8986 = vmatmul.mubr.msk.f32.vlgmr.msra.gmra.mxu0 %vm1899_vm2, %v307_v38 }
  0xfb   :  { %8990 = vmatprep.mubr.msk.f32.mxu0 %vm9663_vm1, %v9662_v2 }
  0xfc   :  { %v937_v56 = vpop.f32.mrf.mxu0  ;;  %v1007_v57 = vpop.f32.mrf.mxu1 }
  0xfd   :  { %8989 = vmatpush3.xpose.msk.msra.mxu0 %vm1899_vm2, %v937_v56  ;;  %8994 = vmatpush3.xpose.msk.msra.mxu1 %vm1899_vm2, %v1007_v57 }
  0xfe   :  { %v8834_v58 = vpop.f32.mrf.mxu0  ;;  %v8845_v59 = vpop.f32.mrf.mxu1  ;;  %8998 = vmatprep.subr.mxu0 %v9662_v2  ;;  %9003 = vmatprep.subr.mxu1 %v9662_v2 }
 0x100   :  { %8991 = vmatmul.mubr.msk.f32.vlgmr.msra.gmra.mxu0 %vm1899_vm2, %v377_v41  ;;  %8996 = vmatmul.mubr.msk.f32.vlgmr.msra.gmra.mxu1 %vm1899_vm2, %v447_v42  ;;  %v8126_v42 = vld [vmem:[%s11251_s1 + $0x5] ss:$0 sm:$0xff] }
 0x101   :  { %9000 = vmatprep.mubr.msk.f32.mxu0 %vm9663_vm1, %v9662_v2  ;;  %9005 = vmatprep.mubr.msk.f32.mxu1 %vm9663_vm1, %v9662_v2 }
 0x106   :  { %v1077_v60 = vpop.f32.mrf.mxu0  ;;  %v1147_v61 = vpop.f32.mrf.mxu1 }
 0x107   :  { %8999 = vmatpush3.xpose.msk.msra.mxu0 %vm1899_vm2, %v1077_v60  ;;  %9004 = vmatpush3.xpose.msk.msra.mxu1 %vm1899_vm2, %v1147_v61 }
 0x108   :  { %v8856_v62 = vpop.f32.mrf.mxu0  ;;  %v8867_v63 = vpop.f32.mrf.mxu1  ;;  %9008 = vmatprep.subr.mxu0 %v9662_v2  ;;  %9013 = vmatprep.subr.mxu1 %v9662_v2 }
 0x10a   :  { %9001 = vmatmul.mubr.msk.f32.vlgmr.msra.gmra.mxu0 %vm1899_vm2, %v517_v45  ;;  %9006 = vmatmul.mubr.msk.f32.vlgmr.msra.gmra.mxu1 %vm1899_vm2, %v587_v46 }
 0x10b   :  { %9010 = vmatprep.mubr.msk.f32.mxu0 %vm9663_vm1, %v9662_v2  ;;  %9015 = vmatprep.mubr.msk.f32.mxu1 %vm9663_vm1, %v9662_v2 }
 0x110   :  { %v1217_v0 = vpop.f32.mrf.mxu0  ;;  %v1287_v1 = vpop.f32.mrf.mxu1 }
 0x111   :  { %9009 = vmatpush3.xpose.msk.msra.mxu0 %vm1899_vm2, %v1217_v0  ;;  %9014 = vmatpush3.xpose.msk.msra.mxu1 %vm1899_vm2, %v1287_v1 }
 0x112   :  { %v8878_v3 = vpop.f32.mrf.mxu0  ;;  %v8889_v4 = vpop.f32.mrf.mxu1  ;;  %9018 = vmatprep.subr.mxu0 %v9662_v2  ;;  %9023 = vmatprep.subr.mxu1 %v9662_v2 }
 0x114   :  { %9011 = vmatmul.mubr.msk.f32.vlgmr.msra.gmra.mxu0 %vm1899_vm2, %v657_v49  ;;  %9016 = vmatmul.mubr.msk.f32.vlgmr.msra.gmra.mxu1 %vm1899_vm2, %v727_v50 }
 0x115   :  { %9020 = vmatprep.mubr.msk.f32.mxu0 %vm9663_vm1, %v9662_v2  ;;  %9025 = vmatprep.mubr.msk.f32.mxu1 %vm9663_vm1, %v9662_v2 }
 0x119   :  { %v1357_v5 = vpop.f32.mrf.mxu0 }
 0x11a   :  { %9019 = vmatpush3.msra.mxu0 %v1357_v5 }
 0x11b   :  { %v8900_v6 = vpop.f32.mrf.mxu0  ;;  %9028 = vmatprep.subr.mxu0 %v9662_v2 }
 0x11e   :  { %v1427_v7 = vpop.f32.mrf.mxu1 }
 0x11f   :  { %9024 = vmatpush3.msra.mxu1 %v1427_v7 }
 0x120   :  { %v8911_v11 = vpop.f32.mrf.mxu1  ;;  %9033 = vmatprep.subr.mxu1 %v9662_v2 }
 0x121   :  { %v10262_v8 = vpop.f32.mrf.mxu0 }
 0x123   :  { %v8922_v12 = vpop.f32.mrf.mxu0 }
 0x12a   :  { %v10265_v13 = vpop.f32.mrf.mxu1  ;;  %v10267_v14 = vpop.f32.mrf.mxu0 }
 0x12c   :  { %v8933_v15 = vpop.f32.mrf.mxu1  ;;  %v8944_v16 = vpop.f32.mrf.mxu0 }
 0x133   :  { %v10269_v17 = vpop.f32.mrf.mxu0 }
 0x134   :  { %v10271_v19 = vpop.f32.mrf.mxu1 }
 0x135   :  { %v8966_v18 = vpop.f32.mrf.mxu0 }
 0x136   :  { %v8955_v20 = vpop.f32.mrf.mxu1 }
 0x13c   :  { %v10273_v21 = vpop.f32.mrf.mxu1 }
 0x13e   :  { %v8977_v22 = vpop.f32.mrf.mxu1 }
 0x1b6   :  { %v1972_v24 = vpop.f32.mrf.mxu0 }
 0x1b7   :  { %v1973_v25 = vadd.f32 %v8121_v23, %v1972_v24 }
 0x1b8   :  { %v8982_v26 = vpop.f32.mrf.mxu0 }
 0x1b9   :  { %v2508_v28 = vsel %vm1899_vm2, %v1973_v25, -inf }
 0x1ba   :  { %2509 = vmax.xlane.f32.xlu0 %v2508_v28  ;;  %v2048_v29 = vpop.f32.mrf.mxu0 }
 0x1bb   :  { %v2049_v30 = vadd.f32 %v8122_v27, %v2048_v29 }
 0x1bc   :  { %v8987_v31 = vpop.f32.mrf.mxu0 }
 0x1bd   :  { %v2511_v32 = vsel %vm1899_vm2, %v2049_v30, -inf }
 0x1be   :  { %2512 = vmax.xlane.f32.xlu0 %v2511_v32 }
 0x1c0   :  { %v2200_v35 = vpop.f32.mrf.mxu1  ;;  %v2124_v9 = vpop.f32.mrf.mxu0 }
 0x1c1   :  { %v2125_v36 = vadd.f32 %v8123_v33, %v2124_v9  ;;  %v2201_v39 = vadd.f32 %v8124_v34, %v2200_v35 }
 0x1c2   :  { %v8992_v37 = vpop.f32.mrf.mxu0  ;;  %v8997_v38 = vpop.f32.mrf.mxu1 }
 0x1c3   :  { %v2514_v40 = vsel %vm1899_vm2, %v2125_v36, -inf  ;;  %v2517_v41 = vsel %vm1899_vm2, %v2201_v39, -inf }
 0x1c4   :  { %2515 = vmax.xlane.f32.xlu1 %v2514_v40 }
 0x1c8   :  { %2518 = vmax.xlane.f32.xlu1 %v2517_v41 }
 0x1ca   :  { %v2352_v44 = vpop.f32.mrf.mxu1  ;;  %v2276_v45 = vpop.f32.mrf.mxu0 }
 0x1cb   :  { %v2353_v46 = vadd.f32 %v8126_v42, %v2352_v44  ;;  %v2277_v47 = vadd.f32 %v8125_v43, %v2276_v45 }
 0x1cc   :  { %v9002_v48 = vpop.f32.mrf.mxu0  ;;  %v9007_v49 = vpop.f32.mrf.mxu1 }
 0x1cd   :  { %v2523_v50 = vsel %vm1899_vm2, %v2353_v46, -inf  ;;  %v2520_v10 = vsel %vm1899_vm2, %v2277_v47, -inf }
 0x1ce   :  { %2524 = vmax.xlane.f32.xlu1 %v2523_v50  ;;  %2521 = vmax.xlane.f32.xlu0 %v2520_v10 }
 0x1d4   :  { %v2428_v53 = vpop.f32.mrf.mxu0  ;;  %v2504_v54 = vpop.f32.mrf.mxu1 }
 0x1d5   :  { %v2429_v55 = vadd.f32 %v8127_v51, %v2428_v53  ;;  %v2505_v56 = vadd.f32 %v8128_v52, %v2504_v54 }
 0x1d6   :  { %v9012_v57 = vpop.f32.mrf.mxu0  ;;  %v9017_v58 = vpop.f32.mrf.mxu1 }
 0x1d7   :  { %v2529_v59 = vsel %vm1899_vm2, %v2505_v56, -inf  ;;  %v2526_v60 = vsel %vm1899_vm2, %v2429_v55, -inf }
 0x1d8   :  { %2530 = vmax.xlane.f32.xlu1 %v2529_v59  ;;  %2527 = vmax.xlane.f32.xlu0 %v2526_v60 }
 0x243   :  { %v2510_v61 = vpop.xlane.xlu0 %2509 }
 0x244   :  { %v2532_v62 = vsub.f32 %v1973_v25, %v2510_v61 }
 0x246   :  { %v2540_v63 = vmul.f32 1.442695, %v2532_v62 }
 0x247   :  { %v2513_v0 = vpop.xlane.xlu0 %2512 }
 0x248   :  { %9550 = vpow2.f32 %v2540_v63  ;;  %v2533_v1 = vsub.f32 %v2049_v30, %v2513_v0  ;;  %v144_v0 = vld [vmem:[%s11255_s5 + $0x10] sm:$0xff] }
 0x24a   :  { %v2542_v3 = vmul.f32 1.442695, %v2533_v1 }
 0x24c   :  { %9552 = vpow2.f32 %v2542_v3 }
 0x24d   :  { %v2516_v4 = vpop.xlane.xlu1 %2515 }
 0x24e   :  { %v2534_v5 = vsub.f32 %v2125_v36, %v2516_v4  ;;  %v145_v4 = vld [vmem:[%s11255_s5 + $0x18] sm:$0xff] }
 0x250   :  { %v2544_v6 = vmul.f32 1.442695, %v2534_v5 }
 0x251   :  { %v2519_v7 = vpop.xlane.xlu1 %2518 }
 0x252   :  { %9554 = vpow2.f32 %v2544_v6  ;;  %v2535_v11 = vsub.f32 %v2201_v39, %v2519_v7  ;;  %v146_v7 = vld [vmem:[%s11255_s5 + $0x20] sm:$0xff] }
 0x254   :  { %v2546_v12 = vmul.f32 1.442695, %v2535_v11 }
 0x255   :  { %v9551_v15 = vpop.eup %9550 }
 0x256   :  { %9556 = vpow2.f32 %v2546_v12  ;;  %v2556_v16 = vsel %vm1899_vm2, %v9551_v15, 0.0 }
 0x257   :  { %v2525_v18 = vpop.xlane.xlu1 %2524  ;;  %v2522_v20 = vpop.xlane.xlu0 %2521  ;;  %2557 = vadd.xlane.f32.xlu0 %v2556_v16 }
 0x258   :  { %v2537_v22 = vsub.f32 %v2353_v46, %v2525_v18  ;;  %v2536_v23 = vsub.f32 %v2277_v47, %v2522_v20  ;;  %v149_v20 = vld [vmem:[%s11255_s5 + $0x38] sm:$0xff] }
 0x259   :  { %v9553_v24 = vpop.eup %9552 }
 0x25a   :  { %v2550_v25 = vmul.f32 1.442695, %v2537_v22  ;;  %v2548_v26 = vmul.f32 1.442695, %v2536_v23  ;;  %v2559_v27 = vsel %vm1899_vm2, %v9553_v24, 0.0  ;;  %v148_v23 = vld [vmem:[%s11255_s5 + $0x30] sm:$0xff] }
 0x25b   :  { %2560 = vadd.xlane.f32.xlu1 %v2559_v27 }
 0x25c   :  { %9558 = vpow2.f32 %v2550_v25 }
 0x25d   :  { %9560 = vpow2.f32 %v2548_v26 }
 0x25f   :  { %v9555_v28 = vpop.eup %9554 }
 0x260   :  { %v2562_v29 = vsel %vm1899_vm2, %v9555_v28, 0.0 }
 0x261   :  { %v2531_v30 = vpop.xlane.xlu1 %2530  ;;  %v2528_v31 = vpop.xlane.xlu0 %2527  ;;  %2563 = vadd.xlane.f32.xlu0 %v2562_v29 }
 0x262   :  { %v2539_v32 = vsub.f32 %v2505_v56, %v2531_v30  ;;  %v2538_v33 = vsub.f32 %v2429_v55, %v2528_v31 }
 0x263   :  { %v9557_v34 = vpop.eup %9556 }
 0x264   :  { %v2554_v35 = vmul.f32 1.442695, %v2539_v32  ;;  %v2552_v9 = vmul.f32 1.442695, %v2538_v33  ;;  %v2565_v36 = vsel %vm1899_vm2, %v9557_v34, 0.0 }
 0x265   :  { %2566 = vadd.xlane.f32.xlu1 %v2565_v36 }
 0x266   :  { %9562 = vpow2.f32 %v2554_v35 }
 0x267   :  { %9564 = vpow2.f32 %v2552_v9 }
 0x269   :  { %v9559_v37 = vpop.eup %9558 }
 0x26a   :  { %v9561_v38 = vpop.eup %9560  ;;  %v2571_v39 = vsel %vm1899_vm2, %v9559_v37, 0.0 }
 0x26b   :  { %2572 = vadd.xlane.f32.xlu1 %v2571_v39  ;;  %v2568_v40 = vsel %vm1899_vm2, %v9561_v38, 0.0 }
 0x26c   :  { %2569 = vadd.xlane.f32.xlu0 %v2568_v40 }
 0x273   :  { %v9563_v41 = vpop.eup %9562 }
 0x274   :  { %v9565_v42 = vpop.eup %9564  ;;  %v2577_v43 = vsel %vm1899_vm2, %v9563_v41, 0.0 }
 0x275   :  { %2578 = vadd.xlane.f32.xlu1 %v2577_v43  ;;  %v2574_v44 = vsel %vm1899_vm2, %v9565_v42, 0.0 }
 0x276   :  { %2575 = vadd.xlane.f32.xlu0 %v2574_v44 }
 0x2e0   :  { %v2558_v45 = vpop.xlane.xlu0 %2557 }
 0x2e1   :  { %9566 = vrcp.f32 %v2558_v45  ;;  %v10407_v45 = vld [vmem:[%s11259_s9] sm:$0x3f] }
 0x2e4   :  { %v2561_v46 = vpop.xlane.xlu1 %2560 }
 0x2e5   :  { %9568 = vrcp.f32 %v2561_v46 }
 0x2ea   :  { %v2564_v47 = vpop.xlane.xlu0 %2563 }
 0x2eb   :  { %9570 = vrcp.f32 %v2564_v47 }
 0x2ee   :  { %v9567_v48 = vpop.eup %9566  ;;  %v2567_v49 = vpop.xlane.xlu1 %2566 }
 0x2ef   :  { %9572 = vrcp.f32 %v2567_v49  ;;  %v2581_v50 = vmul.f32 %v9567_v48, %v9551_v15  ;;  %v147_v15 = vld [vmem:[%s11255_s5 + $0x28] sm:$0xff] }
 0x2f1   :  { %9021 = vmatmul.mubr.msk.f32.vlgmr.msra.gmra.mxu0 %vm1899_vm2, %v2581_v50 }
 0x2f2   :  { %v9569_v10 = vpop.eup %9568  ;;  %9029 = vmatpush3.msra.mxu0 %v10262_v8  ;;  %9030 = vmatprep.mubr.msk.f32.mxu0 %vm9663_vm1, %v9662_v2 }
 0x2f3   :  { %v2583_v51 = vmul.f32 %v9569_v10, %v9553_v24  ;;  %9038 = vmatprep.subr.mxu0 %v9662_v2 }
 0x2f4   :  { %v2573_v52 = vpop.xlane.xlu1 %2572 }
 0x2f5   :  { %9574 = vrcp.f32 %v2573_v52  ;;  %v2570_v53 = vpop.xlane.xlu0 %2569  ;;  %9026 = vmatmul.mubr.msk.f32.vlgmr.msra.gmra.mxu1 %vm1899_vm2, %v2583_v51 }
 0x2f6   :  { %9576 = vrcp.f32 %v2570_v53  ;;  %9034 = vmatpush3.msra.mxu1 %v10265_v13  ;;  %9035 = vmatprep.mubr.msk.f32.mxu1 %vm9663_vm1, %v9662_v2 }
 0x2f7   :  { %9043 = vmatprep.subr.mxu1 %v9662_v2 }
 0x2f8   :  { %v9571_v8 = vpop.eup %9570 }
 0x2f9   :  { %v2585_v54 = vmul.f32 %v9571_v8, %v9555_v28 }
 0x2fb   :  { %9031 = vmatmul.mubr.msk.f32.vlgmr.msra.gmra.mxu0 %vm1899_vm2, %v2585_v54 }
 0x2fc   :  { %v9573_v55 = vpop.eup %9572  ;;  %9039 = vmatpush3.msra.mxu0 %v10267_v14  ;;  %9040 = vmatprep.mubr.msk.f32.mxu0 %vm9663_vm1, %v9662_v2 }
 0x2fd   :  { %v2587_v56 = vmul.f32 %v9573_v55, %v9557_v34  ;;  %9048 = vmatprep.subr.mxu0 %v9662_v2 }
 0x2fe   :  { %v2579_v57 = vpop.xlane.xlu1 %2578 }
 0x2ff   :  { %9578 = vrcp.f32 %v2579_v57  ;;  %v2576_v13 = vpop.xlane.xlu0 %2575  ;;  %9036 = vmatmul.mubr.msk.f32.vlgmr.msra.gmra.mxu1 %vm1899_vm2, %v2587_v56  ;;  %v9630_v57 = vld [vmem:[%s11250_s0 + $0x8] sm:$0xff] }
 0x300   :  { %9580 = vrcp.f32 %v2576_v13  ;;  %9044 = vmatpush3.msra.mxu1 %v10271_v19  ;;  %9045 = vmatprep.mubr.msk.f32.mxu1 %vm9663_vm1, %v9662_v2 }
 0x301   :  { %9053 = vmatprep.subr.mxu1 %v9662_v2 }
 0x302   :  { %v9575_v14 = vpop.eup %9574 }
 0x303   :  { %v9577_v58 = vpop.eup %9576  ;;  %v2591_v59 = vmul.f32 %v9575_v14, %v9559_v37  ;;  %v9631_v14 = vld [vmem:[%s11250_s0] sm:$0xff] }
 0x304   :  { %v2589_v60 = vmul.f32 %v9577_v58, %v9561_v38  ;;  %v3770_v38 = vlaneseq }
 0x305   :  { %9046 = vmatmul.mubr.msk.f32.vlgmr.msra.gmra.mxu1 %vm1899_vm2, %v2591_v59 }
 0x306   :  { %9041 = vmatmul.mubr.msk.f32.vlgmr.msra.gmra.mxu0 %vm1899_vm2, %v2589_v60  ;;  %9054 = vmatpush3.msra.mxu1 %v10273_v21  ;;  %v143_v21 = vld [vmem:[%s11255_s5 + $0x8] sm:$0xff] }
 0x307   :  { %9049 = vmatpush3.msra.mxu0 %v10269_v17  ;;  %9050 = vmatprep.mubr.msk.f32.mxu0 %vm9663_vm1, %v9662_v2  ;;  %v142_v17 = vld [vmem:[%s11255_s5] sm:$0xff] }
 0x308   :  { %9055 = vmatprep.mubr.msk.f32.mxu1 %vm9663_vm1, %v9662_v2  ;;  %9058 = vmatprep.subr.mxu0 %v9662_v2 }
 0x309   :  { %9063 = vmatprep.subr.mxu1 %v9662_v2 }
 0x30c   :  { %v9579_v19 = vpop.eup %9578 }
 0x30d   :  { %v9581_v61 = vpop.eup %9580  ;;  %v2595_v62 = vmul.f32 %v9579_v19, %v9563_v41  ;;  %v10401_v41 = vshrl.u32 %v3770_v38, 7  ;;  %v157_v38 = vld [vmem:[%s11257_s7 + $0x18] sm:$0xff] }
 0x30e   :  { %v2593_v63 = vmul.f32 %v9581_v61, %v9565_v42 }
 0x30f   :  { %9056 = vmatmul.mubr.msk.f32.vlgmr.msra.gmra.mxu1 %vm1899_vm2, %v2595_v62  ;;  %v3772_v44 = vsub.s32 0, %v10401_v41 }
 0x310   :  { %9051 = vmatmul.mubr.msk.f32.vlgmr.msra.gmra.mxu0 %vm1899_vm2, %v2593_v63  ;;  %9065 = vmatprep.mubr.msk.f32.mxu1 %vm9663_vm1, %v9662_v2 }
 0x311   :  { %9060 = vmatprep.mubr.msk.f32.mxu0 %vm9663_vm1, %v9662_v2  ;;  %9059 = vmatpush3.msra.mxu0 %v142_v17  ;;  %v3773_v49 = vrot.slane %v10407_v45, %v3772_v44 }
 0x312   :  { %9068 = vmatprep.subr.mxu0 %v9662_v2  ;;  %9064 = vmatpush3.msra.mxu1 %v143_v21 }
 0x313   :  { %9073 = vmatprep.subr.mxu1 %v9662_v2 }
 0x3b1   :  { %v2665_v1 = vpop.f32.mrf.mxu0 }
 0x3b2   :  { %9061 = vmatmul.mubr.msk.f32.vlgmr.msra.gmra.mxu0 %vm1899_vm2, %v2665_v1 }
 0x3b3   :  { %v9022_v3 = vpop.f32.mrf.mxu0  ;;  %9069 = vmatpush3.msra.mxu0 %v144_v0  ;;  %9070 = vmatprep.mubr.msk.f32.mxu0 %vm9663_vm1, %v9662_v2 }
 0x3b4   :  { %9078 = vmatprep.subr.mxu0 %v9662_v2 }
 0x3b5   :  { %v2738_v5 = vpop.f32.mrf.mxu1 }
 0x3b6   :  { %9066 = vmatmul.mubr.msk.f32.vlgmr.msra.gmra.mxu1 %vm1899_vm2, %v2738_v5  ;;  %v153_v5 = vld [vmem:[%s11256_s6 + $0x18] sm:$0xff] }
 0x3b7   :  { %v9027_v6 = vpop.f32.mrf.mxu1  ;;  %9074 = vmatpush3.msra.mxu1 %v145_v4  ;;  %9075 = vmatprep.mubr.msk.f32.mxu1 %vm9663_vm1, %v9662_v2 }
 0x3b8   :  { %9083 = vmatprep.subr.mxu1 %v9662_v2  ;;  %v152_v6 = vld [vmem:[%s11256_s6 + $0x10] sm:$0xff] }
 0x3bb   :  { %v2811_v11 = vpop.f32.mrf.mxu0 }
 0x3bc   :  { %9071 = vmatmul.mubr.msk.f32.vlgmr.msra.gmra.mxu0 %vm1899_vm2, %v2811_v11  ;;  %v150_v11 = vld [vmem:[%s11256_s6] sm:$0xff] }
 0x3bd   :  { %v9032_v12 = vpop.f32.mrf.mxu0  ;;  %9079 = vmatpush3.msra.mxu0 %v146_v7  ;;  %9080 = vmatprep.mubr.msk.f32.mxu0 %vm9663_vm1, %v9662_v2  ;;  %v151_v7 = vld [vmem:[%s11256_s6 + $0x8] sm:$0xff] }
 0x3be   :  { %9088 = vmatprep.subr.mxu0 %v9662_v2  ;;  %v161_v12 = vld [vmem:[%s11257_s7 + $0x38] sm:$0xff] }
 0x3bf   :  { %v2884_v16 = vpop.f32.mrf.mxu1 }
 0x3c0   :  { %9076 = vmatmul.mubr.msk.f32.vlgmr.msra.gmra.mxu1 %vm1899_vm2, %v2884_v16  ;;  %v159_v16 = vld [vmem:[%s11257_s7 + $0x28] sm:$0xff] }
 0x3c1   :  { %v9037_v18 = vpop.f32.mrf.mxu1  ;;  %9084 = vmatpush3.msra.mxu1 %v147_v15  ;;  %9085 = vmatprep.mubr.msk.f32.mxu1 %vm9663_vm1, %v9662_v2  ;;  %v160_v15 = vld [vmem:[%s11257_s7 + $0x30] sm:$0xff] }
 0x3c2   :  { %9093 = vmatprep.subr.mxu1 %v9662_v2  ;;  %v158_v18 = vld [vmem:[%s11257_s7 + $0x20] sm:$0xff] }
 0x3c5   :  { %v3030_v22 = vpop.f32.mrf.mxu1 }
 0x3c6   :  { %v2957_v24 = vpop.f32.mrf.mxu0  ;;  %9086 = vmatmul.mubr.msk.f32.vlgmr.msra.gmra.mxu1 %vm1899_vm2, %v3030_v22 }
 0x3c7   :  { %9081 = vmatmul.mubr.msk.f32.vlgmr.msra.gmra.mxu0 %vm1899_vm2, %v2957_v24  ;;  %v9047_v25 = vpop.f32.mrf.mxu1  ;;  %9094 = vmatpush3.msra.mxu1 %v149_v20 }
 0x3c8   :  { %v9042_v26 = vpop.f32.mrf.mxu0  ;;  %9089 = vmatpush3.msra.mxu0 %v148_v23  ;;  %9090 = vmatprep.mubr.msk.f32.mxu0 %vm9663_vm1, %v9662_v2 }
 0x3c9   :  { %9095 = vmatprep.mubr.msk.f32.mxu1 %vm9663_vm1, %v9662_v2  ;;  %9098 = vmatprep.subr.mxu0 %v153_v5 }
 0x3ca   :  { %9109 = vmatprep.subr.mxu1 %v161_v12 }
 0x3cf   :  { %v3176_v27 = vpop.f32.mrf.mxu1 }
 0x3d0   :  { %v3103_v28 = vpop.f32.mrf.mxu0  ;;  %9096 = vmatmul.mubr.msk.f32.vlgmr.msra.gmra.mxu1 %vm1899_vm2, %v3176_v27  ;;  %v3807_v27 = vsub.s32 1, %v10401_v41 }
 0x3d1   :  { %9091 = vmatmul.mubr.msk.f32.vlgmr.msra.gmra.mxu0 %vm1899_vm2, %v3103_v28  ;;  %v9057_v29 = vpop.f32.mrf.mxu1  ;;  %9110 = vmatpush3.msra.mxu1 %v161_v12  ;;  %v3813_v28 = vsub.s32 2, %v10401_v41  ;;  %v8174_v12 = vld [vmem:[%s11252_s2 + $0x140] sm:$0xff] }
 0x3d2   :  { %v9052_v30 = vpop.f32.mrf.mxu0  ;;  %9099 = vmatpush3.msra.mxu0 %v153_v5  ;;  %9111 = vmatprep.subr.mxu1 %v160_v15  ;;  %v3808_v29 = vrot.slane %v10407_v45, %v3807_v27  ;;  %v8176_v5 = vld [vmem:[%s11252_s2 + $0x150] sm:$0xff] }
 0x3d3   :  { %9100 = vmatprep.subr.mxu0 %v152_v6  ;;  %9112 = vmatpush3.msra.mxu1 %v160_v15 }
 0x3d4   :  { %9101 = vmatpush3.msra.mxu0 %v152_v6  ;;  %9113 = vmatprep.subr.mxu1 %v159_v16  ;;  %v8167_v6 = vld [vmem:[%s11252_s2 + $0x108] sm:$0xff] }
 0x3d5   :  { %9102 = vmatprep.subr.mxu0 %v151_v7  ;;  %9114 = vmatpush3.msra.mxu1 %v159_v16 }
 0x3d6   :  { %9103 = vmatpush3.msra.mxu0 %v151_v7  ;;  %9115 = vmatprep.subr.mxu1 %v158_v18  ;;  %v8175_v7 = vld [vmem:[%s11252_s2 + $0x148] sm:$0xff] }
 0x3d7   :  { %9104 = vmatprep.subr.mxu0 %v150_v11  ;;  %9116 = vmatpush3.msra.mxu1 %v158_v18 }
 0x3d8   :  { %9105 = vmatpush3.msra.mxu0 %v150_v11  ;;  %9117 = vmatprep.subr.mxu1 %v157_v38  ;;  %v8166_v11 = vld [vmem:[%s11252_s2 + $0x100] sm:$0xff] }
 0x3d9   :  { %9128 = vmatprep.subr.mxu0 %v9662_v2  ;;  %9118 = vmatpush3.msra.mxu1 %v157_v38  ;;  %v8171_v38 = vld [vmem:[%s11252_s2 + $0x128] sm:$0xff] }
 0x472   :  { %v3249_v31 = vpop.f32.mrf.mxu0 }
 0x474   :  { %v9062_v32 = vpop.f32.mrf.mxu0 }
 0x476   :  { %v3322_v33 = vpop.f32.mrf.mxu1 }
 0x478   :  { %v9067_v34 = vpop.f32.mrf.mxu1 }
 0x47c   :  { %v3395_v35 = vpop.f32.mrf.mxu0 }
 0x47d   :  { %v3764_v47 = vadd.f32 %v3395_v35, %v3249_v31 }
 0x47e   :  { %v9072_v9 = vpop.f32.mrf.mxu0 }
 0x480   :  { %v3468_v36 = vpop.f32.mrf.mxu1 }
 0x481   :  { %v3765_v46 = vadd.f32 %v3468_v36, %v3322_v33  ;;  %v3814_v33 = vrot.slane %v10407_v45, %v3813_v28 }
 0x482   :  { %v9077_v37 = vpop.f32.mrf.mxu1 }
 0x486   :  { %v3614_v39 = vpop.f32.mrf.mxu1 }
 0x487   :  { %v3541_v40 = vpop.f32.mrf.mxu0  ;;  %v3767_v48 = vadd.f32 %v3765_v46, %v3614_v39  ;;  %v156_v39 = vld [vmem:[%s11257_s7 + $0x10] sm:$0xff] }
 0x488   :  { %v9087_v42 = vpop.f32.mrf.mxu1  ;;  %v3766_v50 = vadd.f32 %v3764_v47, %v3541_v40  ;;  %9119 = vmatprep.subr.mxu1 %v156_v39  ;;  %v155_v40 = vld [vmem:[%s11257_s7 + $0x8] sm:$0xff] }
 0x489   :  { %v9082_v43 = vpop.f32.mrf.mxu0  ;;  %9120 = vmatpush3.msra.mxu1 %v156_v39  ;;  %v154_v42 = vld [vmem:[%s11257_s7] sm:$0xff]  ;;  %v8183_v39 = vld [vmem:[%s11252_s2 + $0x188] sm:$0xff] }
 0x48a   :  { %9121 = vmatprep.subr.mxu1 %v155_v40  ;;  %v8161_v43 = vld [vmem:[%s11258_s8] ss:$0 sm:$0xff] }
 0x48b   :  { %9122 = vmatpush3.msra.mxu1 %v155_v40 }
 0x48c   :  { %9123 = vmatprep.subr.mxu1 %v154_v42 }
 0x48d   :  { %9124 = vmatpush3.msra.mxu1 %v154_v42  ;;  %v8170_v42 = vld [vmem:[%s11252_s2 + $0x120] sm:$0xff] }
 0x48e   :  { %9150 = vmatprep.subr.mxu1 %v9662_v2 }
 0x490   :  { %v3760_v10 = vpop.f32.mrf.mxu1 }
 0x491   :  { %v3687_v51 = vpop.f32.mrf.mxu0  ;;  %v3769_v52 = vadd.f32 %v3767_v48, %v3760_v10 }
 0x492   :  { %v3768_v53 = vadd.f32 %v3766_v50, %v3687_v51  ;;  %v9097_v8 = vpop.f32.mrf.mxu1  ;;  %v3908_v51 = vsub.s32 3, %v10401_v41 }
 0x493   :  { %v3775_v54 = vadd.f32 %v3773_v49, %v3769_v52  ;;  %v9092_v55 = vpop.f32.mrf.mxu0 }
 0x494   :  { %v3774_v56 = vadd.f32 %v3773_v49, %v3768_v53  ;;  %v3909_v52 = vrot.slane %v10407_v45, %v3908_v51 }
 0x495   :  { %v3777_v13 = vadd.f32 %v9630_v57, %v3775_v54 }
 0x496   :  { %v3776_v58 = vadd.f32 %v9631_v14, %v3774_v56 }
 0x497   :  { %v3781_v59 = vsel %vm164_vm0, %v3777_v13, 0.0 }
 0x498   :  { %3782 = vadd.xlane.f32.xlu1 %v3781_v59  ;;  %v3778_v60 = vsel %vm164_vm0, %v3776_v58, 0.0 }
 0x499   :  { %3779 = vadd.xlane.f32.xlu0 %v3778_v60 }
 0x521   :  { %v3783_v19 = vpop.xlane.xlu1 %3782 }
 0x522   :  { %v3786_v61 = vmul.f32 0.03125, %v3783_v19  ;;  %v3780_v62 = vpop.xlane.xlu0 %3779 }
 0x523   :  { %v3785_v63 = vmul.f32 0.03125, %v3780_v62 }
 0x524   :  { %v3788_v17 = vsub.f32 %v3777_v13, %v3786_v61 }
 0x525   :  { %v3787_v21 = vsub.f32 %v3776_v58, %v3785_v63 }
 0x526   :  { %v3790_v0 = vmul.f32 %v3788_v17, %v3788_v17 }
 0x527   :  { %v3789_v1 = vmul.f32 %v3787_v21, %v3787_v21 }
 0x528   :  { %v3794_v3 = vsel %vm164_vm0, %v3790_v0, 0.0 }
 0x529   :  { %3795 = vadd.xlane.f32.xlu1 %v3794_v3  ;;  %v3791_v4 = vsel %vm164_vm0, %v3789_v1, 0.0  ;;  %v8169_v1 = vld [vmem:[%s11252_s2 + $0x118] sm:$0xff] }
 0x52a   :  { %3792 = vadd.xlane.f32.xlu0 %v3791_v4  ;;  %v8177_v3 = vld [vmem:[%s11252_s2 + $0x158] sm:$0xff]  ;;  %v8168_v4 = vld [vmem:[%s11252_s2 + $0x110] sm:$0xff] }
 0x5b2   :  { %v3796_v20 = vpop.xlane.xlu1 %3795 }
 0x5b3   :  { %v3798_v22 = vmul.f32 0.03125, %v3796_v20  ;;  %v3793_v23 = vpop.xlane.xlu0 %3792 }
 0x5b4   :  { %v3797_v24 = vmul.f32 0.03125, %v3793_v23 }
 0x5b5   :  { %v3800_v25 = vadd.f32 1e-06, %v3798_v22 }
 0x5b6   :  { %v3799_v26 = vadd.f32 1e-06, %v3797_v24  ;;  %v4022_v24 = vsub.s32 4, %v10401_v41 }
 0x5b7   :  { %9582 = vrsqrt.f32 %v3800_v25  ;;  %v4028_v25 = vsub.s32 5, %v10401_v41 }
 0x5b8   :  { %9584 = vrsqrt.f32 %v3799_v26 }
 0x5c4   :  { %v9583_v30 = vpop.eup %9582 }
 0x5c5   :  { %v9585_v31 = vpop.eup %9584  ;;  %v3804_v32 = vmul.f32 %v9583_v30, %v3788_v17 }
 0x5c6   :  { %v3803_v34 = vmul.f32 %v9585_v31, %v3787_v21 }
 0x5c7   :  { %v3810_v35 = vmul.f32 %v3808_v29, %v3804_v32  ;;  %v4029_v32 = vrot.slane %v10407_v45, %v4028_v25 }
 0x5c8   :  { %v3809_v9 = vmul.f32 %v3808_v29, %v3803_v34  ;;  %v4023_v29 = vrot.slane %v10407_v45, %v4022_v24  ;;  %v8172_v45 = vld [vmem:[%s11252_s2 + $0x130] sm:$0xff] }
 0x5c9   :  { %v3816_v36 = vadd.f32 %v3814_v33, %v3810_v35  ;;  %v8173_v35 = vld [vmem:[%s11252_s2 + $0x138] sm:$0xff] }
 0x5ca   :  { %v3815_v37 = vadd.f32 %v3814_v33, %v3809_v9  ;;  %v8185_v9 = vld [vmem:[%s11252_s2 + $0x198] sm:$0xff] }
 0x5cc   :  { %9106 = vmatprep.mubr.msk.f32.mxu0 %vm164_vm0, %v3815_v37 }
 0x5cd   :  { %9107 = vmatmul.mubr.msk.f32.vlgmr.msra.gmra.mxu0 %vm164_vm0, %v3816_v36 }
 0x5ce   :  { %9136 = vmatprep.mubr.msk.f32.mxu0 %vm9663_vm1, %v9662_v2  ;;  %9129 = vmatpush3.msra.mxu0 %v8169_v1  ;;  %v8205_v1 = vld [vmem:[%s11253_s3 + $0x138] sm:$0xff] }
 0x5cf   :  { %9130 = vmatprep.subr.mxu0 %v9662_v2 }
 0x5d0   :  { %9131 = vmatpush3.msra.mxu0 %v8168_v4  ;;  %v8204_v4 = vld [vmem:[%s11253_s3 + $0x130] sm:$0xff] }
 0x5d1   :  { %9132 = vmatprep.subr.mxu0 %v9662_v2 }
 0x5d2   :  { %9133 = vmatpush3.msra.mxu0 %v8167_v6  ;;  %v8203_v6 = vld [vmem:[%s11253_s3 + $0x128] sm:$0xff] }
 0x5d3   :  { %9134 = vmatprep.subr.mxu0 %v9662_v2 }
 0x5d4   :  { %9135 = vmatpush3.msra.mxu0 %v8166_v11  ;;  %v8202_v11 = vld [vmem:[%s11253_s3 + $0x120] sm:$0xff] }
 0x5d5   :  { %9139 = vmatprep.subr.mxu0 %v9662_v2 }
 0x68d   :  { %v9108_v46 = vpop.f32.mrf.mxu0 }
 0x68e   :  { %v3901_v47 = vadd.f32 %v9108_v46, %v8161_v43 }
 0x68f   :  { %v3895_v48 = vpop.f32.mrf.mxu0 }
 0x690   :  { %v3896_v49 = vadd.f32 %v8161_v43, %v3895_v48  ;;  %v3905_v10 = vmax.f32 %v3901_v47, 0.0  ;;  %v8182_v43 = vld [vmem:[%s11252_s2 + $0x180] sm:$0xff]  ;;  %v8181_v47 = vld [vmem:[%s11252_s2 + $0x178] sm:$0xff] }
 0x691   :  { %v8193_v48 = vld [vmem:[%s11252_s2 + $0x1d8] sm:$0xff] }
 0x692   :  { %v3904_v50 = vmax.f32 %v3896_v49, 0.0  ;;  %v8180_v49 = vld [vmem:[%s11252_s2 + $0x170] sm:$0xff] }
 0x694   :  { %9125 = vmatprep.mubr.msk.f32.mxu1 %vm3910_vm3, %v3904_v50  ;;  %v8192_v50 = vld [vmem:[%s11252_s2 + $0x1d0] sm:$0xff] }
 0x695   :  { %9126 = vmatmul.mubr.msk.f32.vlgmr.msra.gmra.mxu1 %vm3910_vm3, %v3905_v10  ;;  %v8179_v10 = vld [vmem:[%s11252_s2 + $0x168] sm:$0xff] }
 0x696   :  { %9158 = vmatprep.mubr.msk.f32.mxu1 %vm9663_vm1, %v9662_v2  ;;  %9151 = vmatpush3.msra.mxu1 %v8177_v3  ;;  %v8217_v3 = vld [vmem:[%s11253_s3 + $0x198] sm:$0xff] }
 0x697   :  { %9152 = vmatprep.subr.mxu1 %v9662_v2 }
 0x698   :  { %9153 = vmatpush3.msra.mxu1 %v8176_v5  ;;  %v8216_v5 = vld [vmem:[%s11253_s3 + $0x190] sm:$0xff] }
 0x699   :  { %9154 = vmatprep.subr.mxu1 %v9662_v2 }
 0x69a   :  { %9155 = vmatpush3.msra.mxu1 %v8175_v7  ;;  %v8215_v7 = vld [vmem:[%s11253_s3 + $0x188] sm:$0xff] }
 0x69b   :  { %9156 = vmatprep.subr.mxu1 %v9662_v2 }
 0x69c   :  { %9157 = vmatpush3.msra.mxu1 %v8174_v12  ;;  %v8214_v12 = vld [vmem:[%s11253_s3 + $0x180] sm:$0xff] }
 0x69d   :  { %9172 = vmatprep.subr.mxu1 %v9662_v2 }
 0x755   :  { %v9127_v53 = vpop.f32.mrf.mxu1 }
 0x756   :  { %v3989_v8 = vadd.f32 %v9127_v53, %v3909_v52  ;;  %v8178_v53 = vld [vmem:[%s11252_s2 + $0x160] sm:$0xff] }
 0x757   :  { %v3983_v54 = vpop.f32.mrf.mxu1 }
 0x758   :  { %v3984_v55 = vadd.f32 %v3983_v54, %v3909_v52  ;;  %v3993_v56 = vadd.f32 %v3989_v8, %v3816_v36  ;;  %v8191_v52 = vld [vmem:[%s11252_s2 + $0x1c8] sm:$0xff]  ;;  %v8190_v8 = vld [vmem:[%s11252_s2 + $0x1c0] sm:$0xff]  ;;  %v8189_v54 = vld [vmem:[%s11252_s2 + $0x1b8] sm:$0xff] }
 0x75a   :  { %v3997_v57 = vsel %vm164_vm0, %v3993_v56, 0.0  ;;  %v3992_v13 = vadd.f32 %v3984_v55, %v3815_v37  ;;  %v8184_v37 = vld [vmem:[%s11252_s2 + $0x190] sm:$0xff]  ;;  %v8201_v55 = vld [vmem:[%s11253_s3 + $0x118] sm:$0xff] }
 0x75b   :  { %3998 = vadd.xlane.f32.xlu1 %v3997_v57  ;;  %v8200_v57 = vld [vmem:[%s11253_s3 + $0x110] sm:$0xff] }
 0x75c   :  { %v3994_v14 = vsel %vm164_vm0, %v3992_v13, 0.0 }
 0x75d   :  { %3995 = vadd.xlane.f32.xlu0 %v3994_v14  ;;  %v8199_v14 = vld [vmem:[%s11253_s3 + $0x108] sm:$0xff] }
 0x7e4   :  { %v3999_v58 = vpop.xlane.xlu1 %3998 }
 0x7e5   :  { %v4001_v59 = vmul.f32 0.03125, %v3999_v58  ;;  %v8186_v58 = vld [vmem:[%s11252_s2 + $0x1a0] sm:$0xff] }
 0x7e6   :  { %v3996_v60 = vpop.xlane.xlu0 %3995 }
 0x7e7   :  { %v4003_v19 = vsub.f32 %v3993_v56, %v4001_v59  ;;  %v4000_v61 = vmul.f32 0.03125, %v3996_v60  ;;  %v8188_v56 = vld [vmem:[%s11252_s2 + $0x1b0] sm:$0xff]  ;;  %v8198_v59 = vld [vmem:[%s11253_s3 + $0x100] sm:$0xff]  ;;  %v8197_v60 = vld [vmem:[%s11252_s2 + $0x1f8] sm:$0xff] }
 0x7e9   :  { %v4002_v62 = vsub.f32 %v3992_v13, %v4000_v61  ;;  %v4005_v63 = vmul.f32 %v4003_v19, %v4003_v19  ;;  %v8187_v13 = vld [vmem:[%s11252_s2 + $0x1a8] sm:$0xff]  ;;  %v8196_v61 = vld [vmem:[%s11252_s2 + $0x1f0] sm:$0xff] }
 0x7eb   :  { %v4009_v17 = vsel %vm164_vm0, %v4005_v63, 0.0  ;;  %v4004_v21 = vmul.f32 %v4002_v62, %v4002_v62  ;;  %v8195_v63 = vld [vmem:[%s11252_s2 + $0x1e8] sm:$0xff] }
 0x7ec   :  { %4010 = vadd.xlane.f32.xlu1 %v4009_v17  ;;  %v8207_v17 = vld [vmem:[%s11253_s3 + $0x148] sm:$0xff] }
 0x7ed   :  { %v4006_v0 = vsel %vm164_vm0, %v4004_v21, 0.0  ;;  %v8194_v21 = vld [vmem:[%s11252_s2 + $0x1e0] sm:$0xff] }
 0x7ee   :  { %4007 = vadd.xlane.f32.xlu0 %v4006_v0  ;;  %v8206_v0 = vld [vmem:[%s11253_s3 + $0x140] sm:$0xff] }
 0x875   :  { %v4011_v15 = vpop.xlane.xlu1 %4010 }
 0x876   :  { %v4013_v16 = vmul.f32 0.03125, %v4011_v15  ;;  %v8213_v15 = vld [vmem:[%s11253_s3 + $0x178] sm:$0xff] }
 0x877   :  { %v4008_v18 = vpop.xlane.xlu0 %4007 }
 0x878   :  { %v4012_v20 = vmul.f32 0.03125, %v4008_v18  ;;  %v4015_v23 = vadd.f32 1e-06, %v4013_v16  ;;  %v8225_v16 = vld [vmem:[%s11253_s3 + $0x1d8] sm:$0xff]  ;;  %v8212_v18 = vld [vmem:[%s11253_s3 + $0x170] sm:$0xff] }
 0x87a   :  { %v4014_v22 = vadd.f32 1e-06, %v4012_v20  ;;  %v8224_v20 = vld [vmem:[%s11253_s3 + $0x1d0] sm:$0xff] }
 0x87c   :  { %9586 = vrsqrt.f32 %v4014_v22  ;;  %v8211_v22 = vld [vmem:[%s11253_s3 + $0x168] sm:$0xff] }
 0x87d   :  { %9588 = vrsqrt.f32 %v4015_v23  ;;  %v8223_v23 = vld [vmem:[%s11253_s3 + $0x1c8] sm:$0xff] }
 0x889   :  { %v9587_v26 = vpop.eup %9586 }
 0x88a   :  { %v4018_v30 = vmul.f32 %v9587_v26, %v4002_v62  ;;  %v9589_v31 = vpop.eup %9588  ;;  %v8208_v62 = vld [vmem:[%s11253_s3 + $0x150] sm:$0xff]  ;;  %v8210_v26 = vld [vmem:[%s11253_s3 + $0x160] sm:$0xff] }
 0x88b   :  { %v4019_v36 = vmul.f32 %v9589_v31, %v4003_v19  ;;  %v8209_v19 = vld [vmem:[%s11253_s3 + $0x158] sm:$0xff] }
 0x88c   :  { %v4024_v33 = vmul.f32 %v4023_v29, %v4018_v30  ;;  %v8221_v30 = vld [vmem:[%s11253_s3 + $0x1b8] sm:$0xff] }
 0x88d   :  { %v4025_v40 = vmul.f32 %v4023_v29, %v4019_v36  ;;  %v8222_v29 = vld [vmem:[%s11253_s3 + $0x1c0] sm:$0xff]  ;;  %v8233_v31 = vld [vmem:[%s11254_s4 + $0x118] sm:$0xff] }
 0x88e   :  { %v10527_v34 = vadd.f32 %v4029_v32, %v4024_v33  ;;  %v8232_v33 = vld [vmem:[%s11254_s4 + $0x110] sm:$0xff]  ;;  %v8218_v36 = vld [vmem:[%s11253_s3 + $0x1a0] sm:$0xff] }
 0x88f   :  { %v10563_v46 = vadd.f32 %v4029_v32, %v4025_v40  ;;  %v8220_v32 = vld [vmem:[%s11253_s3 + $0x1b0] sm:$0xff] }
 0x890   :  { %9137 = vmatmul.mubr.msk.f32.vlgmr.msra.gmra.mxu0 %vm164_vm0, %v10527_v34  ;;  %9159 = vmatmul.mubr.msk.f32.vlgmr.msra.gmra.mxu1 %vm164_vm0, %v10527_v34  ;;  %v8240_v40 = vld [vmem:[%s11254_s4 + $0x150] sm:$0xff] }
 0x891   :  { %9140 = vmatpush3.msra.mxu0 %v8173_v35  ;;  %9173 = vmatpush3.msra.mxu1 %v8185_v9  ;;  %v8219_v35 = vld [vmem:[%s11253_s3 + $0x1a8] sm:$0xff] }
 0x892   :  { %9141 = vmatprep.subr.mxu0 %v9662_v2  ;;  %9174 = vmatprep.subr.mxu1 %v9662_v2  ;;  %v8231_v9 = vld [vmem:[%s11254_s4 + $0x108] sm:$0xff] }
 0x893   :  { %9142 = vmatpush3.msra.mxu0 %v8172_v45  ;;  %9175 = vmatpush3.msra.mxu1 %v8184_v37  ;;  %v8230_v45 = vld [vmem:[%s11254_s4 + $0x100] sm:$0xff]  ;;  %v8229_v37 = vld [vmem:[%s11253_s3 + $0x1f8] sm:$0xff] }
 0x894   :  { %9143 = vmatprep.subr.mxu0 %v9662_v2  ;;  %9176 = vmatprep.subr.mxu1 %v9662_v2 }
 0x895   :  { %9144 = vmatpush3.msra.mxu0 %v8171_v38  ;;  %9177 = vmatpush3.msra.mxu1 %v8183_v39  ;;  %v8241_v38 = vld [vmem:[%s11254_s4 + $0x158] sm:$0xff]  ;;  %v8228_v39 = vld [vmem:[%s11253_s3 + $0x1f0] sm:$0xff] }
 0x896   :  { %9145 = vmatprep.subr.mxu0 %v9662_v2  ;;  %9178 = vmatprep.subr.mxu1 %v9662_v2 }
 0x897   :  { %9146 = vmatpush3.msra.mxu0 %v8170_v42  ;;  %9147 = vmatprep.mubr.msk.f32.mxu0 %vm9663_vm1, %v9662_v2  ;;  %v8227_v42 = vld [vmem:[%s11253_s3 + $0x1e8] sm:$0xff] }
 0x898   :  { %9179 = vmatpush3.msra.mxu1 %v8182_v43  ;;  %9180 = vmatprep.mubr.msk.f32.mxu1 %vm9663_vm1, %v9662_v2  ;;  %v8239_v43 = vld [vmem:[%s11254_s4 + $0x148] sm:$0xff] }
 0x899   :  { %9148 = vmatmul.mubr.msk.f32.vlgmr.msra.gmra.mxu0 %vm164_vm0, %v10563_v46  ;;  %9161 = vmatprep.subr.mxu0 %v9662_v2 }
 0x89a   :  { %9181 = vmatmul.mubr.msk.f32.vlgmr.msra.gmra.mxu1 %vm164_vm0, %v10527_v34  ;;  %9194 = vmatprep.subr.mxu1 %v9662_v2 }
 0x89b   :  { %9162 = vmatpush3.msra.mxu0 %v8181_v47  ;;  %9195 = vmatpush3.msra.mxu1 %v8193_v48  ;;  %v8226_v47 = vld [vmem:[%s11253_s3 + $0x1e0] sm:$0xff] }
 0x89c   :  { %9163 = vmatprep.subr.mxu0 %v9662_v2  ;;  %9196 = vmatprep.subr.mxu1 %v9662_v2  ;;  %v8238_v48 = vld [vmem:[%s11254_s4 + $0x140] sm:$0xff] }
 0x89d   :  { %9164 = vmatpush3.msra.mxu0 %v8180_v49  ;;  %9197 = vmatpush3.msra.mxu1 %v8192_v50  ;;  %v8237_v49 = vld [vmem:[%s11254_s4 + $0x138] sm:$0xff] }
 0x89e   :  { %9165 = vmatprep.subr.mxu0 %v9662_v2  ;;  %9198 = vmatprep.subr.mxu1 %v9662_v2  ;;  %v8249_v50 = vld [vmem:[%s11254_s4 + $0x198] sm:$0xff] }
 0x89f   :  { %9166 = vmatpush3.msra.mxu0 %v8179_v10  ;;  %9199 = vmatpush3.msra.mxu1 %v8191_v52  ;;  %v8236_v10 = vld [vmem:[%s11254_s4 + $0x130] sm:$0xff] }
 0x8a0   :  { %9167 = vmatprep.subr.mxu0 %v9662_v2  ;;  %9200 = vmatprep.subr.mxu1 %v9662_v2  ;;  %v8248_v52 = vld [vmem:[%s11254_s4 + $0x190] sm:$0xff] }
 0x8a1   :  { %9168 = vmatpush3.msra.mxu0 %v8178_v53  ;;  %9169 = vmatprep.mubr.msk.f32.mxu0 %vm9663_vm1, %v9662_v2  ;;  %v8235_v53 = vld [vmem:[%s11254_s4 + $0x128] sm:$0xff] }
 0x8a2   :  { %9201 = vmatpush3.msra.mxu1 %v8190_v8  ;;  %9202 = vmatprep.mubr.msk.f32.mxu1 %vm9663_vm1, %v9662_v2  ;;  %v8247_v8 = vld [vmem:[%s11254_s4 + $0x188] sm:$0xff] }
 0x8a3   :  { %9170 = vmatmul.mubr.msk.f32.vlgmr.msra.gmra.mxu0 %vm164_vm0, %v10563_v46  ;;  %9183 = vmatprep.subr.mxu0 %v9662_v2 }
 0x8a4   :  { %9203 = vmatmul.mubr.msk.f32.vlgmr.msra.gmra.mxu1 %vm164_vm0, %v10527_v34  ;;  %9216 = vmatprep.subr.mxu1 %v9662_v2 }
 0x8a5   :  { %9184 = vmatpush3.msra.mxu0 %v8189_v54  ;;  %9217 = vmatpush3.msra.mxu1 %v8201_v55  ;;  %v8234_v54 = vld [vmem:[%s11254_s4 + $0x120] sm:$0xff] }
 0x8a6   :  { %9185 = vmatprep.subr.mxu0 %v9662_v2  ;;  %9218 = vmatprep.subr.mxu1 %v9662_v2  ;;  %v8246_v55 = vld [vmem:[%s11254_s4 + $0x180] sm:$0xff] }
 0x8a7   :  { %9186 = vmatpush3.msra.mxu0 %v8188_v56  ;;  %9219 = vmatpush3.msra.mxu1 %v8200_v57  ;;  %v8245_v56 = vld [vmem:[%s11254_s4 + $0x178] sm:$0xff] }
 0x8a8   :  { %9187 = vmatprep.subr.mxu0 %v9662_v2  ;;  %9220 = vmatprep.subr.mxu1 %v9662_v2  ;;  %v8257_v57 = vld [vmem:[%s11254_s4 + $0x1d8] sm:$0xff] }
 0x8a9   :  { %9188 = vmatpush3.msra.mxu0 %v8187_v13  ;;  %9221 = vmatpush3.msra.mxu1 %v8199_v14  ;;  %v8244_v13 = vld [vmem:[%s11254_s4 + $0x170] sm:$0xff] }
 0x8aa   :  { %9189 = vmatprep.subr.mxu0 %v9662_v2  ;;  %9222 = vmatprep.subr.mxu1 %v9662_v2  ;;  %v8256_v14 = vld [vmem:[%s11254_s4 + $0x1d0] sm:$0xff] }
 0x8ab   :  { %9190 = vmatpush3.msra.mxu0 %v8186_v58  ;;  %9191 = vmatprep.mubr.msk.f32.mxu0 %vm9663_vm1, %v9662_v2  ;;  %v8243_v58 = vld [vmem:[%s11254_s4 + $0x168] sm:$0xff] }
 0x8ac   :  { %9223 = vmatpush3.msra.mxu1 %v8198_v59  ;;  %9224 = vmatprep.mubr.msk.f32.mxu1 %vm9663_vm1, %v9662_v2  ;;  %v8255_v59 = vld [vmem:[%s11254_s4 + $0x1c8] sm:$0xff] }
 0x8ad   :  { %9192 = vmatmul.mubr.msk.f32.vlgmr.msra.gmra.mxu0 %vm164_vm0, %v10563_v46  ;;  %9205 = vmatprep.subr.mxu0 %v9662_v2 }
 0x8ae   :  { %9225 = vmatmul.mubr.msk.f32.vlgmr.msra.gmra.mxu1 %vm164_vm0, %v10527_v34  ;;  %9238 = vmatprep.subr.mxu1 %v9662_v2 }
 0x8af   :  { %9206 = vmatpush3.msra.mxu0 %v8197_v60  ;;  %9239 = vmatpush3.msra.mxu1 %v8209_v19  ;;  %v8242_v60 = vld [vmem:[%s11254_s4 + $0x160] sm:$0xff] }
 0x8b0   :  { %9207 = vmatprep.subr.mxu0 %v9662_v2  ;;  %9240 = vmatprep.subr.mxu1 %v9662_v2  ;;  %v8254_v19 = vld [vmem:[%s11254_s4 + $0x1c0] sm:$0xff] }
 0x8b1   :  { %9208 = vmatpush3.msra.mxu0 %v8196_v61  ;;  %9241 = vmatpush3.msra.mxu1 %v8208_v62  ;;  %v8253_v61 = vld [vmem:[%s11254_s4 + $0x1b8] sm:$0xff]  ;;  %v8252_v62 = vld [vmem:[%s11254_s4 + $0x1b0] sm:$0xff] }
 0x8b2   :  { %9209 = vmatprep.subr.mxu0 %v9662_v2  ;;  %9242 = vmatprep.subr.mxu1 %v9662_v2 }
 0x8b3   :  { %9210 = vmatpush3.msra.mxu0 %v8195_v63  ;;  %9243 = vmatpush3.msra.mxu1 %v8207_v17  ;;  %v8251_v63 = vld [vmem:[%s11254_s4 + $0x1a8] sm:$0xff]  ;;  %v8250_v17 = vld [vmem:[%s11254_s4 + $0x1a0] sm:$0xff] }
 0x8b4   :  { %9211 = vmatprep.subr.mxu0 %v9662_v2  ;;  %9244 = vmatprep.subr.mxu1 %v9662_v2 }
 0x8b5   :  { %9212 = vmatpush3.msra.mxu0 %v8194_v21  ;;  %9213 = vmatprep.mubr.msk.f32.mxu0 %vm9663_vm1, %v9662_v2  ;;  %v8261_v21 = vld [vmem:[%s11254_s4 + $0x1f8] sm:$0xff] }
 0x8b6   :  { %9245 = vmatpush3.msra.mxu1 %v8206_v0  ;;  %9246 = vmatprep.mubr.msk.f32.mxu1 %vm9663_vm1, %v9662_v2  ;;  %v8260_v0 = vld [vmem:[%s11254_s4 + $0x1f0] sm:$0xff] }
 0x8b7   :  { %9214 = vmatmul.mubr.msk.f32.vlgmr.msra.gmra.mxu0 %vm164_vm0, %v10563_v46  ;;  %9227 = vmatprep.subr.mxu0 %v9662_v2 }
 0x8b8   :  { %9247 = vmatmul.mubr.msk.f32.vlgmr.msra.gmra.mxu1 %vm164_vm0, %v10527_v34  ;;  %9260 = vmatprep.subr.mxu1 %v9662_v2 }
 0x8b9   :  { %9228 = vmatpush3.msra.mxu0 %v8205_v1  ;;  %9261 = vmatpush3.msra.mxu1 %v8217_v3  ;;  %v8259_v1 = vld [vmem:[%s11254_s4 + $0x1e8] sm:$0xff]  ;;  %v8258_v3 = vld [vmem:[%s11254_s4 + $0x1e0] sm:$0xff] }
 0x8ba   :  { %9229 = vmatprep.subr.mxu0 %v9662_v2  ;;  %9262 = vmatprep.subr.mxu1 %v9662_v2 }
 0x8bb   :  { %9230 = vmatpush3.msra.mxu0 %v8204_v4  ;;  %9263 = vmatpush3.msra.mxu1 %v8216_v5 }
 0x8bc   :  { %9231 = vmatprep.subr.mxu0 %v9662_v2  ;;  %9264 = vmatprep.subr.mxu1 %v9662_v2 }
 0x8bd   :  { %9232 = vmatpush3.msra.mxu0 %v8203_v6  ;;  %9265 = vmatpush3.msra.mxu1 %v8215_v7 }
 0x8be   :  { %9233 = vmatprep.subr.mxu0 %v9662_v2  ;;  %9266 = vmatprep.subr.mxu1 %v9662_v2 }
 0x8bf   :  { %9234 = vmatpush3.msra.mxu0 %v8202_v11  ;;  %9235 = vmatprep.mubr.msk.f32.mxu0 %vm9663_vm1, %v9662_v2 }
 0x8c0   :  { %9267 = vmatpush3.msra.mxu1 %v8214_v12  ;;  %9268 = vmatprep.mubr.msk.f32.mxu1 %vm9663_vm1, %v9662_v2 }
 0x8c1   :  { %9236 = vmatmul.mubr.msk.f32.vlgmr.msra.gmra.mxu0 %vm164_vm0, %v10563_v46  ;;  %9249 = vmatprep.subr.mxu0 %v9662_v2 }
 0x8c2   :  { %9269 = vmatmul.mubr.msk.f32.vlgmr.msra.gmra.mxu1 %vm164_vm0, %v10527_v34  ;;  %9282 = vmatprep.subr.mxu1 %v9662_v2 }
 0x8c3   :  { %9250 = vmatpush3.msra.mxu0 %v8213_v15  ;;  %9283 = vmatpush3.msra.mxu1 %v8225_v16 }
 0x8c4   :  { %9251 = vmatprep.subr.mxu0 %v9662_v2  ;;  %9284 = vmatprep.subr.mxu1 %v9662_v2 }
 0x8c5   :  { %9252 = vmatpush3.msra.mxu0 %v8212_v18  ;;  %9285 = vmatpush3.msra.mxu1 %v8224_v20 }
 0x8c6   :  { %9253 = vmatprep.subr.mxu0 %v9662_v2  ;;  %9286 = vmatprep.subr.mxu1 %v9662_v2 }
 0x8c7   :  { %9254 = vmatpush3.msra.mxu0 %v8211_v22  ;;  %9287 = vmatpush3.msra.mxu1 %v8223_v23 }
 0x8c8   :  { %9255 = vmatprep.subr.mxu0 %v9662_v2  ;;  %9288 = vmatprep.subr.mxu1 %v9662_v2 }
 0x8c9   :  { %9256 = vmatpush3.msra.mxu0 %v8210_v26  ;;  %9257 = vmatprep.mubr.msk.f32.mxu0 %vm9663_vm1, %v9662_v2 }
 0x8ca   :  { %9289 = vmatpush3.msra.mxu1 %v8222_v29  ;;  %9290 = vmatprep.mubr.msk.f32.mxu1 %vm9663_vm1, %v9662_v2 }
 0x8cb   :  { %9258 = vmatmul.mubr.msk.f32.vlgmr.msra.gmra.mxu0 %vm164_vm0, %v10563_v46  ;;  %9271 = vmatprep.subr.mxu0 %v9662_v2 }
 0x8cc   :  { %9291 = vmatmul.mubr.msk.f32.vlgmr.msra.gmra.mxu1 %vm164_vm0, %v10527_v34  ;;  %9304 = vmatprep.subr.mxu1 %v9662_v2 }
 0x8cd   :  { %9272 = vmatpush3.msra.mxu0 %v8221_v30  ;;  %9305 = vmatpush3.msra.mxu1 %v8233_v31 }
 0x8ce   :  { %9273 = vmatprep.subr.mxu0 %v9662_v2  ;;  %9306 = vmatprep.subr.mxu1 %v9662_v2 }
 0x8cf   :  { %9274 = vmatpush3.msra.mxu0 %v8220_v32  ;;  %9307 = vmatpush3.msra.mxu1 %v8232_v33 }
 0x8d0   :  { %9275 = vmatprep.subr.mxu0 %v9662_v2  ;;  %9308 = vmatprep.subr.mxu1 %v9662_v2 }
 0x8d1   :  { %9276 = vmatpush3.msra.mxu0 %v8219_v35  ;;  %9309 = vmatpush3.msra.mxu1 %v8231_v9 }
 0x8d2   :  { %9277 = vmatprep.subr.mxu0 %v9662_v2  ;;  %9310 = vmatprep.subr.mxu1 %v9662_v2 }
 0x8d3   :  { %9278 = vmatpush3.msra.mxu0 %v8218_v36  ;;  %9279 = vmatprep.mubr.msk.f32.mxu0 %vm9663_vm1, %v9662_v2 }
 0x8d4   :  { %9311 = vmatpush3.msra.mxu1 %v8230_v45  ;;  %9312 = vmatprep.mubr.msk.f32.mxu1 %vm9663_vm1, %v9662_v2 }
 0x8d5   :  { %9280 = vmatmul.mubr.msk.f32.vlgmr.msra.gmra.mxu0 %vm164_vm0, %v10563_v46  ;;  %9293 = vmatprep.subr.mxu0 %v9662_v2 }
 0x8d6   :  { %9313 = vmatmul.mubr.msk.f32.vlgmr.msra.gmra.mxu1 %vm164_vm0, %v10527_v34  ;;  %9326 = vmatprep.subr.mxu1 %v9662_v2 }
 0x8d7   :  { %9294 = vmatpush3.msra.mxu0 %v8229_v37  ;;  %9327 = vmatpush3.msra.mxu1 %v8241_v38 }
 0x8d8   :  { %9295 = vmatprep.subr.mxu0 %v9662_v2  ;;  %9328 = vmatprep.subr.mxu1 %v9662_v2 }
 0x8d9   :  { %9296 = vmatpush3.msra.mxu0 %v8228_v39  ;;  %9329 = vmatpush3.msra.mxu1 %v8240_v40 }
 0x8da   :  { %9297 = vmatprep.subr.mxu0 %v9662_v2  ;;  %9330 = vmatprep.subr.mxu1 %v9662_v2 }
 0x8db   :  { %9298 = vmatpush3.msra.mxu0 %v8227_v42  ;;  %9331 = vmatpush3.msra.mxu1 %v8239_v43 }
 0x8dc   :  { %9299 = vmatprep.subr.mxu0 %v9662_v2  ;;  %9332 = vmatprep.subr.mxu1 %v9662_v2 }
 0x8dd   :  { %9300 = vmatpush3.msra.mxu0 %v8226_v47  ;;  %9301 = vmatprep.mubr.msk.f32.mxu0 %vm9663_vm1, %v9662_v2 }
 0x8de   :  { %9333 = vmatpush3.msra.mxu1 %v8238_v48  ;;  %9334 = vmatprep.mubr.msk.f32.mxu1 %vm9663_vm1, %v9662_v2 }
 0x8df   :  { %9302 = vmatmul.mubr.msk.f32.vlgmr.msra.gmra.mxu0 %vm164_vm0, %v10563_v46  ;;  %9315 = vmatprep.subr.mxu0 %v9662_v2 }
 0x8e0   :  { %9335 = vmatmul.mubr.msk.f32.vlgmr.msra.gmra.mxu1 %vm164_vm0, %v10527_v34  ;;  %9348 = vmatprep.subr.mxu1 %v9662_v2 }
 0x8e1   :  { %9316 = vmatpush3.msra.mxu0 %v8237_v49  ;;  %9349 = vmatpush3.msra.mxu1 %v8249_v50 }
 0x8e2   :  { %9317 = vmatprep.subr.mxu0 %v9662_v2  ;;  %9350 = vmatprep.subr.mxu1 %v9662_v2 }
 0x8e3   :  { %9318 = vmatpush3.msra.mxu0 %v8236_v10  ;;  %9351 = vmatpush3.msra.mxu1 %v8248_v52 }
 0x8e4   :  { %9319 = vmatprep.subr.mxu0 %v9662_v2  ;;  %9352 = vmatprep.subr.mxu1 %v9662_v2 }
 0x8e5   :  { %9320 = vmatpush3.msra.mxu0 %v8235_v53  ;;  %9353 = vmatpush3.msra.mxu1 %v8247_v8 }
 0x8e6   :  { %9321 = vmatprep.subr.mxu0 %v9662_v2  ;;  %9354 = vmatprep.subr.mxu1 %v9662_v2 }
 0x8e7   :  { %9322 = vmatpush3.msra.mxu0 %v8234_v54  ;;  %9323 = vmatprep.mubr.msk.f32.mxu0 %vm9663_vm1, %v9662_v2 }
 0x8e8   :  { %9355 = vmatpush3.msra.mxu1 %v8246_v55  ;;  %9356 = vmatprep.mubr.msk.f32.mxu1 %vm9663_vm1, %v9662_v2 }
 0x8e9   :  { %9324 = vmatmul.mubr.msk.f32.vlgmr.msra.gmra.mxu0 %vm164_vm0, %v10563_v46  ;;  %9337 = vmatprep.subr.mxu0 %v9662_v2 }
 0x8ea   :  { %9357 = vmatmul.mubr.msk.f32.vlgmr.msra.gmra.mxu1 %vm164_vm0, %v10527_v34  ;;  %9370 = vmatprep.subr.mxu1 %v9662_v2 }
 0x8eb   :  { %9338 = vmatpush3.msra.mxu0 %v8245_v56  ;;  %9371 = vmatpush3.msra.mxu1 %v8257_v57 }
 0x8ec   :  { %9339 = vmatprep.subr.mxu0 %v9662_v2  ;;  %9372 = vmatprep.subr.mxu1 %v9662_v2 }
 0x8ed   :  { %9340 = vmatpush3.msra.mxu0 %v8244_v13  ;;  %9373 = vmatpush3.msra.mxu1 %v8256_v14 }
 0x8ee   :  { %9341 = vmatprep.subr.mxu0 %v9662_v2  ;;  %9374 = vmatprep.subr.mxu1 %v9662_v2 }
 0x8ef   :  { %9342 = vmatpush3.msra.mxu0 %v8243_v58  ;;  %9375 = vmatpush3.msra.mxu1 %v8255_v59 }
 0x8f0   :  { %9343 = vmatprep.subr.mxu0 %v9662_v2  ;;  %9376 = vmatprep.subr.mxu1 %v9662_v2 }
 0x8f1   :  { %9344 = vmatpush3.msra.mxu0 %v8242_v60  ;;  %9345 = vmatprep.mubr.msk.f32.mxu0 %vm9663_vm1, %v9662_v2 }
 0x8f2   :  { %9377 = vmatpush3.msra.mxu1 %v8254_v19  ;;  %9378 = vmatprep.mubr.msk.f32.mxu1 %vm9663_vm1, %v9662_v2 }
 0x8f3   :  { %9346 = vmatmul.mubr.msk.f32.vlgmr.msra.gmra.mxu0 %vm164_vm0, %v10563_v46  ;;  %9359 = vmatprep.subr.mxu0 %v9662_v2 }
 0x8f4   :  { %9379 = vmatmul.mubr.msk.f32.vlgmr.msra.gmra.mxu1 %vm164_vm0, %v10527_v34  ;;  %9360 = vmatpush3.msra.mxu0 %v8253_v61 }
 0x8f5   :  { %9361 = vmatprep.subr.mxu0 %v9662_v2  ;;  %9367 = vmatprep.mubr.msk.f32.mxu0 %vm9663_vm1, %v9662_v2 }
 0x8f6   :  { %9362 = vmatpush3.msra.mxu0 %v8252_v62  ;;  %9392 = vmatprep.subr.mxu1 %v9662_v2 }
 0x8f7   :  { %9363 = vmatprep.subr.mxu0 %v9662_v2  ;;  %9394 = vmatprep.mubr.msk.f32.mxu1 %vm9663_vm1, %v9662_v2 }
 0x8f8   :  { %9364 = vmatpush3.msra.mxu0 %v8251_v63 }
 0x8f9   :  { %9365 = vmatprep.subr.mxu0 %v9662_v2 }
 0x8fa   :  { %9366 = vmatpush3.msra.mxu0 %v8250_v17  ;;  %v9632_v17 = vld [vmem:[%s11251_s1] ss:$0 sm:$0xff] }
 0x8fb   :  { %9368 = vmatmul.mubr.msk.f32.vlgmr.msra.gmra.mxu0 %vm164_vm0, %v10563_v46  ;;  %9381 = vmatprep.subr.mxu0 %v9662_v2 }
 0x8fc   :  { %9382 = vmatpush3.msra.mxu0 %v8261_v21  ;;  %9389 = vmatprep.mubr.msk.f32.mxu0 %vm9663_vm1, %v9662_v2 }
 0x8fd   :  { %9383 = vmatprep.subr.mxu0 %v9662_v2 }
 0x8fe   :  { %9384 = vmatpush3.msra.mxu0 %v8260_v0 }
 0x8ff   :  { %9385 = vmatprep.subr.mxu0 %v9662_v2 }
 0x900   :  { %9386 = vmatpush3.msra.mxu0 %v8259_v1 }
 0x901   :  { %9387 = vmatprep.subr.mxu0 %v9662_v2 }
 0x902   :  { %9388 = vmatpush3.msra.mxu0 %v8258_v3 }
 0x903   :  { %9390 = vmatmul.mubr.msk.f32.vlgmr.msra.gmra.mxu0 %vm164_vm0, %v10563_v46  ;;  %9402 = vmatprep.subr.mxu0 %v9662_v2 }
 0x904   :  { %9404 = vmatprep.mubr.msk.f32.mxu0 %vm9663_vm1, %v9662_v2 }
 0x950   :  { %v4227_v4 = vpop.f32.mrf.mxu0  ;;  %v4370_v5 = vpop.f32.mrf.mxu1 }
 0x952   :  { %v9138_v6 = vpop.f32.mrf.mxu0  ;;  %v9160_v7 = vpop.f32.mrf.mxu1 }
 0x959   :  { %v4300_v11 = vpop.f32.mrf.mxu0 }
 0x95a   :  { %v4510_v12 = vpop.f32.mrf.mxu1 }
 0x95b   :  { %v9149_v15 = vpop.f32.mrf.mxu0 }
 0x95c   :  { %v9182_v16 = vpop.f32.mrf.mxu1 }
 0x963   :  { %v4440_v18 = vpop.f32.mrf.mxu0 }
 0x964   :  { %v4650_v20 = vpop.f32.mrf.mxu1 }
 0x965   :  { %v9171_v22 = vpop.f32.mrf.mxu0 }
 0x966   :  { %v9204_v23 = vpop.f32.mrf.mxu1 }
 0x96d   :  { %v4580_v26 = vpop.f32.mrf.mxu0 }
 0x96e   :  { %v4790_v29 = vpop.f32.mrf.mxu1 }
 0x96f   :  { %9393 = vmatpush3.xpose.msk.msra.mxu1 %vm1899_vm2, %v4790_v29  ;;  %v9193_v30 = vpop.f32.mrf.mxu0 }
 0x970   :  { %v9226_v31 = vpop.f32.mrf.mxu1  ;;  %9397 = vmatprep.subr.mxu1 %v9662_v2 }
 0x971   :  { %v9636_v31 = vld [vmem:[%s11251_s1 + $0x3] ss:$0 sm:$0xff] }
 0x972   :  { %9395 = vmatmul.mubr.msk.f32.vlgmr.msra.gmra.mxu1 %vm1899_vm2, %v4227_v4  ;;  %v9633_v4 = vld [vmem:[%s11251_s1 + $0x2] ss:$0 sm:$0xff] }
 0x973   :  { %9399 = vmatprep.mubr.msk.f32.mxu1 %vm9663_vm1, %v9662_v2 }
 0x977   :  { %v4720_v32 = vpop.f32.mrf.mxu0 }
 0x978   :  { %v4930_v33 = vpop.f32.mrf.mxu1 }
 0x979   :  { %9403 = vmatpush3.xpose.msk.msra.mxu0 %vm1899_vm2, %v4930_v33  ;;  %v9215_v35 = vpop.f32.mrf.mxu0 }
 0x97a   :  { %v9248_v9 = vpop.f32.mrf.mxu1  ;;  %9412 = vmatprep.subr.mxu0 %v9662_v2  ;;  %v9637_v35 = vld [vmem:[%s11251_s1 + $0x6] ss:$0 sm:$0xff] }
 0x97c   :  { %9405 = vmatmul.mubr.msk.f32.vlgmr.msra.gmra.mxu0 %vm1899_vm2, %v4370_v5 }
 0x97d   :  { %9414 = vmatprep.mubr.msk.f32.mxu0 %vm9663_vm1, %v9662_v2 }
 0x981   :  { %v4860_v36 = vpop.f32.mrf.mxu0 }
 0x982   :  { %v5070_v45 = vpop.f32.mrf.mxu1  ;;  %9398 = vmatpush3.xpose.msk.msra.mxu1 %vm1899_vm2, %v4860_v36 }
 0x983   :  { %9413 = vmatpush3.xpose.msk.msra.mxu0 %vm1899_vm2, %v5070_v45  ;;  %v9237_v37 = vpop.f32.mrf.mxu0  ;;  %9407 = vmatprep.subr.mxu1 %v9662_v2 }
 0x984   :  { %v9270_v38 = vpop.f32.mrf.mxu1  ;;  %9422 = vmatprep.subr.mxu0 %v9662_v2 }
 0x985   :  { %9400 = vmatmul.mubr.msk.f32.vlgmr.msra.gmra.mxu1 %vm1899_vm2, %v4300_v11 }
 0x986   :  { %9415 = vmatmul.mubr.msk.f32.vlgmr.msra.gmra.mxu0 %vm1899_vm2, %v4510_v12  ;;  %9409 = vmatprep.mubr.msk.f32.mxu1 %vm9663_vm1, %v9662_v2  ;;  %v9634_v12 = vld [vmem:[%s11251_s1 + $0x1] ss:$0 sm:$0xff] }
 0x987   :  { %9424 = vmatprep.mubr.msk.f32.mxu0 %vm9663_vm1, %v9662_v2 }
 0x98b   :  { %v5000_v39 = vpop.f32.mrf.mxu0 }
 0x98c   :  { %v5210_v40 = vpop.f32.mrf.mxu1  ;;  %9408 = vmatpush3.xpose.msk.msra.mxu1 %vm1899_vm2, %v5000_v39 }
 0x98d   :  { %9423 = vmatpush3.xpose.msk.msra.mxu0 %vm1899_vm2, %v5210_v40  ;;  %v9259_v42 = vpop.f32.mrf.mxu0  ;;  %9417 = vmatprep.subr.mxu1 %v9662_v2  ;;  %v9638_v40 = vld [vmem:[%s11251_s1 + $0x5] ss:$0 sm:$0xff] }
 0x98e   :  { %v9292_v43 = vpop.f32.mrf.mxu1  ;;  %9432 = vmatprep.subr.mxu0 %v9662_v2 }
 0x98f   :  { %9410 = vmatmul.mubr.msk.f32.vlgmr.msra.gmra.mxu1 %vm1899_vm2, %v4440_v18  ;;  %v9635_v18 = vld [vmem:[%s11251_s1 + $0x4] ss:$0 sm:$0xff] }
 0x990   :  { %9425 = vmatmul.mubr.msk.f32.vlgmr.msra.gmra.mxu0 %vm1899_vm2, %v4650_v20  ;;  %9419 = vmatprep.mubr.msk.f32.mxu1 %vm9663_vm1, %v9662_v2 }
 0x991   :  { %9434 = vmatprep.mubr.msk.f32.mxu0 %vm9663_vm1, %v9662_v2 }
 0x995   :  { %v5140_v47 = vpop.f32.mrf.mxu0 }
 0x996   :  { %v5350_v48 = vpop.f32.mrf.mxu1  ;;  %9418 = vmatpush3.xpose.msk.msra.mxu1 %vm1899_vm2, %v5140_v47 }
 0x997   :  { %9433 = vmatpush3.msra.mxu0 %v5350_v48  ;;  %v9281_v49 = vpop.f32.mrf.mxu0  ;;  %9427 = vmatprep.subr.mxu1 %v9662_v2 }
 0x998   :  { %v9314_v50 = vpop.f32.mrf.mxu1  ;;  %9442 = vmatprep.subr.mxu0 %v9662_v2  ;;  %v9639_v49 = vld [vmem:[%s11251_s1 + $0x7] ss:$0 sm:$0xff] }
 0x999   :  { %9420 = vmatmul.mubr.msk.f32.vlgmr.msra.gmra.mxu1 %vm1899_vm2, %v4580_v26 }
 0x99a   :  { %9429 = vmatprep.mubr.msk.f32.mxu1 %vm9663_vm1, %v9662_v2 }
 0x99f   :  { %v5280_v10 = vpop.f32.mrf.mxu0 }
 0x9a0   :  { %v11015_v52 = vpop.f32.mrf.mxu1  ;;  %9428 = vmatpush3.xpose.msk.msra.mxu1 %vm1899_vm2, %v5280_v10 }
 0x9a1   :  { %v9303_v53 = vpop.f32.mrf.mxu0  ;;  %9437 = vmatprep.subr.mxu1 %v9662_v2 }
 0x9a2   :  { %v9336_v8 = vpop.f32.mrf.mxu1 }
 0x9a3   :  { %9430 = vmatmul.mubr.msk.f32.vlgmr.msra.gmra.mxu1 %vm1899_vm2, %v4720_v32 }
 0x9a4   :  { %9439 = vmatprep.mubr.msk.f32.mxu1 %vm9663_vm1, %v9662_v2 }
 0x9a9   :  { %v5420_v54 = vpop.f32.mrf.mxu0 }
 0x9aa   :  { %v11022_v55 = vpop.f32.mrf.mxu1  ;;  %9438 = vmatpush3.msra.mxu1 %v5420_v54 }
 0x9ab   :  { %v9325_v56 = vpop.f32.mrf.mxu0  ;;  %9447 = vmatprep.subr.mxu1 %v9662_v2 }
 0x9ac   :  { %v9358_v57 = vpop.f32.mrf.mxu1 }
 0x9b3   :  { %v11025_v13 = vpop.f32.mrf.mxu0 }
 0x9b4   :  { %v11027_v14 = vpop.f32.mrf.mxu1 }
 0x9b5   :  { %v9347_v58 = vpop.f32.mrf.mxu0 }
 0x9b6   :  { %v9380_v59 = vpop.f32.mrf.mxu1 }
 0x9bb   :  { %v11029_v60 = vpop.f32.mrf.mxu0 }
 0x9bd   :  { %v9369_v19 = vpop.f32.mrf.mxu0 }
 0x9c3   :  { %v11031_v61 = vpop.f32.mrf.mxu0 }
 0x9c5   :  { %v9391_v62 = vpop.f32.mrf.mxu0 }
 0xa32   :  { %v5916_v63 = vpop.f32.mrf.mxu1 }
 0xa33   :  { %v5917_v21 = vadd.f32 %v9632_v17, %v5916_v63 }
 0xa34   :  { %v9396_v0 = vpop.f32.mrf.mxu1 }
 0xa35   :  { %v6452_v1 = vsel %vm1899_vm2, %v5917_v21, -inf }
 0xa36   :  { %6453 = vmax.xlane.f32.xlu0 %v6452_v1 }
 0xa3c   :  { %v6068_v3 = vpop.f32.mrf.mxu0 }
 0xa3d   :  { %v6069_v5 = vadd.f32 %v9633_v4, %v6068_v3 }
 0xa3e   :  { %v9406_v6 = vpop.f32.mrf.mxu0 }
 0xa3f   :  { %v6458_v7 = vsel %vm1899_vm2, %v6069_v5, -inf }
 0xa40   :  { %6459 = vmax.xlane.f32.xlu0 %v6458_v7 }
 0xa45   :  { %v5992_v11 = vpop.f32.mrf.mxu1 }
 0xa46   :  { %v5993_v15 = vadd.f32 %v9634_v12, %v5992_v11  ;;  %v6220_v16 = vpop.f32.mrf.mxu0 }
 0xa47   :  { %v6221_v20 = vadd.f32 %v9635_v18, %v6220_v16  ;;  %v9401_v22 = vpop.f32.mrf.mxu1 }
 0xa48   :  { %v9416_v23 = vpop.f32.mrf.mxu0  ;;  %v6455_v26 = vsel %vm1899_vm2, %v5993_v15, -inf }
 0xa49   :  { %6456 = vmax.xlane.f32.xlu1 %v6455_v26  ;;  %v6464_v29 = vsel %vm1899_vm2, %v6221_v20, -inf }
 0xa4a   :  { %6465 = vmax.xlane.f32.xlu0 %v6464_v29 }
 0xa4f   :  { %v6144_v30 = vpop.f32.mrf.mxu1 }
 0xa50   :  { %v6145_v32 = vadd.f32 %v9636_v31, %v6144_v30  ;;  %v6372_v33 = vpop.f32.mrf.mxu0 }
 0xa51   :  { %v6373_v9 = vadd.f32 %v9637_v35, %v6372_v33  ;;  %v9411_v36 = vpop.f32.mrf.mxu1 }
 0xa52   :  { %v9426_v45 = vpop.f32.mrf.mxu0  ;;  %v6461_v37 = vsel %vm1899_vm2, %v6145_v32, -inf }
 0xa53   :  { %6462 = vmax.xlane.f32.xlu1 %v6461_v37  ;;  %v6470_v38 = vsel %vm1899_vm2, %v6373_v9, -inf }
 0xa54   :  { %6471 = vmax.xlane.f32.xlu0 %v6470_v38 }
 0xa59   :  { %v6296_v39 = vpop.f32.mrf.mxu1 }
 0xa5a   :  { %v6297_v42 = vadd.f32 %v9638_v40, %v6296_v39 }
 0xa5b   :  { %v9421_v43 = vpop.f32.mrf.mxu1 }
 0xa5c   :  { %v6467_v47 = vsel %vm1899_vm2, %v6297_v42, -inf }
 0xa5d   :  { %6468 = vmax.xlane.f32.xlu1 %v6467_v47 }
 0xa63   :  { %v6448_v48 = vpop.f32.mrf.mxu1 }
 0xa64   :  { %v6449_v50 = vadd.f32 %v9639_v49, %v6448_v48 }
 0xa65   :  { %v9431_v10 = vpop.f32.mrf.mxu1 }
 0xa66   :  { %v6473_v53 = vsel %vm1899_vm2, %v6449_v50, -inf }
 0xa67   :  { %6474 = vmax.xlane.f32.xlu1 %v6473_v53 }
 0xabf   :  { %v6454_v8 = vpop.xlane.xlu0 %6453 }
 0xac0   :  { %v6476_v54 = vsub.f32 %v5917_v21, %v6454_v8 }
 0xac2   :  { %v6484_v56 = vmul.f32 1.442695, %v6476_v54 }
 0xac4   :  { %9590 = vpow2.f32 %v6484_v56 }
 0xac9   :  { %v6460_v57 = vpop.xlane.xlu0 %6459 }
 0xaca   :  { %v6478_v58 = vsub.f32 %v6069_v5, %v6460_v57 }
 0xacc   :  { %v6488_v59 = vmul.f32 1.442695, %v6478_v58 }
 0xace   :  { %9592 = vpow2.f32 %v6488_v59 }
 0xad1   :  { %v9591_v19 = vpop.eup %9590 }
 0xad2   :  { %v6457_v62 = vpop.xlane.xlu1 %6456  ;;  %v6500_v63 = vsel %vm1899_vm2, %v9591_v19, 0.0 }
 0xad3   :  { %v6477_v17 = vsub.f32 %v5993_v15, %v6457_v62  ;;  %v6466_v0 = vpop.xlane.xlu0 %6465  ;;  %6501 = vadd.xlane.f32.xlu0 %v6500_v63 }
 0xad4   :  { %v6480_v1 = vsub.f32 %v6221_v20, %v6466_v0 }
 0xad5   :  { %v6486_v3 = vmul.f32 1.442695, %v6477_v17 }
 0xad6   :  { %v6492_v4 = vmul.f32 1.442695, %v6480_v1  ;;  %v8262_v1 = vld [vmem:[%s11255_s5 + $0x40] sm:$0xff] }
 0xad7   :  { %9594 = vpow2.f32 %v6486_v3  ;;  %v8264_v3 = vld [vmem:[%s11255_s5 + $0x50] sm:$0xff] }
 0xad8   :  { %9596 = vpow2.f32 %v6492_v4 }
 0xadb   :  { %v9593_v6 = vpop.eup %9592 }
 0xadc   :  { %v6463_v21 = vpop.xlane.xlu1 %6462  ;;  %v6506_v7 = vsel %vm1899_vm2, %v9593_v6, 0.0 }
 0xadd   :  { %v6479_v11 = vsub.f32 %v6145_v32, %v6463_v21  ;;  %v6472_v5 = vpop.xlane.xlu0 %6471  ;;  %6507 = vadd.xlane.f32.xlu0 %v6506_v7  ;;  %v8266_v21 = vld [vmem:[%s11255_s5 + $0x60] sm:$0xff] }
 0xade   :  { %v6482_v12 = vsub.f32 %v6373_v9, %v6472_v5  ;;  %v8265_v5 = vld [vmem:[%s11255_s5 + $0x58] sm:$0xff] }
 0xadf   :  { %v6490_v16 = vmul.f32 1.442695, %v6479_v11 }
 0xae0   :  { %v6496_v18 = vmul.f32 1.442695, %v6482_v12 }
 0xae1   :  { %9598 = vpow2.f32 %v6490_v16  ;;  %v8268_v16 = vld [vmem:[%s11255_s5 + $0x70] sm:$0xff] }
 0xae2   :  { %9600 = vpow2.f32 %v6496_v18 }
 0xae4   :  { %v9595_v15 = vpop.eup %9594 }
 0xae5   :  { %v9597_v22 = vpop.eup %9596  ;;  %v6503_v20 = vsel %vm1899_vm2, %v9595_v15, 0.0 }
 0xae6   :  { %v6469_v23 = vpop.xlane.xlu1 %6468  ;;  %6504 = vadd.xlane.f32.xlu1 %v6503_v20  ;;  %v6512_v26 = vsel %vm1899_vm2, %v9597_v22, 0.0  ;;  %v8267_v20 = vld [vmem:[%s11255_s5 + $0x68] sm:$0xff] }
 0xae7   :  { %v6481_v29 = vsub.f32 %v6297_v42, %v6469_v23  ;;  %6513 = vadd.xlane.f32.xlu0 %v6512_v26 }
 0xae9   :  { %v6494_v30 = vmul.f32 1.442695, %v6481_v29 }
 0xaeb   :  { %9602 = vpow2.f32 %v6494_v30 }
 0xaee   :  { %v9599_v31 = vpop.eup %9598 }
 0xaef   :  { %v9601_v32 = vpop.eup %9600  ;;  %v6509_v33 = vsel %vm1899_vm2, %v9599_v31, 0.0 }
 0xaf0   :  { %v6475_v35 = vpop.xlane.xlu1 %6474  ;;  %6510 = vadd.xlane.f32.xlu1 %v6509_v33  ;;  %v6518_v9 = vsel %vm1899_vm2, %v9601_v32, 0.0 }
 0xaf1   :  { %v6483_v36 = vsub.f32 %v6449_v50, %v6475_v35  ;;  %6519 = vadd.xlane.f32.xlu0 %v6518_v9 }
 0xaf3   :  { %v6498_v45 = vmul.f32 1.442695, %v6483_v36 }
 0xaf5   :  { %9604 = vpow2.f32 %v6498_v45 }
 0xaf8   :  { %v9603_v37 = vpop.eup %9602 }
 0xaf9   :  { %v6515_v38 = vsel %vm1899_vm2, %v9603_v37, 0.0 }
 0xafa   :  { %6516 = vadd.xlane.f32.xlu1 %v6515_v38 }
 0xb02   :  { %v9605_v39 = vpop.eup %9604 }
 0xb03   :  { %v6521_v40 = vsel %vm1899_vm2, %v9605_v39, 0.0 }
 0xb04   :  { %6522 = vadd.xlane.f32.xlu1 %v6521_v40 }
 0xb5c   :  { %v6502_v42 = vpop.xlane.xlu0 %6501 }
 0xb5d   :  { %9606 = vrcp.f32 %v6502_v42 }
 0xb66   :  { %v6508_v43 = vpop.xlane.xlu0 %6507 }
 0xb67   :  { %9608 = vrcp.f32 %v6508_v43 }
 0xb6a   :  { %v9607_v47 = vpop.eup %9606 }
 0xb6b   :  { %v6525_v48 = vmul.f32 %v9607_v47, %v9591_v19  ;;  %v11162_v47 = vld [vmem:[%s11259_s9 + $0x8] sm:$0x3f]  ;;  %s8089_s9 = sshll.u32 %s9669_s11, 4  ;;  %s8090_s9 = int_to_ptr.vmem [resolvable:$true] %s8089_s9 }
 0xb6c   :  { %s9640_s12 = scalar_lea.vmem %s8090_s9, 64  ;;  %p9645_p1 = scmp.lt.s32.totalorder %s8090_s9, %s8090_s9 }
 0xb6d   :  { %9435 = vmatmul.mubr.msk.f32.vlgmr.msra.gmra.mxu0 %vm1899_vm2, %v6525_v48  ;;  %p9641_p0 = scmp.ne.s32.totalorder %s8090_s9, %s9640_s12  ;;  %p9646_p2 = scmp.lt.s32.totalorder %s9640_s12, %s9640_s12 }
 0xb6e   :  { %9443 = vmatpush3.msra.mxu0 %v11015_v52  ;;  %9444 = vmatprep.mubr.msk.f32.mxu0 %vm9663_vm1, %v9662_v2 }
 0xb6f   :  { %v6505_v49 = vpop.xlane.xlu1 %6504  ;;  %9452 = vmatprep.subr.mxu0 %v9662_v2  ;;  %p9647_p3 = por %p9646_p2, %p9645_p1 }
 0xb70   :  { %9610 = vrcp.f32 %v6505_v49  ;;  %v6514_v50 = vpop.xlane.xlu0 %6513 }
 0xb71   :  { %9612 = vrcp.f32 %v6514_v50  ;;  %p9648_p4 = pnand %p9647_p3, %p9641_p0 }
 0xb74   :  { %v9609_v10 = vpop.eup %9608 }
 0xb75   :  { %v6529_v53 = vmul.f32 %v9609_v10, %v9593_v6  ;;  %v7717_v10 = vrot.slane %v11162_v47, %v3772_v44 }
 0xb77   :  { %9445 = vmatmul.mubr.msk.f32.vlgmr.msra.gmra.mxu0 %vm1899_vm2, %v6529_v53 }
 0xb78   :  { %9453 = vmatpush3.msra.mxu0 %v11022_v55  ;;  %9454 = vmatprep.mubr.msk.f32.mxu0 %vm9663_vm1, %v9662_v2 }
 0xb79   :  { %v6511_v8 = vpop.xlane.xlu1 %6510  ;;  %9462 = vmatprep.subr.mxu0 %v9662_v2 }
 0xb7a   :  { %9614 = vrcp.f32 %v6511_v8  ;;  %v6520_v52 = vpop.xlane.xlu0 %6519 }
 0xb7b   :  { %9616 = vrcp.f32 %v6520_v52 }
 0xb7d   :  { %v9611_v54 = vpop.eup %9610 }
 0xb7e   :  { %v9613_v56 = vpop.eup %9612  ;;  %v6527_v57 = vmul.f32 %v9611_v54, %v9595_v15 }
 0xb7f   :  { %v6533_v58 = vmul.f32 %v9613_v56, %v9597_v22 }
 0xb80   :  { %9440 = vmatmul.mubr.msk.f32.vlgmr.msra.gmra.mxu1 %vm1899_vm2, %v6527_v57 }
 0xb81   :  { %9448 = vmatpush3.msra.mxu1 %v11025_v13  ;;  %9455 = vmatmul.mubr.msk.f32.vlgmr.msra.gmra.mxu0 %vm1899_vm2, %v6533_v58 }
 0xb82   :  { %9463 = vmatpush3.msra.mxu0 %v11027_v14  ;;  %9449 = vmatprep.mubr.msk.f32.mxu1 %vm9663_vm1, %v9662_v2 }
 0xb83   :  { %v6517_v55 = vpop.xlane.xlu1 %6516  ;;  %9457 = vmatprep.subr.mxu1 %v9662_v2  ;;  %9464 = vmatprep.mubr.msk.f32.mxu0 %vm9663_vm1, %v9662_v2 }
 0xb84   :  { %9618 = vrcp.f32 %v6517_v55  ;;  %9472 = vmatprep.subr.mxu0 %v9662_v2 }
 0xb87   :  { %v9615_v59 = vpop.eup %9614 }
 0xb88   :  { %v9617_v19 = vpop.eup %9616  ;;  %v6531_v62 = vmul.f32 %v9615_v59, %v9599_v31  ;;  %v8269_v31 = vld [vmem:[%s11255_s5 + $0x78] sm:$0xff] }
 0xb89   :  { %v6537_v13 = vmul.f32 %v9617_v19, %v9601_v32 }
 0xb8a   :  { %9450 = vmatmul.mubr.msk.f32.vlgmr.msra.gmra.mxu1 %vm1899_vm2, %v6531_v62 }
 0xb8b   :  { %9458 = vmatpush3.msra.mxu1 %v11029_v60  ;;  %9465 = vmatmul.mubr.msk.f32.vlgmr.msra.gmra.mxu0 %vm1899_vm2, %v6537_v13 }
 0xb8c   :  { %9459 = vmatprep.mubr.msk.f32.mxu1 %vm9663_vm1, %v9662_v2  ;;  %9467 = vmatprep.subr.mxu1 %v9662_v2 }
 0xb8d   :  { %v6523_v14 = vpop.xlane.xlu1 %6522  ;;  %9474 = vmatprep.mubr.msk.f32.mxu0 %vm9663_vm1, %v9662_v2  ;;  %9473 = vmatpush3.msra.mxu0 %v8262_v1 }
 0xb8e   :  { %9620 = vrcp.f32 %v6523_v14  ;;  %9482 = vmatprep.subr.mxu0 %v9662_v2 }
 0xb91   :  { %v9619_v63 = vpop.eup %9618 }
 0xb92   :  { %v6535_v17 = vmul.f32 %v9619_v63, %v9603_v37 }
 0xb94   :  { %9460 = vmatmul.mubr.msk.f32.vlgmr.msra.gmra.mxu1 %vm1899_vm2, %v6535_v17 }
 0xb95   :  { %9468 = vmatpush3.msra.mxu1 %v11031_v61  ;;  %9469 = vmatprep.mubr.msk.f32.mxu1 %vm9663_vm1, %v9662_v2  ;;  %v8263_v61 = vld [vmem:[%s11255_s5 + $0x48] sm:$0xff]  ;;  %s9668_s5 = smov 96  }
 0xb96   :  { %9477 = vmatprep.subr.mxu1 %v9662_v2 }
 0xb9b   :  { %v9621_v60 = vpop.eup %9620 }
 0xb9c   :  { %v6539_v0 = vmul.f32 %v9621_v60, %v9605_v39 }
 0xb9e   :  { %9470 = vmatmul.mubr.msk.f32.vlgmr.msra.gmra.mxu1 %vm1899_vm2, %v6539_v0 }
 0xb9f   :  { %9479 = vmatprep.mubr.msk.f32.mxu1 %vm9663_vm1, %v9662_v2  ;;  %9478 = vmatpush3.msra.mxu1 %v8263_v61 }
 0xba0   :  { %9487 = vmatprep.subr.mxu1 %v9662_v2 }
 0xc2d   :  { %v6609_v4 = vpop.f32.mrf.mxu0 }
 0xc2e   :  { %9475 = vmatmul.mubr.msk.f32.vlgmr.msra.gmra.mxu0 %vm1899_vm2, %v6609_v4 }
 0xc2f   :  { %v9436_v6 = vpop.f32.mrf.mxu0  ;;  %9483 = vmatpush3.msra.mxu0 %v8264_v3  ;;  %9484 = vmatprep.mubr.msk.f32.mxu0 %vm9663_vm1, %v9662_v2 }
 0xc30   :  { %9492 = vmatprep.subr.mxu0 %v9662_v2 }
 0xc37   :  { %v6755_v7 = vpop.f32.mrf.mxu0 }
 0xc38   :  { %9485 = vmatmul.mubr.msk.f32.vlgmr.msra.gmra.mxu0 %vm1899_vm2, %v6755_v7 }
 0xc39   :  { %v9446_v11 = vpop.f32.mrf.mxu0  ;;  %9493 = vmatpush3.msra.mxu0 %v8266_v21  ;;  %9494 = vmatprep.mubr.msk.f32.mxu0 %vm9663_vm1, %v9662_v2 }
 0xc3a   :  { %9502 = vmatprep.subr.mxu0 %v9662_v2 }
 0xc40   :  { %v6682_v12 = vpop.f32.mrf.mxu1 }
 0xc41   :  { %v6901_v18 = vpop.f32.mrf.mxu0  ;;  %9480 = vmatmul.mubr.msk.f32.vlgmr.msra.gmra.mxu1 %vm1899_vm2, %v6682_v12  ;;  %v8271_v12 = vld [vmem:[%s11256_s6 + $0x28] sm:$0xff] }
 0xc42   :  { %9495 = vmatmul.mubr.msk.f32.vlgmr.msra.gmra.mxu0 %vm1899_vm2, %v6901_v18  ;;  %v9441_v15 = vpop.f32.mrf.mxu1  ;;  %9488 = vmatpush3.msra.mxu1 %v8265_v5  ;;  %v8272_v5 = vld [vmem:[%s11256_s6 + $0x30] sm:$0xff]  ;;  %v8281_v18 = vld [vmem:[%s11257_s7 + $0x78] sm:$0xff] }
 0xc43   :  { %v9456_v22 = vpop.f32.mrf.mxu0  ;;  %9489 = vmatprep.mubr.msk.f32.mxu1 %vm9663_vm1, %v9662_v2  ;;  %9503 = vmatpush3.msra.mxu0 %v8268_v16  ;;  %v8270_v16 = vld [vmem:[%s11256_s6 + $0x20] sm:$0xff]  ;;  %v8280_v15 = vld [vmem:[%s11257_s7 + $0x70] sm:$0xff] }
 0xc44   :  { %9504 = vmatprep.mubr.msk.f32.mxu0 %vm9663_vm1, %v9662_v2  ;;  %9497 = vmatprep.subr.mxu1 %v9662_v2  ;;  %v8279_v22 = vld [vmem:[%s11257_s7 + $0x68] sm:$0xff] }
 0xc4a   :  { %v6828_v23 = vpop.f32.mrf.mxu1 }
 0xc4b   :  { %v7047_v26 = vpop.f32.mrf.mxu0  ;;  %9490 = vmatmul.mubr.msk.f32.vlgmr.msra.gmra.mxu1 %vm1899_vm2, %v6828_v23 }
 0xc4c   :  { %9505 = vmatmul.mubr.msk.f32.vlgmr.msra.gmra.mxu0 %vm1899_vm2, %v7047_v26  ;;  %v9451_v29 = vpop.f32.mrf.mxu1  ;;  %9498 = vmatpush3.msra.mxu1 %v8267_v20  ;;  %v8278_v20 = vld [vmem:[%s11257_s7 + $0x60] sm:$0xff] }
 0xc4d   :  { %v9466_v30 = vpop.f32.mrf.mxu0  ;;  %9499 = vmatprep.mubr.msk.f32.mxu1 %vm9663_vm1, %v9662_v2  ;;  %9507 = vmatprep.subr.mxu1 %v9662_v2 }
 0xc4e   :  { %v7751_v30 = vrot.slane %v11162_v47, %v3807_v27  ;;  %v8277_v27 = vld [vmem:[%s11257_s7 + $0x58] sm:$0xff] }
 0xc54   :  { %v6974_v32 = vpop.f32.mrf.mxu1 }
 0xc55   :  { %9500 = vmatmul.mubr.msk.f32.vlgmr.msra.gmra.mxu1 %vm1899_vm2, %v6974_v32 }
 0xc56   :  { %v9461_v33 = vpop.f32.mrf.mxu1  ;;  %9508 = vmatpush3.msra.mxu1 %v8269_v31  ;;  %9509 = vmatprep.mubr.msk.f32.mxu1 %vm9663_vm1, %v9662_v2 }
 0xc57   :  { %9523 = vmatprep.subr.mxu1 %v8281_v18 }
 0xc5e   :  { %v7120_v35 = vpop.f32.mrf.mxu1 }
 0xc5f   :  { %9510 = vmatmul.mubr.msk.f32.vlgmr.msra.gmra.mxu1 %vm1899_vm2, %v7120_v35  ;;  %v7757_v35 = vrot.slane %v11162_v47, %v3813_v28  ;;  %v8276_v28 = vld [vmem:[%s11257_s7 + $0x50] sm:$0xff] }
 0xc60   :  { %v9471_v9 = vpop.f32.mrf.mxu1  ;;  %9524 = vmatpush3.msra.mxu1 %v8281_v18 }
 0xc61   :  { %9525 = vmatprep.subr.mxu1 %v8280_v15 }
 0xc62   :  { %9526 = vmatpush3.msra.mxu1 %v8280_v15 }
 0xc63   :  { %9527 = vmatprep.subr.mxu1 %v8279_v22 }
 0xc64   :  { %9528 = vmatpush3.msra.mxu1 %v8279_v22  ;;  %v7971_v22 = vrot.slane %v11162_v47, %v4028_v25 }
 0xc65   :  { %9529 = vmatprep.subr.mxu1 %v8278_v20 }
 0xc66   :  { %9530 = vmatpush3.msra.mxu1 %v8278_v20 }
 0xc67   :  { %9531 = vmatprep.subr.mxu1 %v8277_v27 }
 0xc68   :  { %9532 = vmatpush3.msra.mxu1 %v8277_v27 }
 0xc69   :  { %9533 = vmatprep.subr.mxu1 %v8276_v28 }
 0xc6a   :  { %9534 = vmatpush3.msra.mxu1 %v8276_v28 }
 0xcee   :  { %v7193_v36 = vpop.f32.mrf.mxu0 }
 0xcf0   :  { %v9476_v45 = vpop.f32.mrf.mxu0 }
 0xcf8   :  { %v7339_v37 = vpop.f32.mrf.mxu0 }
 0xcf9   :  { %v7708_v48 = vadd.f32 %v7339_v37, %v7193_v36 }
 0xcfa   :  { %v9486_v38 = vpop.f32.mrf.mxu0 }
 0xd01   :  { %v7266_v39 = vpop.f32.mrf.mxu1 }
 0xd02   :  { %v7485_v40 = vpop.f32.mrf.mxu0 }
 0xd03   :  { %v9481_v42 = vpop.f32.mrf.mxu1  ;;  %v7710_v49 = vadd.f32 %v7708_v48, %v7485_v40  ;;  %v8274_v48 = vld [vmem:[%s11257_s7 + $0x40] sm:$0xff] }
 0xd04   :  { %v9496_v43 = vpop.f32.mrf.mxu0 }
 0xd05   :  { %v8275_v43 = vld [vmem:[%s11257_s7 + $0x48] sm:$0xff]  ;;  %s9666_s7 = smov 64  }
 0xd06   :  { %9535 = vmatprep.subr.mxu1 %v8275_v43 }
 0xd07   :  { %9536 = vmatpush3.msra.mxu1 %v8275_v43 }
 0xd08   :  { %9537 = vmatprep.subr.mxu1 %v8274_v48 }
 0xd09   :  { %9538 = vmatpush3.msra.mxu1 %v8274_v48 }
 0xd0b   :  { %v7412_v50 = vpop.f32.mrf.mxu1 }
 0xd0c   :  { %v7631_v53 = vpop.f32.mrf.mxu0  ;;  %v7709_v19 = vadd.f32 %v7412_v50, %v7266_v39 }
 0xd0d   :  { %v7712_v8 = vadd.f32 %v7710_v49, %v7631_v53  ;;  %v9491_v52 = vpop.f32.mrf.mxu1  ;;  %v8340_v49 = vld [vmem:[%s11258_s8 + $0x1] ss:$0 sm:$0xff]  ;;  %s9667_s8 = smov 32  }
 0xd0e   :  { %v9506_v54 = vpop.f32.mrf.mxu0 }
 0xd0f   :  { %v7718_v56 = vadd.f32 %v7717_v10, %v7712_v8 }
 0xd11   :  { %v7720_v57 = vadd.f32 %v7718_v56, %v10527_v34  ;;  %v7852_v56 = vrot.slane %v11162_v47, %v3908_v51 }
 0xd13   :  { %v7722_v58 = vsel %vm164_vm0, %v7720_v57, 0.0 }
 0xd14   :  { %7723 = vadd.xlane.f32.xlu0 %v7722_v58 }
 0xd15   :  { %v7558_v55 = vpop.f32.mrf.mxu1 }
 0xd16   :  { %v7711_v62 = vadd.f32 %v7709_v19, %v7558_v55 }
 0xd17   :  { %v9501_v59 = vpop.f32.mrf.mxu1 }
 0xd1f   :  { %v7704_v13 = vpop.f32.mrf.mxu1 }
 0xd20   :  { %v7713_v14 = vadd.f32 %v7711_v62, %v7704_v13 }
 0xd21   :  { %v9511_v63 = vpop.f32.mrf.mxu1 }
 0xd22   :  { %v7719_v17 = vadd.f32 %v7717_v10, %v7713_v14 }
 0xd24   :  { %v7721_v44 = vadd.f32 %v7719_v17, %v10563_v46  ;;  %v8273_v46 = vld [vmem:[%s11256_s6 + $0x38] sm:$0xff] }
 0xd25   :  { %9512 = vmatprep.subr.mxu0 %v8273_v46 }
 0xd26   :  { %v7725_v60 = vsel %vm164_vm0, %v7721_v44, 0.0  ;;  %9513 = vmatpush3.msra.mxu0 %v8273_v46 }
 0xd27   :  { %7726 = vadd.xlane.f32.xlu1 %v7725_v60  ;;  %9514 = vmatprep.subr.mxu0 %v8272_v5 }
 0xd28   :  { %9515 = vmatpush3.msra.mxu0 %v8272_v5  ;;  %v9664_v5 = vmov 1983009808  }
 0xd29   :  { %9516 = vmatprep.subr.mxu0 %v8271_v12 }
 0xd2a   :  { %9517 = vmatpush3.msra.mxu0 %v8271_v12  ;;  %v7976_v12 = vunpack.c.l.s4 %v9664_v5 }
 0xd2b   :  { %9518 = vmatprep.subr.mxu0 %v8270_v16 }
 0xd2c   :  { %9519 = vmatpush3.msra.mxu0 %v8270_v16  ;;  %v7965_v16 = vrot.slane %v11162_v47, %v4022_v24  ;;  %v7977_v20 = vunpack.c.0.s8 %v7976_v12 }
 0xd9d   :  { %v7724_v0 = vpop.xlane.xlu0 %7723 }
 0xd9e   :  { %v7728_v1 = vmul.f32 0.03125, %v7724_v0 }
 0xda0   :  { %v7730_v61 = vsub.f32 %v7720_v57, %v7728_v1 }
 0xda2   :  { %v7732_v34 = vmul.f32 %v7730_v61, %v7730_v61 }
 0xda4   :  { %v7734_v3 = vsel %vm164_vm0, %v7732_v34, 0.0 }
 0xda5   :  { %7735 = vadd.xlane.f32.xlu0 %v7734_v3 }
 0xdb0   :  { %v7727_v4 = vpop.xlane.xlu1 %7726 }
 0xdb1   :  { %v7729_v6 = vmul.f32 0.03125, %v7727_v4 }
 0xdb3   :  { %v7731_v21 = vsub.f32 %v7721_v44, %v7729_v6 }
 0xdb5   :  { %v7733_v7 = vmul.f32 %v7731_v21, %v7731_v21 }
 0xdb7   :  { %v7737_v11 = vsel %vm164_vm0, %v7733_v7, 0.0 }
 0xdb8   :  { %7738 = vadd.xlane.f32.xlu1 %v7737_v11 }
 0xe2e   :  { %v7736_v23 = vpop.xlane.xlu0 %7735 }
 0xe2f   :  { %v7740_v26 = vmul.f32 0.03125, %v7736_v23  ;;  %v9665_v23 = vmov 1934713408  }
 0xe31   :  { %v7742_v29 = vadd.f32 1e-06, %v7740_v26  ;;  %v8007_v26 = vunpack.c.l.s4 %v9665_v23 }
 0xe33   :  { %9622 = vrsqrt.f32 %v7742_v29 }
 0xe40   :  { %v9623_v31 = vpop.eup %9622 }
 0xe41   :  { %v7739_v32 = vpop.xlane.xlu1 %7738  ;;  %v7746_v33 = vmul.f32 %v9623_v31, %v7730_v61 }
 0xe42   :  { %v7741_v9 = vmul.f32 0.03125, %v7739_v32 }
 0xe43   :  { %v7752_v36 = vmul.f32 %v7751_v30, %v7746_v33 }
 0xe44   :  { %v7743_v45 = vadd.f32 1e-06, %v7741_v9  ;;  %v8008_v9 = vunpack.c.0.s8 %v8007_v26 }
 0xe45   :  { %v7758_v37 = vadd.f32 %v7757_v35, %v7752_v36 }
 0xe46   :  { %9624 = vrsqrt.f32 %v7743_v45 }
 0xe47   :  { %9520 = vmatprep.mubr.msk.f32.mxu0 %vm164_vm0, %v7758_v37 }
 0xe53   :  { %v9625_v38 = vpop.eup %9624 }
 0xe54   :  { %v7747_v39 = vmul.f32 %v9625_v38, %v7731_v21  ;;  %v8011_v38 = vsub.s32 %v8008_v9, %v10401_v41 }
 0xe56   :  { %v7753_v40 = vmul.f32 %v7751_v30, %v7747_v39 }
 0xe58   :  { %v7759_v42 = vadd.f32 %v7757_v35, %v7753_v40  ;;  %v7980_v35 = vsub.s32 %v7977_v20, %v10401_v41 }
 0xe5a   :  { %9521 = vmatmul.mubr.msk.f32.vlgmr.msra.gmra.mxu0 %vm164_vm0, %v7759_v42 }
 0xf1a   :  { %v9522_v50 = vpop.f32.mrf.mxu0 }
 0xf1b   :  { %v7844_v10 = vadd.f32 %v9522_v50, %v8340_v49 }
 0xf1c   :  { %v7838_v53 = vpop.f32.mrf.mxu0 }
 0xf1d   :  { %v7839_v8 = vadd.f32 %v8340_v49, %v7838_v53  ;;  %v7848_v54 = vmax.f32 %v7844_v10, 0.0 }
 0xf1f   :  { %v7847_v52 = vmax.f32 %v7839_v8, 0.0 }
 0xf21   :  { %9539 = vmatprep.mubr.msk.f32.mxu1 %vm3910_vm3, %v7847_v52 }
 0xf22   :  { %9540 = vmatmul.mubr.msk.f32.vlgmr.msra.gmra.mxu1 %vm3910_vm3, %v7848_v54 }
 0xfe2   :  { %v9541_v57 = vpop.f32.mrf.mxu1 }
 0xfe3   :  { %v7931_v58 = vadd.f32 %v9541_v57, %v7852_v56 }
 0xfe4   :  { %v7925_v55 = vpop.f32.mrf.mxu1 }
 0xfe5   :  { %v7926_v59 = vadd.f32 %v7925_v55, %v7852_v56  ;;  %v7935_v19 = vadd.f32 %v7931_v58, %v7759_v42 }
 0xfe7   :  { %v7939_v62 = vsel %vm164_vm0, %v7935_v19, 0.0  ;;  %v7934_v13 = vadd.f32 %v7926_v59, %v7758_v37 }
 0xfe8   :  { %7940 = vadd.xlane.f32.xlu1 %v7939_v62 }
 0xfe9   :  { %v7936_v14 = vsel %vm164_vm0, %v7934_v13, 0.0 }
 0xfea   :  { %7937 = vadd.xlane.f32.xlu0 %v7936_v14 }
0x1071   :  { %v7941_v63 = vpop.xlane.xlu1 %7940 }
0x1072   :  { %v7943_v17 = vmul.f32 0.03125, %v7941_v63 }
0x1073   :  { %v7938_v44 = vpop.xlane.xlu0 %7937 }
0x1074   :  { %v7945_v60 = vsub.f32 %v7935_v19, %v7943_v17  ;;  %v7942_v0 = vmul.f32 0.03125, %v7938_v44 }
0x1076   :  { %v7944_v1 = vsub.f32 %v7934_v13, %v7942_v0  ;;  %v7947_v61 = vmul.f32 %v7945_v60, %v7945_v60 }
0x1078   :  { %v7951_v51 = vsel %vm164_vm0, %v7947_v61, 0.0  ;;  %v7946_v34 = vmul.f32 %v7944_v1, %v7944_v1 }
0x1079   :  { %7952 = vadd.xlane.f32.xlu1 %v7951_v51 }
0x107a   :  { %v7948_v3 = vsel %vm164_vm0, %v7946_v34, 0.0 }
0x107b   :  { %7949 = vadd.xlane.f32.xlu0 %v7948_v3 }
0x1102   :  { %v7953_v4 = vpop.xlane.xlu1 %7952 }
0x1103   :  { %v7955_v6 = vmul.f32 0.03125, %v7953_v4 }
0x1104   :  { %v7950_v21 = vpop.xlane.xlu0 %7949 }
0x1105   :  { %v7957_v7 = vadd.f32 1e-06, %v7955_v6  ;;  %v7954_v11 = vmul.f32 0.03125, %v7950_v21 }
0x1107   :  { %9626 = vrsqrt.f32 %v7957_v7  ;;  %v7956_v46 = vadd.f32 1e-06, %v7954_v11 }
0x1109   :  { %9628 = vrsqrt.f32 %v7956_v46 }
0x1114   :  { %v9627_v18 = vpop.eup %9626 }
0x1115   :  { %v7961_v15 = vmul.f32 %v9627_v18, %v7945_v60 }
0x1116   :  { %v9629_v29 = vpop.eup %9628 }
0x1117   :  { %v7960_v30 = vmul.f32 %v9629_v29, %v7944_v1  ;;  %v7967_v31 = vmul.f32 %v7965_v16, %v7961_v15 }
0x1119   :  { %v7966_v32 = vmul.f32 %v7965_v16, %v7960_v30  ;;  %v7973_v33 = vadd.f32 %v7971_v22, %v7967_v31 }
0x111b   :  { %v7972_v36 = vadd.f32 %v7971_v22, %v7966_v32  ;;  %v7989_v24 = vcombine.high %v7973_v33, %v9662_v2  ;;  %v7996_v37 = vrot.slane %v7973_v33, %v7980_v35 }
0x111d   :  { %v7981_v45 = vrot.slane %v7972_v36, %v7980_v35  ;;  %v7974_v25 = vcombine.high %v7972_v36, %v9662_v2  ;;  %v8003_v42 = vrot.slane %v7989_v24, %v7980_v35 }
0x111f   :  { %v8005_v47 = vcombine.high %v7981_v45, %v7996_v37  ;;  %v8004_v39 = vcombine.low %v7981_v45, %v7996_v37  ;;  %v7988_v40 = vrot.slane %v7974_v25, %v7980_v35 }
0x1121   :  { %v8019_v27 = vrot.slane %v8005_v47, %v8011_v38  ;;  %v8012_v28 = vrot.slane %v8004_v39, %v8011_v38  ;;  %v8021_v43 = vcombine.high %v7988_v40, %v8003_v42  ;;  %v8020_v48 = vcombine.low %v7988_v40, %v8003_v42 }
0x1123   :  { %8045 = vrot.lane.b32.xlu1 %v8019_v27, %s9666_s7  ;;  %v8036_v49 = vcombine.high %v8012_v28, %v9662_v2  ;;  %v8035_v50 = vrot.slane %v8021_v43, %v8011_v38  ;;  %v8028_v10 = vrot.slane %v8020_v48, %v8011_v38  ;;  %v8037_v41 = vcombine.high %v8019_v27, %v9662_v2 }
0x1125   :  { %8041 = vrot.lane.b32.xlu0 %v8036_v49, %s9667_s8  ;;  %v8038_v53 = vcombine.high %v8028_v10, %v9662_v2  ;;  %v8039_v8 = vcombine.high %v8035_v50, %v9662_v2 }
0x1127   :  { %8057 = vrot.lane.b32.xlu1 %v8035_v50, %s9666_s7 }
0x1129   :  { %8049 = vrot.lane.b32.xlu0 %v8037_v41, %s9668_s5 }
0x112b   :  { %8053 = vrot.lane.b32.xlu1 %v8038_v53, %s9667_s8 }
0x112f   :  { %8061 = vrot.lane.b32.xlu1 %v8039_v8, %s9668_s5 }
0x1195   :  { %v8046_v52 = vpop.permute.xlu1 %8045 }
0x1197   :  { %v8042_v54 = vpop.permute.xlu0 %8041 }
0x1198   :  { %v8064_v58 = vsel %vm164_vm0, %v8012_v28, %v8042_v54 }
0x1199   :  { %v8058_v56 = vpop.permute.xlu1 %8057  ;;  %v8065_v19 = vsel %vm3910_vm3, %v8064_v58, %v8046_v52 }
0x119b   :  { %v8050_v59 = vpop.permute.xlu0 %8049 }
0x119c   :  { %v8067_v14 = vsel %vm8066_vm4, %v8065_v19, %v8050_v59 }
0x119d   :  { %v8054_v57 = vpop.permute.xlu1 %8053 }
0x119e   :  { %v8068_v55 = vsel %vm164_vm0, %v8028_v10, %v8054_v57 }
0x119f   :  { %v8069_v62 = vsel %vm3910_vm3, %v8068_v55, %v8058_v56 }
0x11a1   :  { %v8062_v13 = vpop.permute.xlu1 %8061 }
0x11a2   :  { %v8070_v2 = vsel %vm8066_vm4, %v8069_v62, %v8062_v13 }
0x11a3   :  { %v8073_v63 = vcombine.low %v8067_v14, %v8070_v2 }
0x11a5   :  { %8345 = vst.sshfl [vmem:[#allocation2] sm:$0x33 pattern:$0x76325410] %v8073_v63 }
0x11a6   :  { %9651 = shalt.err (!%p9648_p4)
}
0x11a7   :  { %8092 = dma.vmem_to_hbm [thread:$0]  %s8090_s9, 64, %s11260_s10, [#allocation3]  }
0x11a8   :  { %9660 = dma.done.wait [#allocation3], 64  }
0x11a9   :  { %9661 = vsyncadd [#allocation3], 4294967232 }
0x11aa   :  { %8096 = vsyncpa [#allocation3], 1 }

</bundles_post_ra>
